<compile_context>
chip_gen: v7x
topology: tpu7x:2x2x1
jax: 0.10.0
libtpu: 0.0.40
codegen_flags: <defaults>
</compile_context>

<pallas_src>
import functools

import jax
import jax.numpy as jnp
from jax.experimental import pallas as pl
from jax.experimental.pallas import tpu as pltpu

_LANE = 128        # vreg lane width
_BATCH_ALIGN = 16  # sublane rows per (packed) bf16 vreg


def _round_up(x, m):
    return (x + m - 1) // m * m


def _pad_gate_axis(a, h, hp):
    """Pad the trailing 4*h gate axis to 4*hp, preserving (i,f,g,o) blocks."""
    lead = a.shape[:-1]
    a4 = a.reshape(*lead, 4, h)
    a4 = jnp.pad(a4, [(0, 0)] * (a4.ndim - 1) + [(0, hp - h)])
    return a4.reshape(*lead, 4 * hp)


def bert_lstm_kernel(x_ref, w_ih_ref, w_hh_ref, b_ref, wc_ref, bc_ref, o_ref,
                     gx_ref, ys_ref, *, num_layers, time_chunk):
    """One batch tile of: multi-layer LSTM -> last timestep -> Linear.

    x_ref    : (S, Bt, Hp)   bf16  time-major BERT hidden states (batch tile)
    w_ih_ref : (L, Hp, Gp)   bf16  torch weight_ih_l{k}.T, gate order (i,f,g,o)
    w_hh_ref : (L, Hp, Gp)   bf16  torch weight_hh_l{k}.T
    b_ref    : (L, 1, Gp)    f32   bias_ih_l{k} + bias_hh_l{k} (folded on host)
    wc_ref   : (Hp, Cp)      bf16  classify.weight.T (zero padded)
    bc_ref   : (1, Cp)       f32   classify.bias     (zero padded)
    o_ref    : (Bt, Cp)      f32   logits (lane-dense, Cp multiple of 128)
    gx_ref   : (Tc, Bt, Gp)  f32   VMEM scratch: staged input projections
    ys_ref   : (S, Bt, Hp)   f32   VMEM scratch: current layer's input/output
    All Hp/Gp/Cp are multiples of 128 and Bt is a multiple of 16, so gate
    slices and stores are lane/sublane aligned.  Padding is exact (zeros).
    """
    S, Bt, Hp = ys_ref.shape
    Gp = gx_ref.shape[-1]
    mm_dtype = w_ih_ref.dtype  # bf16 matmul operands, f32 accumulation

    # Stage this batch tile's hidden states in VMEM scratch.  ys_ref always
    # holds the *current layer's input* and is overwritten in place with that
    # layer's outputs as the recurrence advances (each chunk's projection
    # reads the chunk before any timestep inside it is overwritten).
    ys_ref[...] = x_ref[...].astype(jnp.float32)

    h = None
    for layer in range(num_layers):
        bias = b_ref[layer]                               # (1, Gp) f32
        h = jnp.zeros((Bt, Hp), jnp.float32)
        c = jnp.zeros((Bt, Hp), jnp.float32)

        for s0 in range(0, S, time_chunk):
            ch = min(time_chunk, S - s0)
            # Hoisted input projection for `ch` timesteps at once: a single
            # (ch*Bt, Hp) @ (Hp, Gp) MXU matmul (bf16 in, f32 acc), staged in
            # VMEM so it does not hold ch*Bt*Gp values live in vregs.
            x_chunk = ys_ref[s0:s0 + ch].reshape(ch * Bt, Hp).astype(mm_dtype)
            gx = jnp.dot(x_chunk, w_ih_ref[layer],
                         preferred_element_type=jnp.float32) + bias
            gx_ref[0:ch] = gx.reshape(ch, Bt, Gp)

            # TODO(synk): for real sequence lengths (S >= 64) replace this
            # static unroll with lax.fori_loop(..., unroll=2..4) reading
            # gx_ref[t] dynamically; at S=8 the full unroll is fine.
            for tt in range(ch):
                gates = gx_ref[tt] + jnp.dot(
                    h.astype(mm_dtype), w_hh_ref[layer],
                    preferred_element_type=jnp.float32)     # (Bt, Gp) f32
                # Hp is a multiple of 128 -> each gate block is a whole number
                # of lane-aligned vregs (no masked sub-lane relayouts).
                i_g = jax.nn.sigmoid(gates[:, 0 * Hp:1 * Hp])
                f_g = jax.nn.sigmoid(gates[:, 1 * Hp:2 * Hp])
                g_g = jnp.tanh(gates[:, 2 * Hp:3 * Hp])
                o_g = jax.nn.sigmoid(gates[:, 3 * Hp:4 * Hp])
                c = f_g * c + i_g * g_g                      # f32 state
                h = o_g * jnp.tanh(c)
                if layer + 1 < num_layers:
                    ys_ref[s0 + tt] = h                      # next layer input

    # Top layer's final hidden state == lstm_out[:, -1, :].
    logits = jnp.dot(h.astype(mm_dtype), wc_ref[...],
                     preferred_element_type=jnp.float32) + bc_ref[...]
    o_ref[...] = logits.astype(o_ref.dtype)                  # lane-dense store


def bert_lstm_forward(hidden, w_ih, w_hh, b, wc, bc, *,
                      batch_tile=None, time_chunk=None, min_grid_steps=2):
    """hidden: (B,S,H) f32; w_ih/w_hh: (L,H,4H); b: (L,1,4H); wc: (H,C); bc: (1,C)."""
    B, S, H = hidden.shape
    L = w_ih.shape[0]
    C = wc.shape[1]

    Hp = _round_up(H, _LANE)
    Gp = 4 * Hp
    Cp = _round_up(C, _LANE)

    # Batch tiling: >= min_grid_steps grid steps (both v7x TensorCores busy),
    # each tile a multiple of 16 rows so bf16/f32 sublanes are fully used.
    if batch_tile is None:
        batch_tile = _round_up(pl.cdiv(B, min_grid_steps), _BATCH_ALIGN)
    else:
        batch_tile = _round_up(batch_tile, _BATCH_ALIGN)
    grid_b = max(min_grid_steps, pl.cdiv(B, batch_tile))
    B_pad = grid_b * batch_tile

    if time_chunk is None:
        time_chunk = min(S, 128)   # bounds gx scratch at long sequence lengths

    # ---- host-side, mathematically exact zero padding + layout prep --------
    # x: pad batch & feature, go time-major, bf16 (halves input DMA bytes).
    x = jnp.pad(hidden, ((0, B_pad - B), (0, 0), (0, Hp - H)))
    x = jnp.transpose(x, (1, 0, 2)).astype(jnp.bfloat16)            # (S,B_pad,Hp)

    # LSTM weights: pad per gate block, pad input rows, cast to bf16.
    w_ih_p = jnp.pad(_pad_gate_axis(w_ih, H, Hp),
                     ((0, 0), (0, Hp - H), (0, 0))).astype(jnp.bfloat16)
    w_hh_p = jnp.pad(_pad_gate_axis(w_hh, H, Hp),
                     ((0, 0), (0, Hp - H), (0, 0))).astype(jnp.bfloat16)
    b_p = _pad_gate_axis(b, H, Hp).astype(jnp.float32)               # (L,1,Gp)

    # Classifier: pad to lane-dense (Hp, Cp) / (1, Cp).
    wc_p = jnp.pad(wc, ((0, Hp - H), (0, Cp - C))).astype(jnp.bfloat16)
    bc_p = jnp.pad(bc, ((0, 0), (0, Cp - C))).astype(jnp.float32)

    # ---- VMEM budget sized to the actual buffers ----------------------------
    weight_bytes = (w_ih_p.size + w_hh_p.size + wc_p.size) * 2 \
                   + (b_p.size + bc_p.size) * 4
    io_bytes = 2 * (S * batch_tile * Hp) * 2 + 2 * (batch_tile * Cp) * 4
    scratch_bytes = (time_chunk * batch_tile * Gp + S * batch_tile * Hp) * 4
    vmem_bytes = int(1.5 * (weight_bytes + io_bytes + scratch_bytes))
    # Never go below the scoped default; cap below physical (re-derive for
    # v7x's 64 MiB when scaling to real BERT sizes).
    vmem_bytes = min(max(vmem_bytes, 32 << 20), 96 << 20)

    kern = functools.partial(bert_lstm_kernel, num_layers=L,
                             time_chunk=time_chunk)
    out = pl.pallas_call(
        kern,
        out_shape=jax.ShapeDtypeStruct((B_pad, Cp), jnp.float32),
        grid=(grid_b,),
        in_specs=[
            pl.BlockSpec((S, batch_tile, Hp), lambda i: (0, i, 0)),
            # Grid-invariant parameters: whole-array resident in VMEM, fetched
            # once, no per-step re-fetch / double buffering.
            pl.BlockSpec(memory_space=pltpu.MemorySpace.VMEM),   # w_ih
            pl.BlockSpec(memory_space=pltpu.MemorySpace.VMEM),   # w_hh
            pl.BlockSpec(memory_space=pltpu.MemorySpace.VMEM),   # folded bias
            pl.BlockSpec(memory_space=pltpu.MemorySpace.VMEM),   # classifier W
            pl.BlockSpec(memory_space=pltpu.MemorySpace.VMEM),   # classifier b
        ],
        out_specs=pl.BlockSpec((batch_tile, Cp), lambda i: (i, 0)),
        scratch_shapes=[
            pltpu.VMEM((time_chunk, batch_tile, Gp), jnp.float32),  # gx stage
            pltpu.VMEM((S, batch_tile, Hp), jnp.float32),           # layer io
        ],
        compiler_params=pltpu.CompilerParams(
            dimension_semantics=("parallel",),
            vmem_limit_bytes=vmem_bytes),
    )(x, w_ih_p, w_hh_p, b_p, wc_p, bc_p)

    return out[:B, :C]


def reference_forward(hidden, w_ih, w_hh, b, wc, bc, matmul_dtype=jnp.bfloat16):
    """Pure-JAX reference mirroring torch nn.LSTM (batch_first) + Linear.

    matmul_dtype=bf16 mirrors the kernel's MXU numerics exactly;
    matmul_dtype=f32 gives the torch-parity baseline.
    """
    B, S, H = hidden.shape
    L = w_ih.shape[0]
    x = hidden
    for l in range(L):
        h = jnp.zeros((B, H), jnp.float32)
        c = jnp.zeros((B, H), jnp.float32)
        gx = jnp.dot(x.reshape(B * S, H).astype(matmul_dtype),
                     w_ih[l].astype(matmul_dtype),
                     preferred_element_type=jnp.float32).reshape(B, S, 4 * H)
        gx = gx + b[l]
        outs = []
        for t in range(S):
            gates = gx[:, t, :] + jnp.dot(h.astype(matmul_dtype),
                                          w_hh[l].astype(matmul_dtype),
                                          preferred_element_type=jnp.float32)
            i_g = jax.nn.sigmoid(gates[:, 0 * H:1 * H])
            f_g = jax.nn.sigmoid(gates[:, 1 * H:2 * H])
            g_g = jnp.tanh(gates[:, 2 * H:3 * H])
            o_g = jax.nn.sigmoid(gates[:, 3 * H:4 * H])
            c = f_g * c + i_g * g_g
            h = o_g * jnp.tanh(c)
            outs.append(h)
        x = jnp.stack(outs, axis=1)
    return jnp.dot(x[:, -1, :].astype(matmul_dtype), wc.astype(matmul_dtype),
                   preferred_element_type=jnp.float32) + bc


if __name__ == "__main__":
    # Small shapes consistent with the module's forward.
    B, S, H, C = 2, 8, 32, 4          # batch, seq_len, hidden_size, num_classes
    NUM_LAYERS = 2
    VOCAB = 100

    key = jax.random.PRNGKey(0)
    (k_emb, k_tok, k_wih, k_whh, k_bih, k_bhh, k_wc, k_bc) = jax.random.split(key, 8)

    # ---- "BERT" last_hidden_state (glue):
    # TODO(synk): full BERT encoder not implemented; the last_hidden_state is
    # synthesized with a deterministic embedding lookup.
    emb_table = jax.random.normal(k_emb, (VOCAB, H), jnp.float32) * 0.1
    token_ids = jax.random.randint(k_tok, (B, S), 0, VOCAB)
    hidden = emb_table[token_ids]                        # (B, S, H)

    # ---- LSTM parameters (torch layout: weight_ih_l{k} is (4H, in), gate
    # order i,f,g,o; the kernel wants the transpose (in, 4H) and a single
    # folded bias b_ih + b_hh).
    k_init = 1.0 / (H ** 0.5)
    w_ih = jax.random.uniform(k_wih, (NUM_LAYERS, H, 4 * H), jnp.float32,
                              minval=-k_init, maxval=k_init)
    w_hh = jax.random.uniform(k_whh, (NUM_LAYERS, H, 4 * H), jnp.float32,
                              minval=-k_init, maxval=k_init)
    b_ih = jax.random.uniform(k_bih, (NUM_LAYERS, 4 * H), jnp.float32,
                              minval=-k_init, maxval=k_init)
    b_hh = jax.random.uniform(k_bhh, (NUM_LAYERS, 4 * H), jnp.float32,
                              minval=-k_init, maxval=k_init)
    b = (b_ih + b_hh).reshape(NUM_LAYERS, 1, 4 * H)

    # ---- classifier: torch Linear(H, C) weight is (C, H); kernel wants (H, C).
    wc = jnp.transpose(jax.random.uniform(k_wc, (C, H), jnp.float32,
                                          minval=-k_init, maxval=k_init))
    bc = jax.random.uniform(k_bc, (1, C), jnp.float32,
                            minval=-k_init, maxval=k_init)

    out = bert_lstm_forward(hidden, w_ih, w_hh, b, wc, bc)
    out = jax.block_until_ready(out)
    assert out.shape == (B, C)

    # Tight check against a reference using identical bf16-operand / f32-acc
    # matmul numerics.
    ref_bf16 = reference_forward(hidden, w_ih, w_hh, b, wc, bc,
                                 matmul_dtype=jnp.bfloat16)
    assert jnp.allclose(out, ref_bf16, atol=2e-3, rtol=2e-3), (out, ref_bf16)

    # Looser check against the full-f32 (torch-parity) reference.
    ref_f32 = reference_forward(hidden, w_ih, w_hh, b, wc, bc,
                                matmul_dtype=jnp.float32)
    assert jnp.allclose(out, ref_f32, atol=5e-2), (out, ref_f32)

    print("KERNEL_OK")
</pallas_src>

<mosaic_0001>
module attributes {stable_mosaic.version = 11 : i64} {
  func.func @bert_lstm_kernel(%arg0: i32, %arg1: memref<8x16x128xbf16, #tpu.memory_space<vmem>>, %arg2: memref<2x128x512xbf16, #tpu.memory_space<vmem>>, %arg3: memref<2x128x512xbf16, #tpu.memory_space<vmem>>, %arg4: memref<2x1x512xf32, #tpu.memory_space<vmem>>, %arg5: memref<128x128xbf16, #tpu.memory_space<vmem>>, %arg6: memref<1x128xf32, #tpu.memory_space<vmem>>, %arg7: memref<16x128xf32, #tpu.memory_space<vmem>>, %arg8: memref<8x16x512xf32, #tpu.memory_space<vmem>>, %arg9: memref<8x16x128xf32, #tpu.memory_space<vmem>>) attributes {dimension_semantics = [#tpu.dimension_semantics<parallel>], iteration_bounds = array<i64: 2>, scalar_prefetch = 0 : i64, scratch_operands = 2 : i64, tpu.core_type = #tpu.core_type<tc>, window_params = [{transform_indices = @transform_0, window_bounds = array<i64: 8, 16, 128>}, {pipeline_mode = #tpu.pipeline_mode<synchronous>, transform_indices = @transform_1, window_bounds = array<i64: 2, 128, 512>}, {pipeline_mode = #tpu.pipeline_mode<synchronous>, transform_indices = @transform_2, window_bounds = array<i64: 2, 128, 512>}, {pipeline_mode = #tpu.pipeline_mode<synchronous>, transform_indices = @transform_3, window_bounds = array<i64: 2, 1, 512>}, {pipeline_mode = #tpu.pipeline_mode<synchronous>, transform_indices = @transform_4, window_bounds = array<i64: 128, 128>}, {pipeline_mode = #tpu.pipeline_mode<synchronous>, transform_indices = @transform_5, window_bounds = array<i64: 1, 128>}, {transform_indices = @transform_6, window_bounds = array<i64: 16, 128>}]} {
    %c0 = arith.constant 0 : index
    %c0_0 = arith.constant 0 : index
    %c0_1 = arith.constant 0 : index
    %0 = vector.load %arg1[%c0, %c0_0, %c0_1] : memref<8x16x128xbf16, #tpu.memory_space<vmem>>, vector<8x16x128xbf16>
    %1 = arith.extf %0 : vector<8x16x128xbf16> to vector<8x16x128xf32>
    %c0_2 = arith.constant 0 : index
    %c0_3 = arith.constant 0 : index
    %c0_4 = arith.constant 0 : index
    %2 = vector.load %arg9[%c0_2, %c0_3, %c0_4] : memref<8x16x128xf32, #tpu.memory_space<vmem>>, vector<8x16x128xf32>
    tpu.vector_store %arg9[%c0_2, %c0_3, %c0_4], %1 {strides = array<i32>} : memref<8x16x128xf32, #tpu.memory_space<vmem>>, vector<8x16x128xf32>,
    %c0_5 = arith.constant 0 : index
    %c0_6 = arith.constant 0 : index
    %c0_7 = arith.constant 0 : index
    %3 = vector.load %arg4[%c0_5, %c0_6, %c0_7] : memref<2x1x512xf32, #tpu.memory_space<vmem>>, vector<1x1x512xf32>
    %4 = vector.shape_cast %3 : vector<1x1x512xf32> to vector<1x512xf32>
    %cst = arith.constant 0.000000e+00 : f32
    %5 = vector.broadcast %cst : f32 to vector<16x128xf32>
    %cst_8 = arith.constant 0.000000e+00 : f32
    %6 = vector.broadcast %cst_8 : f32 to vector<16x128xf32>
    %c0_9 = arith.constant 0 : index
    %c0_10 = arith.constant 0 : index
    %c0_11 = arith.constant 0 : index
    %7 = vector.load %arg9[%c0_9, %c0_10, %c0_11] : memref<8x16x128xf32, #tpu.memory_space<vmem>>, vector<8x16x128xf32>
    %8 = vector.shape_cast %7 : vector<8x16x128xf32> to vector<128x128xf32>
    %9 = arith.truncf %8 : vector<128x128xf32> to vector<128x128xbf16>
    %c0_12 = arith.constant 0 : index
    %c0_13 = arith.constant 0 : index
    %c0_14 = arith.constant 0 : index
    %10 = vector.load %arg2[%c0_12, %c0_13, %c0_14] : memref<2x128x512xbf16, #tpu.memory_space<vmem>>, vector<1x128x512xbf16>
    %11 = vector.shape_cast %10 : vector<1x128x512xbf16> to vector<128x512xbf16>
    %cst_15 = arith.constant dense<0.000000e+00> : vector<128x512xf32>
    %12 = tpu.matmul %9, %11, %cst_15 {dimension_numbers = #tpu.dot_dimension_numbers<[1], [0], [0], [1], [0, 0, 1, 1], [], []>} : vector<128x128xbf16>, vector<128x512xbf16>, vector<128x512xf32> -> vector<128x512xf32>
    %13 = vector.broadcast %4 : vector<1x512xf32> to vector<128x512xf32>
    %14 = arith.addf %12, %13 : vector<128x512xf32>
    %15 = vector.shape_cast %14 : vector<128x512xf32> to vector<8x16x512xf32>
    %c0_16 = arith.constant 0 : index
    %c0_17 = arith.constant 0 : index
    %c0_18 = arith.constant 0 : index
    %16 = vector.load %arg8[%c0_16, %c0_17, %c0_18] : memref<8x16x512xf32, #tpu.memory_space<vmem>>, vector<8x16x512xf32>
    tpu.vector_store %arg8[%c0_16, %c0_17, %c0_18], %15 {strides = array<i32>} : memref<8x16x512xf32, #tpu.memory_space<vmem>>, vector<8x16x512xf32>,
    %c0_19 = arith.constant 0 : index
    %c0_20 = arith.constant 0 : index
    %c0_21 = arith.constant 0 : index
    %17 = vector.load %arg8[%c0_19, %c0_20, %c0_21] : memref<8x16x512xf32, #tpu.memory_space<vmem>>, vector<1x16x512xf32>
    %18 = vector.shape_cast %17 : vector<1x16x512xf32> to vector<16x512xf32>
    %19 = arith.truncf %5 : vector<16x128xf32> to vector<16x128xbf16>
    %c0_22 = arith.constant 0 : index
    %c0_23 = arith.constant 0 : index
    %c0_24 = arith.constant 0 : index
    %20 = vector.load %arg3[%c0_22, %c0_23, %c0_24] : memref<2x128x512xbf16, #tpu.memory_space<vmem>>, vector<1x128x512xbf16>
    %21 = vector.shape_cast %20 : vector<1x128x512xbf16> to vector<128x512xbf16>
    %cst_25 = arith.constant dense<0.000000e+00> : vector<16x512xf32>
    %22 = tpu.matmul %19, %21, %cst_25 {dimension_numbers = #tpu.dot_dimension_numbers<[1], [0], [0], [1], [0, 0, 1, 1], [], []>} : vector<16x128xbf16>, vector<128x512xbf16>, vector<16x512xf32> -> vector<16x512xf32>
    %23 = arith.addf %18, %22 : vector<16x512xf32>
    %24 = vector.extract_strided_slice %23 {offsets = [0, 0], sizes = [16, 128], strides = [1, 1]} : vector<16x512xf32> to vector<16x128xf32>
    %25 = arith.negf %24 : vector<16x128xf32>
    %26 = math.exp %25 : vector<16x128xf32>
    %cst_26 = arith.constant 1.000000e+00 : f32
    %27 = vector.broadcast %cst_26 : f32 to vector<16x128xf32>
    %28 = arith.addf %27, %26 : vector<16x128xf32>
    %29 = arith.divf %27, %28 : vector<16x128xf32>
    %30 = vector.extract_strided_slice %23 {offsets = [0, 128], sizes = [16, 128], strides = [1, 1]} : vector<16x512xf32> to vector<16x128xf32>
    %31 = arith.negf %30 : vector<16x128xf32>
    %32 = math.exp %31 : vector<16x128xf32>
    %cst_27 = arith.constant 1.000000e+00 : f32
    %33 = vector.broadcast %cst_27 : f32 to vector<16x128xf32>
    %34 = arith.addf %33, %32 : vector<16x128xf32>
    %35 = arith.divf %33, %34 : vector<16x128xf32>
    %36 = vector.extract_strided_slice %23 {offsets = [0, 256], sizes = [16, 128], strides = [1, 1]} : vector<16x512xf32> to vector<16x128xf32>
    %37 = math.tanh %36 : vector<16x128xf32>
    %38 = vector.extract_strided_slice %23 {offsets = [0, 384], sizes = [16, 128], strides = [1, 1]} : vector<16x512xf32> to vector<16x128xf32>
    %39 = arith.negf %38 : vector<16x128xf32>
    %40 = math.exp %39 : vector<16x128xf32>
    %cst_28 = arith.constant 1.000000e+00 : f32
    %41 = vector.broadcast %cst_28 : f32 to vector<16x128xf32>
    %42 = arith.addf %41, %40 : vector<16x128xf32>
    %43 = arith.divf %41, %42 : vector<16x128xf32>
    %44 = arith.mulf %35, %6 : vector<16x128xf32>
    %45 = arith.mulf %29, %37 : vector<16x128xf32>
    %46 = arith.addf %44, %45 : vector<16x128xf32>
    %47 = math.tanh %46 : vector<16x128xf32>
    %48 = arith.mulf %43, %47 : vector<16x128xf32>
    %c0_29 = arith.constant 0 : index
    %c0_30 = arith.constant 0 : index
    %c0_31 = arith.constant 0 : index
    %49 = vector.load %arg9[%c0_29, %c0_30, %c0_31] : memref<8x16x128xf32, #tpu.memory_space<vmem>>, vector<1x16x128xf32>
    %50 = vector.shape_cast %49 : vector<1x16x128xf32> to vector<16x128xf32>
    %51 = vector.shape_cast %48 : vector<16x128xf32> to vector<1x16x128xf32>
    tpu.vector_store %arg9[%c0_29, %c0_30, %c0_31], %51 {strides = array<i32>} : memref<8x16x128xf32, #tpu.memory_space<vmem>>, vector<1x16x128xf32>,
    %c1 = arith.constant 1 : index
    %c0_32 = arith.constant 0 : index
    %c0_33 = arith.constant 0 : index
    %52 = vector.load %arg8[%c1, %c0_32, %c0_33] : memref<8x16x512xf32, #tpu.memory_space<vmem>>, vector<1x16x512xf32>
    %53 = vector.shape_cast %52 : vector<1x16x512xf32> to vector<16x512xf32>
    %54 = arith.truncf %48 : vector<16x128xf32> to vector<16x128xbf16>
    %c0_34 = arith.constant 0 : index
    %c0_35 = arith.constant 0 : index
    %c0_36 = arith.constant 0 : index
    %55 = vector.load %arg3[%c0_34, %c0_35, %c0_36] : memref<2x128x512xbf16, #tpu.memory_space<vmem>>, vector<1x128x512xbf16>
    %56 = vector.shape_cast %55 : vector<1x128x512xbf16> to vector<128x512xbf16>
    %cst_37 = arith.constant dense<0.000000e+00> : vector<16x512xf32>
    %57 = tpu.matmul %54, %56, %cst_37 {dimension_numbers = #tpu.dot_dimension_numbers<[1], [0], [0], [1], [0, 0, 1, 1], [], []>} : vector<16x128xbf16>, vector<128x512xbf16>, vector<16x512xf32> -> vector<16x512xf32>
    %58 = arith.addf %53, %57 : vector<16x512xf32>
    %59 = vector.extract_strided_slice %58 {offsets = [0, 0], sizes = [16, 128], strides = [1, 1]} : vector<16x512xf32> to vector<16x128xf32>
    %60 = arith.negf %59 : vector<16x128xf32>
    %61 = math.exp %60 : vector<16x128xf32>
    %cst_38 = arith.constant 1.000000e+00 : f32
    %62 = vector.broadcast %cst_38 : f32 to vector<16x128xf32>
    %63 = arith.addf %62, %61 : vector<16x128xf32>
    %64 = arith.divf %62, %63 : vector<16x128xf32>
    %65 = vector.extract_strided_slice %58 {offsets = [0, 128], sizes = [16, 128], strides = [1, 1]} : vector<16x512xf32> to vector<16x128xf32>
    %66 = arith.negf %65 : vector<16x128xf32>
    %67 = math.exp %66 : vector<16x128xf32>
    %cst_39 = arith.constant 1.000000e+00 : f32
    %68 = vector.broadcast %cst_39 : f32 to vector<16x128xf32>
    %69 = arith.addf %68, %67 : vector<16x128xf32>
    %70 = arith.divf %68, %69 : vector<16x128xf32>
    %71 = vector.extract_strided_slice %58 {offsets = [0, 256], sizes = [16, 128], strides = [1, 1]} : vector<16x512xf32> to vector<16x128xf32>
    %72 = math.tanh %71 : vector<16x128xf32>
    %73 = vector.extract_strided_slice %58 {offsets = [0, 384], sizes = [16, 128], strides = [1, 1]} : vector<16x512xf32> to vector<16x128xf32>
    %74 = arith.negf %73 : vector<16x128xf32>
    %75 = math.exp %74 : vector<16x128xf32>
    %cst_40 = arith.constant 1.000000e+00 : f32
    %76 = vector.broadcast %cst_40 : f32 to vector<16x128xf32>
    %77 = arith.addf %76, %75 : vector<16x128xf32>
    %78 = arith.divf %76, %77 : vector<16x128xf32>
    %79 = arith.mulf %70, %46 : vector<16x128xf32>
    %80 = arith.mulf %64, %72 : vector<16x128xf32>
    %81 = arith.addf %79, %80 : vector<16x128xf32>
    %82 = math.tanh %81 : vector<16x128xf32>
    %83 = arith.mulf %78, %82 : vector<16x128xf32>
    %c1_41 = arith.constant 1 : index
    %c0_42 = arith.constant 0 : index
    %c0_43 = arith.constant 0 : index
    %84 = vector.load %arg9[%c1_41, %c0_42, %c0_43] : memref<8x16x128xf32, #tpu.memory_space<vmem>>, vector<1x16x128xf32>
    %85 = vector.shape_cast %84 : vector<1x16x128xf32> to vector<16x128xf32>
    %86 = vector.shape_cast %83 : vector<16x128xf32> to vector<1x16x128xf32>
    tpu.vector_store %arg9[%c1_41, %c0_42, %c0_43], %86 {strides = array<i32>} : memref<8x16x128xf32, #tpu.memory_space<vmem>>, vector<1x16x128xf32>,
    %c2 = arith.constant 2 : index
    %c0_44 = arith.constant 0 : index
    %c0_45 = arith.constant 0 : index
    %87 = vector.load %arg8[%c2, %c0_44, %c0_45] : memref<8x16x512xf32, #tpu.memory_space<vmem>>, vector<1x16x512xf32>
    %88 = vector.shape_cast %87 : vector<1x16x512xf32> to vector<16x512xf32>
    %89 = arith.truncf %83 : vector<16x128xf32> to vector<16x128xbf16>
    %c0_46 = arith.constant 0 : index
    %c0_47 = arith.constant 0 : index
    %c0_48 = arith.constant 0 : index
    %90 = vector.load %arg3[%c0_46, %c0_47, %c0_48] : memref<2x128x512xbf16, #tpu.memory_space<vmem>>, vector<1x128x512xbf16>
    %91 = vector.shape_cast %90 : vector<1x128x512xbf16> to vector<128x512xbf16>
    %cst_49 = arith.constant dense<0.000000e+00> : vector<16x512xf32>
    %92 = tpu.matmul %89, %91, %cst_49 {dimension_numbers = #tpu.dot_dimension_numbers<[1], [0], [0], [1], [0, 0, 1, 1], [], []>} : vector<16x128xbf16>, vector<128x512xbf16>, vector<16x512xf32> -> vector<16x512xf32>
    %93 = arith.addf %88, %92 : vector<16x512xf32>
    %94 = vector.extract_strided_slice %93 {offsets = [0, 0], sizes = [16, 128], strides = [1, 1]} : vector<16x512xf32> to vector<16x128xf32>
    %95 = arith.negf %94 : vector<16x128xf32>
    %96 = math.exp %95 : vector<16x128xf32>
    %cst_50 = arith.constant 1.000000e+00 : f32
    %97 = vector.broadcast %cst_50 : f32 to vector<16x128xf32>
    %98 = arith.addf %97, %96 : vector<16x128xf32>
    %99 = arith.divf %97, %98 : vector<16x128xf32>
    %100 = vector.extract_strided_slice %93 {offsets = [0, 128], sizes = [16, 128], strides = [1, 1]} : vector<16x512xf32> to vector<16x128xf32>
    %101 = arith.negf %100 : vector<16x128xf32>
    %102 = math.exp %101 : vector<16x128xf32>
    %cst_51 = arith.constant 1.000000e+00 : f32
    %103 = vector.broadcast %cst_51 : f32 to vector<16x128xf32>
    %104 = arith.addf %103, %102 : vector<16x128xf32>
    %105 = arith.divf %103, %104 : vector<16x128xf32>
    %106 = vector.extract_strided_slice %93 {offsets = [0, 256], sizes = [16, 128], strides = [1, 1]} : vector<16x512xf32> to vector<16x128xf32>
    %107 = math.tanh %106 : vector<16x128xf32>
    %108 = vector.extract_strided_slice %93 {offsets = [0, 384], sizes = [16, 128], strides = [1, 1]} : vector<16x512xf32> to vector<16x128xf32>
    %109 = arith.negf %108 : vector<16x128xf32>
    %110 = math.exp %109 : vector<16x128xf32>
    %cst_52 = arith.constant 1.000000e+00 : f32
    %111 = vector.broadcast %cst_52 : f32 to vector<16x128xf32>
    %112 = arith.addf %111, %110 : vector<16x128xf32>
    %113 = arith.divf %111, %112 : vector<16x128xf32>
    %114 = arith.mulf %105, %81 : vector<16x128xf32>
    %115 = arith.mulf %99, %107 : vector<16x128xf32>
    %116 = arith.addf %114, %115 : vector<16x128xf32>
    %117 = math.tanh %116 : vector<16x128xf32>
    %118 = arith.mulf %113, %117 : vector<16x128xf32>
    %c2_53 = arith.constant 2 : index
    %c0_54 = arith.constant 0 : index
    %c0_55 = arith.constant 0 : index
    %119 = vector.load %arg9[%c2_53, %c0_54, %c0_55] : memref<8x16x128xf32, #tpu.memory_space<vmem>>, vector<1x16x128xf32>
    %120 = vector.shape_cast %119 : vector<1x16x128xf32> to vector<16x128xf32>
    %121 = vector.shape_cast %118 : vector<16x128xf32> to vector<1x16x128xf32>
    tpu.vector_store %arg9[%c2_53, %c0_54, %c0_55], %121 {strides = array<i32>} : memref<8x16x128xf32, #tpu.memory_space<vmem>>, vector<1x16x128xf32>,
    %c3 = arith.constant 3 : index
    %c0_56 = arith.constant 0 : index
    %c0_57 = arith.constant 0 : index
    %122 = vector.load %arg8[%c3, %c0_56, %c0_57] : memref<8x16x512xf32, #tpu.memory_space<vmem>>, vector<1x16x512xf32>
    %123 = vector.shape_cast %122 : vector<1x16x512xf32> to vector<16x512xf32>
    %124 = arith.truncf %118 : vector<16x128xf32> to vector<16x128xbf16>
    %c0_58 = arith.constant 0 : index
    %c0_59 = arith.constant 0 : index
    %c0_60 = arith.constant 0 : index
    %125 = vector.load %arg3[%c0_58, %c0_59, %c0_60] : memref<2x128x512xbf16, #tpu.memory_space<vmem>>, vector<1x128x512xbf16>
    %126 = vector.shape_cast %125 : vector<1x128x512xbf16> to vector<128x512xbf16>
    %cst_61 = arith.constant dense<0.000000e+00> : vector<16x512xf32>
    %127 = tpu.matmul %124, %126, %cst_61 {dimension_numbers = #tpu.dot_dimension_numbers<[1], [0], [0], [1], [0, 0, 1, 1], [], []>} : vector<16x128xbf16>, vector<128x512xbf16>, vector<16x512xf32> -> vector<16x512xf32>
    %128 = arith.addf %123, %127 : vector<16x512xf32>
    %129 = vector.extract_strided_slice %128 {offsets = [0, 0], sizes = [16, 128], strides = [1, 1]} : vector<16x512xf32> to vector<16x128xf32>
    %130 = arith.negf %129 : vector<16x128xf32>
    %131 = math.exp %130 : vector<16x128xf32>
    %cst_62 = arith.constant 1.000000e+00 : f32
    %132 = vector.broadcast %cst_62 : f32 to vector<16x128xf32>
    %133 = arith.addf %132, %131 : vector<16x128xf32>
    %134 = arith.divf %132, %133 : vector<16x128xf32>
    %135 = vector.extract_strided_slice %128 {offsets = [0, 128], sizes = [16, 128], strides = [1, 1]} : vector<16x512xf32> to vector<16x128xf32>
    %136 = arith.negf %135 : vector<16x128xf32>
    %137 = math.exp %136 : vector<16x128xf32>
    %cst_63 = arith.constant 1.000000e+00 : f32
    %138 = vector.broadcast %cst_63 : f32 to vector<16x128xf32>
    %139 = arith.addf %138, %137 : vector<16x128xf32>
    %140 = arith.divf %138, %139 : vector<16x128xf32>
    %141 = vector.extract_strided_slice %128 {offsets = [0, 256], sizes = [16, 128], strides = [1, 1]} : vector<16x512xf32> to vector<16x128xf32>
    %142 = math.tanh %141 : vector<16x128xf32>
    %143 = vector.extract_strided_slice %128 {offsets = [0, 384], sizes = [16, 128], strides = [1, 1]} : vector<16x512xf32> to vector<16x128xf32>
    %144 = arith.negf %143 : vector<16x128xf32>
    %145 = math.exp %144 : vector<16x128xf32>
    %cst_64 = arith.constant 1.000000e+00 : f32
    %146 = vector.broadcast %cst_64 : f32 to vector<16x128xf32>
    %147 = arith.addf %146, %145 : vector<16x128xf32>
    %148 = arith.divf %146, %147 : vector<16x128xf32>
    %149 = arith.mulf %140, %116 : vector<16x128xf32>
    %150 = arith.mulf %134, %142 : vector<16x128xf32>
    %151 = arith.addf %149, %150 : vector<16x128xf32>
    %152 = math.tanh %151 : vector<16x128xf32>
    %153 = arith.mulf %148, %152 : vector<16x128xf32>
    %c3_65 = arith.constant 3 : index
    %c0_66 = arith.constant 0 : index
    %c0_67 = arith.constant 0 : index
    %154 = vector.load %arg9[%c3_65, %c0_66, %c0_67] : memref<8x16x128xf32, #tpu.memory_space<vmem>>, vector<1x16x128xf32>
    %155 = vector.shape_cast %154 : vector<1x16x128xf32> to vector<16x128xf32>
    %156 = vector.shape_cast %153 : vector<16x128xf32> to vector<1x16x128xf32>
    tpu.vector_store %arg9[%c3_65, %c0_66, %c0_67], %156 {strides = array<i32>} : memref<8x16x128xf32, #tpu.memory_space<vmem>>, vector<1x16x128xf32>,
    %c4 = arith.constant 4 : index
    %c0_68 = arith.constant 0 : index
    %c0_69 = arith.constant 0 : index
    %157 = vector.load %arg8[%c4, %c0_68, %c0_69] : memref<8x16x512xf32, #tpu.memory_space<vmem>>, vector<1x16x512xf32>
    %158 = vector.shape_cast %157 : vector<1x16x512xf32> to vector<16x512xf32>
    %159 = arith.truncf %153 : vector<16x128xf32> to vector<16x128xbf16>
    %c0_70 = arith.constant 0 : index
    %c0_71 = arith.constant 0 : index
    %c0_72 = arith.constant 0 : index
    %160 = vector.load %arg3[%c0_70, %c0_71, %c0_72] : memref<2x128x512xbf16, #tpu.memory_space<vmem>>, vector<1x128x512xbf16>
    %161 = vector.shape_cast %160 : vector<1x128x512xbf16> to vector<128x512xbf16>
    %cst_73 = arith.constant dense<0.000000e+00> : vector<16x512xf32>
    %162 = tpu.matmul %159, %161, %cst_73 {dimension_numbers = #tpu.dot_dimension_numbers<[1], [0], [0], [1], [0, 0, 1, 1], [], []>} : vector<16x128xbf16>, vector<128x512xbf16>, vector<16x512xf32> -> vector<16x512xf32>
    %163 = arith.addf %158, %162 : vector<16x512xf32>
    %164 = vector.extract_strided_slice %163 {offsets = [0, 0], sizes = [16, 128], strides = [1, 1]} : vector<16x512xf32> to vector<16x128xf32>
    %165 = arith.negf %164 : vector<16x128xf32>
    %166 = math.exp %165 : vector<16x128xf32>
    %cst_74 = arith.constant 1.000000e+00 : f32
    %167 = vector.broadcast %cst_74 : f32 to vector<16x128xf32>
    %168 = arith.addf %167, %166 : vector<16x128xf32>
    %169 = arith.divf %167, %168 : vector<16x128xf32>
    %170 = vector.extract_strided_slice %163 {offsets = [0, 128], sizes = [16, 128], strides = [1, 1]} : vector<16x512xf32> to vector<16x128xf32>
    %171 = arith.negf %170 : vector<16x128xf32>
    %172 = math.exp %171 : vector<16x128xf32>
    %cst_75 = arith.constant 1.000000e+00 : f32
    %173 = vector.broadcast %cst_75 : f32 to vector<16x128xf32>
    %174 = arith.addf %173, %172 : vector<16x128xf32>
    %175 = arith.divf %173, %174 : vector<16x128xf32>
    %176 = vector.extract_strided_slice %163 {offsets = [0, 256], sizes = [16, 128], strides = [1, 1]} : vector<16x512xf32> to vector<16x128xf32>
    %177 = math.tanh %176 : vector<16x128xf32>
    %178 = vector.extract_strided_slice %163 {offsets = [0, 384], sizes = [16, 128], strides = [1, 1]} : vector<16x512xf32> to vector<16x128xf32>
    %179 = arith.negf %178 : vector<16x128xf32>
    %180 = math.exp %179 : vector<16x128xf32>
    %cst_76 = arith.constant 1.000000e+00 : f32
    %181 = vector.broadcast %cst_76 : f32 to vector<16x128xf32>
    %182 = arith.addf %181, %180 : vector<16x128xf32>
    %183 = arith.divf %181, %182 : vector<16x128xf32>
    %184 = arith.mulf %175, %151 : vector<16x128xf32>
    %185 = arith.mulf %169, %177 : vector<16x128xf32>
    %186 = arith.addf %184, %185 : vector<16x128xf32>
    %187 = math.tanh %186 : vector<16x128xf32>
    %188 = arith.mulf %183, %187 : vector<16x128xf32>
    %c4_77 = arith.constant 4 : index
    %c0_78 = arith.constant 0 : index
    %c0_79 = arith.constant 0 : index
    %189 = vector.load %arg9[%c4_77, %c0_78, %c0_79] : memref<8x16x128xf32, #tpu.memory_space<vmem>>, vector<1x16x128xf32>
    %190 = vector.shape_cast %189 : vector<1x16x128xf32> to vector<16x128xf32>
    %191 = vector.shape_cast %188 : vector<16x128xf32> to vector<1x16x128xf32>
    tpu.vector_store %arg9[%c4_77, %c0_78, %c0_79], %191 {strides = array<i32>} : memref<8x16x128xf32, #tpu.memory_space<vmem>>, vector<1x16x128xf32>,
    %c5 = arith.constant 5 : index
    %c0_80 = arith.constant 0 : index
    %c0_81 = arith.constant 0 : index
    %192 = vector.load %arg8[%c5, %c0_80, %c0_81] : memref<8x16x512xf32, #tpu.memory_space<vmem>>, vector<1x16x512xf32>
    %193 = vector.shape_cast %192 : vector<1x16x512xf32> to vector<16x512xf32>
    %194 = arith.truncf %188 : vector<16x128xf32> to vector<16x128xbf16>
    %c0_82 = arith.constant 0 : index
    %c0_83 = arith.constant 0 : index
    %c0_84 = arith.constant 0 : index
    %195 = vector.load %arg3[%c0_82, %c0_83, %c0_84] : memref<2x128x512xbf16, #tpu.memory_space<vmem>>, vector<1x128x512xbf16>
    %196 = vector.shape_cast %195 : vector<1x128x512xbf16> to vector<128x512xbf16>
    %cst_85 = arith.constant dense<0.000000e+00> : vector<16x512xf32>
    %197 = tpu.matmul %194, %196, %cst_85 {dimension_numbers = #tpu.dot_dimension_numbers<[1], [0], [0], [1], [0, 0, 1, 1], [], []>} : vector<16x128xbf16>, vector<128x512xbf16>, vector<16x512xf32> -> vector<16x512xf32>
    %198 = arith.addf %193, %197 : vector<16x512xf32>
    %199 = vector.extract_strided_slice %198 {offsets = [0, 0], sizes = [16, 128], strides = [1, 1]} : vector<16x512xf32> to vector<16x128xf32>
    %200 = arith.negf %199 : vector<16x128xf32>
    %201 = math.exp %200 : vector<16x128xf32>
    %cst_86 = arith.constant 1.000000e+00 : f32
    %202 = vector.broadcast %cst_86 : f32 to vector<16x128xf32>
    %203 = arith.addf %202, %201 : vector<16x128xf32>
    %204 = arith.divf %202, %203 : vector<16x128xf32>
    %205 = vector.extract_strided_slice %198 {offsets = [0, 128], sizes = [16, 128], strides = [1, 1]} : vector<16x512xf32> to vector<16x128xf32>
    %206 = arith.negf %205 : vector<16x128xf32>
    %207 = math.exp %206 : vector<16x128xf32>
    %cst_87 = arith.constant 1.000000e+00 : f32
    %208 = vector.broadcast %cst_87 : f32 to vector<16x128xf32>
    %209 = arith.addf %208, %207 : vector<16x128xf32>
    %210 = arith.divf %208, %209 : vector<16x128xf32>
    %211 = vector.extract_strided_slice %198 {offsets = [0, 256], sizes = [16, 128], strides = [1, 1]} : vector<16x512xf32> to vector<16x128xf32>
    %212 = math.tanh %211 : vector<16x128xf32>
    %213 = vector.extract_strided_slice %198 {offsets = [0, 384], sizes = [16, 128], strides = [1, 1]} : vector<16x512xf32> to vector<16x128xf32>
    %214 = arith.negf %213 : vector<16x128xf32>
    %215 = math.exp %214 : vector<16x128xf32>
    %cst_88 = arith.constant 1.000000e+00 : f32
    %216 = vector.broadcast %cst_88 : f32 to vector<16x128xf32>
    %217 = arith.addf %216, %215 : vector<16x128xf32>
    %218 = arith.divf %216, %217 : vector<16x128xf32>
    %219 = arith.mulf %210, %186 : vector<16x128xf32>
    %220 = arith.mulf %204, %212 : vector<16x128xf32>
    %221 = arith.addf %219, %220 : vector<16x128xf32>
    %222 = math.tanh %221 : vector<16x128xf32>
    %223 = arith.mulf %218, %222 : vector<16x128xf32>
    %c5_89 = arith.constant 5 : index
    %c0_90 = arith.constant 0 : index
    %c0_91 = arith.constant 0 : index
    %224 = vector.load %arg9[%c5_89, %c0_90, %c0_91] : memref<8x16x128xf32, #tpu.memory_space<vmem>>, vector<1x16x128xf32>
    %225 = vector.shape_cast %224 : vector<1x16x128xf32> to vector<16x128xf32>
    %226 = vector.shape_cast %223 : vector<16x128xf32> to vector<1x16x128xf32>
    tpu.vector_store %arg9[%c5_89, %c0_90, %c0_91], %226 {strides = array<i32>} : memref<8x16x128xf32, #tpu.memory_space<vmem>>, vector<1x16x128xf32>,
    %c6 = arith.constant 6 : index
    %c0_92 = arith.constant 0 : index
    %c0_93 = arith.constant 0 : index
    %227 = vector.load %arg8[%c6, %c0_92, %c0_93] : memref<8x16x512xf32, #tpu.memory_space<vmem>>, vector<1x16x512xf32>
    %228 = vector.shape_cast %227 : vector<1x16x512xf32> to vector<16x512xf32>
    %229 = arith.truncf %223 : vector<16x128xf32> to vector<16x128xbf16>
    %c0_94 = arith.constant 0 : index
    %c0_95 = arith.constant 0 : index
    %c0_96 = arith.constant 0 : index
    %230 = vector.load %arg3[%c0_94, %c0_95, %c0_96] : memref<2x128x512xbf16, #tpu.memory_space<vmem>>, vector<1x128x512xbf16>
    %231 = vector.shape_cast %230 : vector<1x128x512xbf16> to vector<128x512xbf16>
    %cst_97 = arith.constant dense<0.000000e+00> : vector<16x512xf32>
    %232 = tpu.matmul %229, %231, %cst_97 {dimension_numbers = #tpu.dot_dimension_numbers<[1], [0], [0], [1], [0, 0, 1, 1], [], []>} : vector<16x128xbf16>, vector<128x512xbf16>, vector<16x512xf32> -> vector<16x512xf32>
    %233 = arith.addf %228, %232 : vector<16x512xf32>
    %234 = vector.extract_strided_slice %233 {offsets = [0, 0], sizes = [16, 128], strides = [1, 1]} : vector<16x512xf32> to vector<16x128xf32>
    %235 = arith.negf %234 : vector<16x128xf32>
    %236 = math.exp %235 : vector<16x128xf32>
    %cst_98 = arith.constant 1.000000e+00 : f32
    %237 = vector.broadcast %cst_98 : f32 to vector<16x128xf32>
    %238 = arith.addf %237, %236 : vector<16x128xf32>
    %239 = arith.divf %237, %238 : vector<16x128xf32>
    %240 = vector.extract_strided_slice %233 {offsets = [0, 128], sizes = [16, 128], strides = [1, 1]} : vector<16x512xf32> to vector<16x128xf32>
    %241 = arith.negf %240 : vector<16x128xf32>
    %242 = math.exp %241 : vector<16x128xf32>
    %cst_99 = arith.constant 1.000000e+00 : f32
    %243 = vector.broadcast %cst_99 : f32 to vector<16x128xf32>
    %244 = arith.addf %243, %242 : vector<16x128xf32>
    %245 = arith.divf %243, %244 : vector<16x128xf32>
    %246 = vector.extract_strided_slice %233 {offsets = [0, 256], sizes = [16, 128], strides = [1, 1]} : vector<16x512xf32> to vector<16x128xf32>
    %247 = math.tanh %246 : vector<16x128xf32>
    %248 = vector.extract_strided_slice %233 {offsets = [0, 384], sizes = [16, 128], strides = [1, 1]} : vector<16x512xf32> to vector<16x128xf32>
    %249 = arith.negf %248 : vector<16x128xf32>
    %250 = math.exp %249 : vector<16x128xf32>
    %cst_100 = arith.constant 1.000000e+00 : f32
    %251 = vector.broadcast %cst_100 : f32 to vector<16x128xf32>
    %252 = arith.addf %251, %250 : vector<16x128xf32>
    %253 = arith.divf %251, %252 : vector<16x128xf32>
    %254 = arith.mulf %245, %221 : vector<16x128xf32>
    %255 = arith.mulf %239, %247 : vector<16x128xf32>
    %256 = arith.addf %254, %255 : vector<16x128xf32>
    %257 = math.tanh %256 : vector<16x128xf32>
    %258 = arith.mulf %253, %257 : vector<16x128xf32>
    %c6_101 = arith.constant 6 : index
    %c0_102 = arith.constant 0 : index
    %c0_103 = arith.constant 0 : index
    %259 = vector.load %arg9[%c6_101, %c0_102, %c0_103] : memref<8x16x128xf32, #tpu.memory_space<vmem>>, vector<1x16x128xf32>
    %260 = vector.shape_cast %259 : vector<1x16x128xf32> to vector<16x128xf32>
    %261 = vector.shape_cast %258 : vector<16x128xf32> to vector<1x16x128xf32>
    tpu.vector_store %arg9[%c6_101, %c0_102, %c0_103], %261 {strides = array<i32>} : memref<8x16x128xf32, #tpu.memory_space<vmem>>, vector<1x16x128xf32>,
    %c7 = arith.constant 7 : index
    %c0_104 = arith.constant 0 : index
    %c0_105 = arith.constant 0 : index
    %262 = vector.load %arg8[%c7, %c0_104, %c0_105] : memref<8x16x512xf32, #tpu.memory_space<vmem>>, vector<1x16x512xf32>
    %263 = vector.shape_cast %262 : vector<1x16x512xf32> to vector<16x512xf32>
    %264 = arith.truncf %258 : vector<16x128xf32> to vector<16x128xbf16>
    %c0_106 = arith.constant 0 : index
    %c0_107 = arith.constant 0 : index
    %c0_108 = arith.constant 0 : index
    %265 = vector.load %arg3[%c0_106, %c0_107, %c0_108] : memref<2x128x512xbf16, #tpu.memory_space<vmem>>, vector<1x128x512xbf16>
    %266 = vector.shape_cast %265 : vector<1x128x512xbf16> to vector<128x512xbf16>
    %cst_109 = arith.constant dense<0.000000e+00> : vector<16x512xf32>
    %267 = tpu.matmul %264, %266, %cst_109 {dimension_numbers = #tpu.dot_dimension_numbers<[1], [0], [0], [1], [0, 0, 1, 1], [], []>} : vector<16x128xbf16>, vector<128x512xbf16>, vector<16x512xf32> -> vector<16x512xf32>
    %268 = arith.addf %263, %267 : vector<16x512xf32>
    %269 = vector.extract_strided_slice %268 {offsets = [0, 0], sizes = [16, 128], strides = [1, 1]} : vector<16x512xf32> to vector<16x128xf32>
    %270 = arith.negf %269 : vector<16x128xf32>
    %271 = math.exp %270 : vector<16x128xf32>
    %cst_110 = arith.constant 1.000000e+00 : f32
    %272 = vector.broadcast %cst_110 : f32 to vector<16x128xf32>
    %273 = arith.addf %272, %271 : vector<16x128xf32>
    %274 = arith.divf %272, %273 : vector<16x128xf32>
    %275 = vector.extract_strided_slice %268 {offsets = [0, 128], sizes = [16, 128], strides = [1, 1]} : vector<16x512xf32> to vector<16x128xf32>
    %276 = arith.negf %275 : vector<16x128xf32>
    %277 = math.exp %276 : vector<16x128xf32>
    %cst_111 = arith.constant 1.000000e+00 : f32
    %278 = vector.broadcast %cst_111 : f32 to vector<16x128xf32>
    %279 = arith.addf %278, %277 : vector<16x128xf32>
    %280 = arith.divf %278, %279 : vector<16x128xf32>
    %281 = vector.extract_strided_slice %268 {offsets = [0, 256], sizes = [16, 128], strides = [1, 1]} : vector<16x512xf32> to vector<16x128xf32>
    %282 = math.tanh %281 : vector<16x128xf32>
    %283 = vector.extract_strided_slice %268 {offsets = [0, 384], sizes = [16, 128], strides = [1, 1]} : vector<16x512xf32> to vector<16x128xf32>
    %284 = arith.negf %283 : vector<16x128xf32>
    %285 = math.exp %284 : vector<16x128xf32>
    %cst_112 = arith.constant 1.000000e+00 : f32
    %286 = vector.broadcast %cst_112 : f32 to vector<16x128xf32>
    %287 = arith.addf %286, %285 : vector<16x128xf32>
    %288 = arith.divf %286, %287 : vector<16x128xf32>
    %289 = arith.mulf %280, %256 : vector<16x128xf32>
    %290 = arith.mulf %274, %282 : vector<16x128xf32>
    %291 = arith.addf %289, %290 : vector<16x128xf32>
    %292 = math.tanh %291 : vector<16x128xf32>
    %293 = arith.mulf %288, %292 : vector<16x128xf32>
    %c7_113 = arith.constant 7 : index
    %c0_114 = arith.constant 0 : index
    %c0_115 = arith.constant 0 : index
    %294 = vector.load %arg9[%c7_113, %c0_114, %c0_115] : memref<8x16x128xf32, #tpu.memory_space<vmem>>, vector<1x16x128xf32>
    %295 = vector.shape_cast %294 : vector<1x16x128xf32> to vector<16x128xf32>
    %296 = vector.shape_cast %293 : vector<16x128xf32> to vector<1x16x128xf32>
    tpu.vector_store %arg9[%c7_113, %c0_114, %c0_115], %296 {strides = array<i32>} : memref<8x16x128xf32, #tpu.memory_space<vmem>>, vector<1x16x128xf32>,
    %c1_116 = arith.constant 1 : index
    %c0_117 = arith.constant 0 : index
    %c0_118 = arith.constant 0 : index
    %297 = vector.load %arg4[%c1_116, %c0_117, %c0_118] : memref<2x1x512xf32, #tpu.memory_space<vmem>>, vector<1x1x512xf32>
    %298 = vector.shape_cast %297 : vector<1x1x512xf32> to vector<1x512xf32>
    %cst_119 = arith.constant 0.000000e+00 : f32
    %299 = vector.broadcast %cst_119 : f32 to vector<16x128xf32>
    %cst_120 = arith.constant 0.000000e+00 : f32
    %300 = vector.broadcast %cst_120 : f32 to vector<16x128xf32>
    %c0_121 = arith.constant 0 : index
    %c0_122 = arith.constant 0 : index
    %c0_123 = arith.constant 0 : index
    %301 = vector.load %arg9[%c0_121, %c0_122, %c0_123] : memref<8x16x128xf32, #tpu.memory_space<vmem>>, vector<8x16x128xf32>
    %302 = vector.shape_cast %301 : vector<8x16x128xf32> to vector<128x128xf32>
    %303 = arith.truncf %302 : vector<128x128xf32> to vector<128x128xbf16>
    %c1_124 = arith.constant 1 : index
    %c0_125 = arith.constant 0 : index
    %c0_126 = arith.constant 0 : index
    %304 = vector.load %arg2[%c1_124, %c0_125, %c0_126] : memref<2x128x512xbf16, #tpu.memory_space<vmem>>, vector<1x128x512xbf16>
    %305 = vector.shape_cast %304 : vector<1x128x512xbf16> to vector<128x512xbf16>
    %cst_127 = arith.constant dense<0.000000e+00> : vector<128x512xf32>
    %306 = tpu.matmul %303, %305, %cst_127 {dimension_numbers = #tpu.dot_dimension_numbers<[1], [0], [0], [1], [0, 0, 1, 1], [], []>} : vector<128x128xbf16>, vector<128x512xbf16>, vector<128x512xf32> -> vector<128x512xf32>
    %307 = vector.broadcast %298 : vector<1x512xf32> to vector<128x512xf32>
    %308 = arith.addf %306, %307 : vector<128x512xf32>
    %309 = vector.shape_cast %308 : vector<128x512xf32> to vector<8x16x512xf32>
    %c0_128 = arith.constant 0 : index
    %c0_129 = arith.constant 0 : index
    %c0_130 = arith.constant 0 : index
    %310 = vector.load %arg8[%c0_128, %c0_129, %c0_130] : memref<8x16x512xf32, #tpu.memory_space<vmem>>, vector<8x16x512xf32>
    tpu.vector_store %arg8[%c0_128, %c0_129, %c0_130], %309 {strides = array<i32>} : memref<8x16x512xf32, #tpu.memory_space<vmem>>, vector<8x16x512xf32>,
    %c0_131 = arith.constant 0 : index
    %c0_132 = arith.constant 0 : index
    %c0_133 = arith.constant 0 : index
    %311 = vector.load %arg8[%c0_131, %c0_132, %c0_133] : memref<8x16x512xf32, #tpu.memory_space<vmem>>, vector<1x16x512xf32>
    %312 = vector.shape_cast %311 : vector<1x16x512xf32> to vector<16x512xf32>
    %313 = arith.truncf %299 : vector<16x128xf32> to vector<16x128xbf16>
    %c1_134 = arith.constant 1 : index
    %c0_135 = arith.constant 0 : index
    %c0_136 = arith.constant 0 : index
    %314 = vector.load %arg3[%c1_134, %c0_135, %c0_136] : memref<2x128x512xbf16, #tpu.memory_space<vmem>>, vector<1x128x512xbf16>
    %315 = vector.shape_cast %314 : vector<1x128x512xbf16> to vector<128x512xbf16>
    %cst_137 = arith.constant dense<0.000000e+00> : vector<16x512xf32>
    %316 = tpu.matmul %313, %315, %cst_137 {dimension_numbers = #tpu.dot_dimension_numbers<[1], [0], [0], [1], [0, 0, 1, 1], [], []>} : vector<16x128xbf16>, vector<128x512xbf16>, vector<16x512xf32> -> vector<16x512xf32>
    %317 = arith.addf %312, %316 : vector<16x512xf32>
    %318 = vector.extract_strided_slice %317 {offsets = [0, 0], sizes = [16, 128], strides = [1, 1]} : vector<16x512xf32> to vector<16x128xf32>
    %319 = arith.negf %318 : vector<16x128xf32>
    %320 = math.exp %319 : vector<16x128xf32>
    %cst_138 = arith.constant 1.000000e+00 : f32
    %321 = vector.broadcast %cst_138 : f32 to vector<16x128xf32>
    %322 = arith.addf %321, %320 : vector<16x128xf32>
    %323 = arith.divf %321, %322 : vector<16x128xf32>
    %324 = vector.extract_strided_slice %317 {offsets = [0, 128], sizes = [16, 128], strides = [1, 1]} : vector<16x512xf32> to vector<16x128xf32>
    %325 = arith.negf %324 : vector<16x128xf32>
    %326 = math.exp %325 : vector<16x128xf32>
    %cst_139 = arith.constant 1.000000e+00 : f32
    %327 = vector.broadcast %cst_139 : f32 to vector<16x128xf32>
    %328 = arith.addf %327, %326 : vector<16x128xf32>
    %329 = arith.divf %327, %328 : vector<16x128xf32>
    %330 = vector.extract_strided_slice %317 {offsets = [0, 256], sizes = [16, 128], strides = [1, 1]} : vector<16x512xf32> to vector<16x128xf32>
    %331 = math.tanh %330 : vector<16x128xf32>
    %332 = vector.extract_strided_slice %317 {offsets = [0, 384], sizes = [16, 128], strides = [1, 1]} : vector<16x512xf32> to vector<16x128xf32>
    %333 = arith.negf %332 : vector<16x128xf32>
    %334 = math.exp %333 : vector<16x128xf32>
    %cst_140 = arith.constant 1.000000e+00 : f32
    %335 = vector.broadcast %cst_140 : f32 to vector<16x128xf32>
    %336 = arith.addf %335, %334 : vector<16x128xf32>
    %337 = arith.divf %335, %336 : vector<16x128xf32>
    %338 = arith.mulf %329, %300 : vector<16x128xf32>
    %339 = arith.mulf %323, %331 : vector<16x128xf32>
    %340 = arith.addf %338, %339 : vector<16x128xf32>
    %341 = math.tanh %340 : vector<16x128xf32>
    %342 = arith.mulf %337, %341 : vector<16x128xf32>
    %c1_141 = arith.constant 1 : index
    %c0_142 = arith.constant 0 : index
    %c0_143 = arith.constant 0 : index
    %343 = vector.load %arg8[%c1_141, %c0_142, %c0_143] : memref<8x16x512xf32, #tpu.memory_space<vmem>>, vector<1x16x512xf32>
    %344 = vector.shape_cast %343 : vector<1x16x512xf32> to vector<16x512xf32>
    %345 = arith.truncf %342 : vector<16x128xf32> to vector<16x128xbf16>
    %c1_144 = arith.constant 1 : index
    %c0_145 = arith.constant 0 : index
    %c0_146 = arith.constant 0 : index
    %346 = vector.load %arg3[%c1_144, %c0_145, %c0_146] : memref<2x128x512xbf16, #tpu.memory_space<vmem>>, vector<1x128x512xbf16>
    %347 = vector.shape_cast %346 : vector<1x128x512xbf16> to vector<128x512xbf16>
    %cst_147 = arith.constant dense<0.000000e+00> : vector<16x512xf32>
    %348 = tpu.matmul %345, %347, %cst_147 {dimension_numbers = #tpu.dot_dimension_numbers<[1], [0], [0], [1], [0, 0, 1, 1], [], []>} : vector<16x128xbf16>, vector<128x512xbf16>, vector<16x512xf32> -> vector<16x512xf32>
    %349 = arith.addf %344, %348 : vector<16x512xf32>
    %350 = vector.extract_strided_slice %349 {offsets = [0, 0], sizes = [16, 128], strides = [1, 1]} : vector<16x512xf32> to vector<16x128xf32>
    %351 = arith.negf %350 : vector<16x128xf32>
    %352 = math.exp %351 : vector<16x128xf32>
    %cst_148 = arith.constant 1.000000e+00 : f32
    %353 = vector.broadcast %cst_148 : f32 to vector<16x128xf32>
    %354 = arith.addf %353, %352 : vector<16x128xf32>
    %355 = arith.divf %353, %354 : vector<16x128xf32>
    %356 = vector.extract_strided_slice %349 {offsets = [0, 128], sizes = [16, 128], strides = [1, 1]} : vector<16x512xf32> to vector<16x128xf32>
    %357 = arith.negf %356 : vector<16x128xf32>
    %358 = math.exp %357 : vector<16x128xf32>
    %cst_149 = arith.constant 1.000000e+00 : f32
    %359 = vector.broadcast %cst_149 : f32 to vector<16x128xf32>
    %360 = arith.addf %359, %358 : vector<16x128xf32>
    %361 = arith.divf %359, %360 : vector<16x128xf32>
    %362 = vector.extract_strided_slice %349 {offsets = [0, 256], sizes = [16, 128], strides = [1, 1]} : vector<16x512xf32> to vector<16x128xf32>
    %363 = math.tanh %362 : vector<16x128xf32>
    %364 = vector.extract_strided_slice %349 {offsets = [0, 384], sizes = [16, 128], strides = [1, 1]} : vector<16x512xf32> to vector<16x128xf32>
    %365 = arith.negf %364 : vector<16x128xf32>
    %366 = math.exp %365 : vector<16x128xf32>
    %cst_150 = arith.constant 1.000000e+00 : f32
    %367 = vector.broadcast %cst_150 : f32 to vector<16x128xf32>
    %368 = arith.addf %367, %366 : vector<16x128xf32>
    %369 = arith.divf %367, %368 : vector<16x128xf32>
    %370 = arith.mulf %361, %340 : vector<16x128xf32>
    %371 = arith.mulf %355, %363 : vector<16x128xf32>
    %372 = arith.addf %370, %371 : vector<16x128xf32>
    %373 = math.tanh %372 : vector<16x128xf32>
    %374 = arith.mulf %369, %373 : vector<16x128xf32>
    %c2_151 = arith.constant 2 : index
    %c0_152 = arith.constant 0 : index
    %c0_153 = arith.constant 0 : index
    %375 = vector.load %arg8[%c2_151, %c0_152, %c0_153] : memref<8x16x512xf32, #tpu.memory_space<vmem>>, vector<1x16x512xf32>
    %376 = vector.shape_cast %375 : vector<1x16x512xf32> to vector<16x512xf32>
    %377 = arith.truncf %374 : vector<16x128xf32> to vector<16x128xbf16>
    %c1_154 = arith.constant 1 : index
    %c0_155 = arith.constant 0 : index
    %c0_156 = arith.constant 0 : index
    %378 = vector.load %arg3[%c1_154, %c0_155, %c0_156] : memref<2x128x512xbf16, #tpu.memory_space<vmem>>, vector<1x128x512xbf16>
    %379 = vector.shape_cast %378 : vector<1x128x512xbf16> to vector<128x512xbf16>
    %cst_157 = arith.constant dense<0.000000e+00> : vector<16x512xf32>
    %380 = tpu.matmul %377, %379, %cst_157 {dimension_numbers = #tpu.dot_dimension_numbers<[1], [0], [0], [1], [0, 0, 1, 1], [], []>} : vector<16x128xbf16>, vector<128x512xbf16>, vector<16x512xf32> -> vector<16x512xf32>
    %381 = arith.addf %376, %380 : vector<16x512xf32>
    %382 = vector.extract_strided_slice %381 {offsets = [0, 0], sizes = [16, 128], strides = [1, 1]} : vector<16x512xf32> to vector<16x128xf32>
    %383 = arith.negf %382 : vector<16x128xf32>
    %384 = math.exp %383 : vector<16x128xf32>
    %cst_158 = arith.constant 1.000000e+00 : f32
    %385 = vector.broadcast %cst_158 : f32 to vector<16x128xf32>
    %386 = arith.addf %385, %384 : vector<16x128xf32>
    %387 = arith.divf %385, %386 : vector<16x128xf32>
    %388 = vector.extract_strided_slice %381 {offsets = [0, 128], sizes = [16, 128], strides = [1, 1]} : vector<16x512xf32> to vector<16x128xf32>
    %389 = arith.negf %388 : vector<16x128xf32>
    %390 = math.exp %389 : vector<16x128xf32>
    %cst_159 = arith.constant 1.000000e+00 : f32
    %391 = vector.broadcast %cst_159 : f32 to vector<16x128xf32>
    %392 = arith.addf %391, %390 : vector<16x128xf32>
    %393 = arith.divf %391, %392 : vector<16x128xf32>
    %394 = vector.extract_strided_slice %381 {offsets = [0, 256], sizes = [16, 128], strides = [1, 1]} : vector<16x512xf32> to vector<16x128xf32>
    %395 = math.tanh %394 : vector<16x128xf32>
    %396 = vector.extract_strided_slice %381 {offsets = [0, 384], sizes = [16, 128], strides = [1, 1]} : vector<16x512xf32> to vector<16x128xf32>
    %397 = arith.negf %396 : vector<16x128xf32>
    %398 = math.exp %397 : vector<16x128xf32>
    %cst_160 = arith.constant 1.000000e+00 : f32
    %399 = vector.broadcast %cst_160 : f32 to vector<16x128xf32>
    %400 = arith.addf %399, %398 : vector<16x128xf32>
    %401 = arith.divf %399, %400 : vector<16x128xf32>
    %402 = arith.mulf %393, %372 : vector<16x128xf32>
    %403 = arith.mulf %387, %395 : vector<16x128xf32>
    %404 = arith.addf %402, %403 : vector<16x128xf32>
    %405 = math.tanh %404 : vector<16x128xf32>
    %406 = arith.mulf %401, %405 : vector<16x128xf32>
    %c3_161 = arith.constant 3 : index
    %c0_162 = arith.constant 0 : index
    %c0_163 = arith.constant 0 : index
    %407 = vector.load %arg8[%c3_161, %c0_162, %c0_163] : memref<8x16x512xf32, #tpu.memory_space<vmem>>, vector<1x16x512xf32>
    %408 = vector.shape_cast %407 : vector<1x16x512xf32> to vector<16x512xf32>
    %409 = arith.truncf %406 : vector<16x128xf32> to vector<16x128xbf16>
    %c1_164 = arith.constant 1 : index
    %c0_165 = arith.constant 0 : index
    %c0_166 = arith.constant 0 : index
    %410 = vector.load %arg3[%c1_164, %c0_165, %c0_166] : memref<2x128x512xbf16, #tpu.memory_space<vmem>>, vector<1x128x512xbf16>
    %411 = vector.shape_cast %410 : vector<1x128x512xbf16> to vector<128x512xbf16>
    %cst_167 = arith.constant dense<0.000000e+00> : vector<16x512xf32>
    %412 = tpu.matmul %409, %411, %cst_167 {dimension_numbers = #tpu.dot_dimension_numbers<[1], [0], [0], [1], [0, 0, 1, 1], [], []>} : vector<16x128xbf16>, vector<128x512xbf16>, vector<16x512xf32> -> vector<16x512xf32>
    %413 = arith.addf %408, %412 : vector<16x512xf32>
    %414 = vector.extract_strided_slice %413 {offsets = [0, 0], sizes = [16, 128], strides = [1, 1]} : vector<16x512xf32> to vector<16x128xf32>
    %415 = arith.negf %414 : vector<16x128xf32>
    %416 = math.exp %415 : vector<16x128xf32>
    %cst_168 = arith.constant 1.000000e+00 : f32
    %417 = vector.broadcast %cst_168 : f32 to vector<16x128xf32>
    %418 = arith.addf %417, %416 : vector<16x128xf32>
    %419 = arith.divf %417, %418 : vector<16x128xf32>
    %420 = vector.extract_strided_slice %413 {offsets = [0, 128], sizes = [16, 128], strides = [1, 1]} : vector<16x512xf32> to vector<16x128xf32>
    %421 = arith.negf %420 : vector<16x128xf32>
    %422 = math.exp %421 : vector<16x128xf32>
    %cst_169 = arith.constant 1.000000e+00 : f32
    %423 = vector.broadcast %cst_169 : f32 to vector<16x128xf32>
    %424 = arith.addf %423, %422 : vector<16x128xf32>
    %425 = arith.divf %423, %424 : vector<16x128xf32>
    %426 = vector.extract_strided_slice %413 {offsets = [0, 256], sizes = [16, 128], strides = [1, 1]} : vector<16x512xf32> to vector<16x128xf32>
    %427 = math.tanh %426 : vector<16x128xf32>
    %428 = vector.extract_strided_slice %413 {offsets = [0, 384], sizes = [16, 128], strides = [1, 1]} : vector<16x512xf32> to vector<16x128xf32>
    %429 = arith.negf %428 : vector<16x128xf32>
    %430 = math.exp %429 : vector<16x128xf32>
    %cst_170 = arith.constant 1.000000e+00 : f32
    %431 = vector.broadcast %cst_170 : f32 to vector<16x128xf32>
    %432 = arith.addf %431, %430 : vector<16x128xf32>
    %433 = arith.divf %431, %432 : vector<16x128xf32>
    %434 = arith.mulf %425, %404 : vector<16x128xf32>
    %435 = arith.mulf %419, %427 : vector<16x128xf32>
    %436 = arith.addf %434, %435 : vector<16x128xf32>
    %437 = math.tanh %436 : vector<16x128xf32>
    %438 = arith.mulf %433, %437 : vector<16x128xf32>
    %c4_171 = arith.constant 4 : index
    %c0_172 = arith.constant 0 : index
    %c0_173 = arith.constant 0 : index
    %439 = vector.load %arg8[%c4_171, %c0_172, %c0_173] : memref<8x16x512xf32, #tpu.memory_space<vmem>>, vector<1x16x512xf32>
    %440 = vector.shape_cast %439 : vector<1x16x512xf32> to vector<16x512xf32>
    %441 = arith.truncf %438 : vector<16x128xf32> to vector<16x128xbf16>
    %c1_174 = arith.constant 1 : index
    %c0_175 = arith.constant 0 : index
    %c0_176 = arith.constant 0 : index
    %442 = vector.load %arg3[%c1_174, %c0_175, %c0_176] : memref<2x128x512xbf16, #tpu.memory_space<vmem>>, vector<1x128x512xbf16>
    %443 = vector.shape_cast %442 : vector<1x128x512xbf16> to vector<128x512xbf16>
    %cst_177 = arith.constant dense<0.000000e+00> : vector<16x512xf32>
    %444 = tpu.matmul %441, %443, %cst_177 {dimension_numbers = #tpu.dot_dimension_numbers<[1], [0], [0], [1], [0, 0, 1, 1], [], []>} : vector<16x128xbf16>, vector<128x512xbf16>, vector<16x512xf32> -> vector<16x512xf32>
    %445 = arith.addf %440, %444 : vector<16x512xf32>
    %446 = vector.extract_strided_slice %445 {offsets = [0, 0], sizes = [16, 128], strides = [1, 1]} : vector<16x512xf32> to vector<16x128xf32>
    %447 = arith.negf %446 : vector<16x128xf32>
    %448 = math.exp %447 : vector<16x128xf32>
    %cst_178 = arith.constant 1.000000e+00 : f32
    %449 = vector.broadcast %cst_178 : f32 to vector<16x128xf32>
    %450 = arith.addf %449, %448 : vector<16x128xf32>
    %451 = arith.divf %449, %450 : vector<16x128xf32>
    %452 = vector.extract_strided_slice %445 {offsets = [0, 128], sizes = [16, 128], strides = [1, 1]} : vector<16x512xf32> to vector<16x128xf32>
    %453 = arith.negf %452 : vector<16x128xf32>
    %454 = math.exp %453 : vector<16x128xf32>
    %cst_179 = arith.constant 1.000000e+00 : f32
    %455 = vector.broadcast %cst_179 : f32 to vector<16x128xf32>
    %456 = arith.addf %455, %454 : vector<16x128xf32>
    %457 = arith.divf %455, %456 : vector<16x128xf32>
    %458 = vector.extract_strided_slice %445 {offsets = [0, 256], sizes = [16, 128], strides = [1, 1]} : vector<16x512xf32> to vector<16x128xf32>
    %459 = math.tanh %458 : vector<16x128xf32>
    %460 = vector.extract_strided_slice %445 {offsets = [0, 384], sizes = [16, 128], strides = [1, 1]} : vector<16x512xf32> to vector<16x128xf32>
    %461 = arith.negf %460 : vector<16x128xf32>
    %462 = math.exp %461 : vector<16x128xf32>
    %cst_180 = arith.constant 1.000000e+00 : f32
    %463 = vector.broadcast %cst_180 : f32 to vector<16x128xf32>
    %464 = arith.addf %463, %462 : vector<16x128xf32>
    %465 = arith.divf %463, %464 : vector<16x128xf32>
    %466 = arith.mulf %457, %436 : vector<16x128xf32>
    %467 = arith.mulf %451, %459 : vector<16x128xf32>
    %468 = arith.addf %466, %467 : vector<16x128xf32>
    %469 = math.tanh %468 : vector<16x128xf32>
    %470 = arith.mulf %465, %469 : vector<16x128xf32>
    %c5_181 = arith.constant 5 : index
    %c0_182 = arith.constant 0 : index
    %c0_183 = arith.constant 0 : index
    %471 = vector.load %arg8[%c5_181, %c0_182, %c0_183] : memref<8x16x512xf32, #tpu.memory_space<vmem>>, vector<1x16x512xf32>
    %472 = vector.shape_cast %471 : vector<1x16x512xf32> to vector<16x512xf32>
    %473 = arith.truncf %470 : vector<16x128xf32> to vector<16x128xbf16>
    %c1_184 = arith.constant 1 : index
    %c0_185 = arith.constant 0 : index
    %c0_186 = arith.constant 0 : index
    %474 = vector.load %arg3[%c1_184, %c0_185, %c0_186] : memref<2x128x512xbf16, #tpu.memory_space<vmem>>, vector<1x128x512xbf16>
    %475 = vector.shape_cast %474 : vector<1x128x512xbf16> to vector<128x512xbf16>
    %cst_187 = arith.constant dense<0.000000e+00> : vector<16x512xf32>
    %476 = tpu.matmul %473, %475, %cst_187 {dimension_numbers = #tpu.dot_dimension_numbers<[1], [0], [0], [1], [0, 0, 1, 1], [], []>} : vector<16x128xbf16>, vector<128x512xbf16>, vector<16x512xf32> -> vector<16x512xf32>
    %477 = arith.addf %472, %476 : vector<16x512xf32>
    %478 = vector.extract_strided_slice %477 {offsets = [0, 0], sizes = [16, 128], strides = [1, 1]} : vector<16x512xf32> to vector<16x128xf32>
    %479 = arith.negf %478 : vector<16x128xf32>
    %480 = math.exp %479 : vector<16x128xf32>
    %cst_188 = arith.constant 1.000000e+00 : f32
    %481 = vector.broadcast %cst_188 : f32 to vector<16x128xf32>
    %482 = arith.addf %481, %480 : vector<16x128xf32>
    %483 = arith.divf %481, %482 : vector<16x128xf32>
    %484 = vector.extract_strided_slice %477 {offsets = [0, 128], sizes = [16, 128], strides = [1, 1]} : vector<16x512xf32> to vector<16x128xf32>
    %485 = arith.negf %484 : vector<16x128xf32>
    %486 = math.exp %485 : vector<16x128xf32>
    %cst_189 = arith.constant 1.000000e+00 : f32
    %487 = vector.broadcast %cst_189 : f32 to vector<16x128xf32>
    %488 = arith.addf %487, %486 : vector<16x128xf32>
    %489 = arith.divf %487, %488 : vector<16x128xf32>
    %490 = vector.extract_strided_slice %477 {offsets = [0, 256], sizes = [16, 128], strides = [1, 1]} : vector<16x512xf32> to vector<16x128xf32>
    %491 = math.tanh %490 : vector<16x128xf32>
    %492 = vector.extract_strided_slice %477 {offsets = [0, 384], sizes = [16, 128], strides = [1, 1]} : vector<16x512xf32> to vector<16x128xf32>
    %493 = arith.negf %492 : vector<16x128xf32>
    %494 = math.exp %493 : vector<16x128xf32>
    %cst_190 = arith.constant 1.000000e+00 : f32
    %495 = vector.broadcast %cst_190 : f32 to vector<16x128xf32>
    %496 = arith.addf %495, %494 : vector<16x128xf32>
    %497 = arith.divf %495, %496 : vector<16x128xf32>
    %498 = arith.mulf %489, %468 : vector<16x128xf32>
    %499 = arith.mulf %483, %491 : vector<16x128xf32>
    %500 = arith.addf %498, %499 : vector<16x128xf32>
    %501 = math.tanh %500 : vector<16x128xf32>
    %502 = arith.mulf %497, %501 : vector<16x128xf32>
    %c6_191 = arith.constant 6 : index
    %c0_192 = arith.constant 0 : index
    %c0_193 = arith.constant 0 : index
    %503 = vector.load %arg8[%c6_191, %c0_192, %c0_193] : memref<8x16x512xf32, #tpu.memory_space<vmem>>, vector<1x16x512xf32>
    %504 = vector.shape_cast %503 : vector<1x16x512xf32> to vector<16x512xf32>
    %505 = arith.truncf %502 : vector<16x128xf32> to vector<16x128xbf16>
    %c1_194 = arith.constant 1 : index
    %c0_195 = arith.constant 0 : index
    %c0_196 = arith.constant 0 : index
    %506 = vector.load %arg3[%c1_194, %c0_195, %c0_196] : memref<2x128x512xbf16, #tpu.memory_space<vmem>>, vector<1x128x512xbf16>
    %507 = vector.shape_cast %506 : vector<1x128x512xbf16> to vector<128x512xbf16>
    %cst_197 = arith.constant dense<0.000000e+00> : vector<16x512xf32>
    %508 = tpu.matmul %505, %507, %cst_197 {dimension_numbers = #tpu.dot_dimension_numbers<[1], [0], [0], [1], [0, 0, 1, 1], [], []>} : vector<16x128xbf16>, vector<128x512xbf16>, vector<16x512xf32> -> vector<16x512xf32>
    %509 = arith.addf %504, %508 : vector<16x512xf32>
    %510 = vector.extract_strided_slice %509 {offsets = [0, 0], sizes = [16, 128], strides = [1, 1]} : vector<16x512xf32> to vector<16x128xf32>
    %511 = arith.negf %510 : vector<16x128xf32>
    %512 = math.exp %511 : vector<16x128xf32>
    %cst_198 = arith.constant 1.000000e+00 : f32
    %513 = vector.broadcast %cst_198 : f32 to vector<16x128xf32>
    %514 = arith.addf %513, %512 : vector<16x128xf32>
    %515 = arith.divf %513, %514 : vector<16x128xf32>
    %516 = vector.extract_strided_slice %509 {offsets = [0, 128], sizes = [16, 128], strides = [1, 1]} : vector<16x512xf32> to vector<16x128xf32>
    %517 = arith.negf %516 : vector<16x128xf32>
    %518 = math.exp %517 : vector<16x128xf32>
    %cst_199 = arith.constant 1.000000e+00 : f32
    %519 = vector.broadcast %cst_199 : f32 to vector<16x128xf32>
    %520 = arith.addf %519, %518 : vector<16x128xf32>
    %521 = arith.divf %519, %520 : vector<16x128xf32>
    %522 = vector.extract_strided_slice %509 {offsets = [0, 256], sizes = [16, 128], strides = [1, 1]} : vector<16x512xf32> to vector<16x128xf32>
    %523 = math.tanh %522 : vector<16x128xf32>
    %524 = vector.extract_strided_slice %509 {offsets = [0, 384], sizes = [16, 128], strides = [1, 1]} : vector<16x512xf32> to vector<16x128xf32>
    %525 = arith.negf %524 : vector<16x128xf32>
    %526 = math.exp %525 : vector<16x128xf32>
    %cst_200 = arith.constant 1.000000e+00 : f32
    %527 = vector.broadcast %cst_200 : f32 to vector<16x128xf32>
    %528 = arith.addf %527, %526 : vector<16x128xf32>
    %529 = arith.divf %527, %528 : vector<16x128xf32>
    %530 = arith.mulf %521, %500 : vector<16x128xf32>
    %531 = arith.mulf %515, %523 : vector<16x128xf32>
    %532 = arith.addf %530, %531 : vector<16x128xf32>
    %533 = math.tanh %532 : vector<16x128xf32>
    %534 = arith.mulf %529, %533 : vector<16x128xf32>
    %c7_201 = arith.constant 7 : index
    %c0_202 = arith.constant 0 : index
    %c0_203 = arith.constant 0 : index
    %535 = vector.load %arg8[%c7_201, %c0_202, %c0_203] : memref<8x16x512xf32, #tpu.memory_space<vmem>>, vector<1x16x512xf32>
    %536 = vector.shape_cast %535 : vector<1x16x512xf32> to vector<16x512xf32>
    %537 = arith.truncf %534 : vector<16x128xf32> to vector<16x128xbf16>
    %c1_204 = arith.constant 1 : index
    %c0_205 = arith.constant 0 : index
    %c0_206 = arith.constant 0 : index
    %538 = vector.load %arg3[%c1_204, %c0_205, %c0_206] : memref<2x128x512xbf16, #tpu.memory_space<vmem>>, vector<1x128x512xbf16>
    %539 = vector.shape_cast %538 : vector<1x128x512xbf16> to vector<128x512xbf16>
    %cst_207 = arith.constant dense<0.000000e+00> : vector<16x512xf32>
    %540 = tpu.matmul %537, %539, %cst_207 {dimension_numbers = #tpu.dot_dimension_numbers<[1], [0], [0], [1], [0, 0, 1, 1], [], []>} : vector<16x128xbf16>, vector<128x512xbf16>, vector<16x512xf32> -> vector<16x512xf32>
    %541 = arith.addf %536, %540 : vector<16x512xf32>
    %542 = vector.extract_strided_slice %541 {offsets = [0, 0], sizes = [16, 128], strides = [1, 1]} : vector<16x512xf32> to vector<16x128xf32>
    %543 = arith.negf %542 : vector<16x128xf32>
    %544 = math.exp %543 : vector<16x128xf32>
    %cst_208 = arith.constant 1.000000e+00 : f32
    %545 = vector.broadcast %cst_208 : f32 to vector<16x128xf32>
    %546 = arith.addf %545, %544 : vector<16x128xf32>
    %547 = arith.divf %545, %546 : vector<16x128xf32>
    %548 = vector.extract_strided_slice %541 {offsets = [0, 128], sizes = [16, 128], strides = [1, 1]} : vector<16x512xf32> to vector<16x128xf32>
    %549 = arith.negf %548 : vector<16x128xf32>
    %550 = math.exp %549 : vector<16x128xf32>
    %cst_209 = arith.constant 1.000000e+00 : f32
    %551 = vector.broadcast %cst_209 : f32 to vector<16x128xf32>
    %552 = arith.addf %551, %550 : vector<16x128xf32>
    %553 = arith.divf %551, %552 : vector<16x128xf32>
    %554 = vector.extract_strided_slice %541 {offsets = [0, 256], sizes = [16, 128], strides = [1, 1]} : vector<16x512xf32> to vector<16x128xf32>
    %555 = math.tanh %554 : vector<16x128xf32>
    %556 = vector.extract_strided_slice %541 {offsets = [0, 384], sizes = [16, 128], strides = [1, 1]} : vector<16x512xf32> to vector<16x128xf32>
    %557 = arith.negf %556 : vector<16x128xf32>
    %558 = math.exp %557 : vector<16x128xf32>
    %cst_210 = arith.constant 1.000000e+00 : f32
    %559 = vector.broadcast %cst_210 : f32 to vector<16x128xf32>
    %560 = arith.addf %559, %558 : vector<16x128xf32>
    %561 = arith.divf %559, %560 : vector<16x128xf32>
    %562 = arith.mulf %553, %532 : vector<16x128xf32>
    %563 = arith.mulf %547, %555 : vector<16x128xf32>
    %564 = arith.addf %562, %563 : vector<16x128xf32>
    %565 = math.tanh %564 : vector<16x128xf32>
    %566 = arith.mulf %561, %565 : vector<16x128xf32>
    %567 = arith.truncf %566 : vector<16x128xf32> to vector<16x128xbf16>
    %c0_211 = arith.constant 0 : index
    %c0_212 = arith.constant 0 : index
    %568 = vector.load %arg5[%c0_211, %c0_212] : memref<128x128xbf16, #tpu.memory_space<vmem>>, vector<128x128xbf16>
    %cst_213 = arith.constant dense<0.000000e+00> : vector<16x128xf32>
    %569 = tpu.matmul %567, %568, %cst_213 {dimension_numbers = #tpu.dot_dimension_numbers<[1], [0], [0], [1], [0, 0, 1, 1], [], []>} : vector<16x128xbf16>, vector<128x128xbf16>, vector<16x128xf32> -> vector<16x128xf32>
    %c0_214 = arith.constant 0 : index
    %c0_215 = arith.constant 0 : index
    %570 = vector.load %arg6[%c0_214, %c0_215] : memref<1x128xf32, #tpu.memory_space<vmem>>, vector<1x128xf32>
    %571 = vector.broadcast %570 : vector<1x128xf32> to vector<16x128xf32>
    %572 = arith.addf %569, %571 : vector<16x128xf32>
    %c0_216 = arith.constant 0 : index
    %c0_217 = arith.constant 0 : index
    %573 = vector.load %arg7[%c0_216, %c0_217] : memref<16x128xf32, #tpu.memory_space<vmem>>, vector<16x128xf32>
    tpu.vector_store %arg7[%c0_216, %c0_217], %572 {strides = array<i32>} : memref<16x128xf32, #tpu.memory_space<vmem>>, vector<16x128xf32>,
    return
  }
  func.func @transform_0(%arg0: i32) -> (i32, i32, i32) {
    %c0_i32 = arith.constant 0 : i32
    %c0_i32_0 = arith.constant 0 : i32
    %c0_i32_1 = arith.constant 0 : i32
    return %c0_i32, %arg0, %c0_i32_0 : i32, i32, i32
  }
  func.func @transform_1(%arg0: i32) -> (i32, i32, i32) {
    %c0_i32 = arith.constant 0 : i32
    %c0_i32_0 = arith.constant 0 : i32
    %c0_i32_1 = arith.constant 0 : i32
    %c0_i32_2 = arith.constant 0 : i32
    return %c0_i32, %c0_i32_0, %c0_i32_1 : i32, i32, i32
  }
  func.func @transform_2(%arg0: i32) -> (i32, i32, i32) {
    %c0_i32 = arith.constant 0 : i32
    %c0_i32_0 = arith.constant 0 : i32
    %c0_i32_1 = arith.constant 0 : i32
    %c0_i32_2 = arith.constant 0 : i32
    return %c0_i32, %c0_i32_0, %c0_i32_1 : i32, i32, i32
  }
  func.func @transform_3(%arg0: i32) -> (i32, i32, i32) {
    %c0_i32 = arith.constant 0 : i32
    %c0_i32_0 = arith.constant 0 : i32
    %c0_i32_1 = arith.constant 0 : i32
    %c0_i32_2 = arith.constant 0 : i32
    return %c0_i32, %c0_i32_0, %c0_i32_1 : i32, i32, i32
  }
  func.func @transform_4(%arg0: i32) -> (i32, i32) {
    %c0_i32 = arith.constant 0 : i32
    %c0_i32_0 = arith.constant 0 : i32
    %c0_i32_1 = arith.constant 0 : i32
    return %c0_i32, %c0_i32_0 : i32, i32
  }
  func.func @transform_5(%arg0: i32) -> (i32, i32) {
    %c0_i32 = arith.constant 0 : i32
    %c0_i32_0 = arith.constant 0 : i32
    %c0_i32_1 = arith.constant 0 : i32
    return %c0_i32, %c0_i32_0 : i32, i32
  }
  func.func @transform_6(%arg0: i32) -> (i32, i32) {
    %c0_i32 = arith.constant 0 : i32
    %c0_i32_0 = arith.constant 0 : i32
    return %arg0, %c0_i32 : i32, i32
  }
}

</mosaic_0001>

<bundles_post_ra>
// kernel: tpu_custom_call.1
= control target key start
LH: loop header
LB: loop body
LE: loop exit
PB: predicated region body
PF: predicated region fallthrough
CT: control target
= control target key end

     0   :  { %s9166_s0 = inlined_call_operand.hbm [shape: bf16[8,32,128], index: 0, kind: input, shape index: {}]   ;;  %s9167_s1 = inlined_call_operand.hbm [shape: bf16[2,128,512], index: 1, kind: input, shape index: {}]   ;;  %s9168_s2 = inlined_call_operand.hbm [shape: bf16[2,128,512], index: 2, kind: input, shape index: {}]   ;;  %s9169_s3 = inlined_call_operand.vmem [shape: f32[2,1,512], index: 3, kind: input, shape index: {}]   ;;  %s9170_s4 = inlined_call_operand.hbm [shape: bf16[128,128], index: 4, kind: input, shape index: {}]   ;;  %s9171_s5 = inlined_call_operand.vmem [shape: f32[1,128], index: 5, kind: input, shape index: {}]   ;;  %s9172_s6 = inlined_call_operand.hbm [shape: f32[32,128], index: 6, kind: output, shape index: {}]  }
   0x1   :  { %9184 = sst [smem:[#allocation23_spill]] %s9167_s1 }
   0x2   :  { %11 = vsyncpa [#allocation5], 0 }
   0x3   :  { %13 = vsyncpa [#allocation5 + $0x1], 0 }
   0x4   :  { %14 = vsyncpa [#allocation8], 0 }
   0x5   :  { %15 = vsyncpa [#allocation11], 0 }
   0x6   :  { %16 = vsyncpa [#allocation6], 0 }
   0x7   :  { %18 = vsyncpa [#allocation6 + $0x1], 0  ;;  %s7758_s21 = smov 0   ;;  %s7760_s22 = smov 0  }
   0x8   :  { %s7762_s23 = smov 0   ;;  %s7764_s24 = smov 0  }
   0x9 LB: > { %s7779_s25 = sadd.s32 4294967295, %s7702_s24   ;;  %s5852_s26 = sadd.s32 4294967294, %s7702_s24   ;;  %s7702_s24 = sphi %s7764_s24, %s9209_s24   ;;  %s7698_s23 = sphi %s7762_s23, %s9213_s23   ;;  %s7694_s22 = sphi %s7760_s22, %s9212_s22   ;;  %s7690_s21 = sphi %s7758_s21, %s9211_s21  }
   0xa   : > { %s7783_s27 = sadd.s32 1, %s7702_s24   ;;  %s31_s28 = sadd.s32 1, %s7698_s23 }
   0xb   : > { %9185 = sst [smem:[#allocation20_spill]] %s7783_s27  ;;  %s28_s29 = ssub.s32 %s7702_s24, %s7783_s27 }
   0xc   : > { %p38_p0 = scmp.ne.s32.totalorder %s7698_s23, %s7694_s22  ;;  %p29_p1 = scmp.eq.s32.totalorder %s28_s29, 0 }
   0xd   : > { %p39_p2 = scmp.eq.s32.totalorder %s7702_s24, 0  ;;  %p44_p3 = scmp.ne.s32.totalorder %s7694_s22, %s7690_s21 }
   0xe   : > { %p9173_p4 = scmp.eq.s32.totalorder %s7779_s25, 0  ;;  %p173_p7 = scmp.eq.s32.totalorder %s7779_s25, 1 }
   0xf   : > { %s7795_s30 = scalar_select %p29_p1, %s7698_s23, %s31_s28  }
  0x10   : > { %p7797_p5 = por %p39_p2, %p38_p0  ;;  %p7803_p6 = por %p9173_p4, %p44_p3 }
  0x11   : > { %9186 = sst [smem:[#allocation21_spill]] %s7795_s30  ;;  %p179_p8 = scmp.eq.s32.totalorder %s5852_s26, 1 }
  0x12   : > { %s9187_s7 = scalar_select %p7797_p5, 1, 0 }
  0x13   : > { %s9188_s8 = scalar_select %p7803_p6, 1, 0 }
  0x14   : > { %p5853_p9 = scmp.ge.s32.totalorder %s7702_s24, 1  ;;  %p186_p10 = scmp.lt.s32.totalorder %s7702_s24, 3 }
  0x15   : > { %p7810_p11 = por %p173_p7, %p38_p0  ;;  %p7814_p12 = por %p179_p8, %p44_p3 }
  0x16   : > { %p7818_p13 = pnand %p5853_p9, %p186_p10  ;;  %s7704_s12 = smov [#allocation7]  }
  0x17   : > { %s9189_s9 = scalar_select %p7810_p11, 1, 0 }
  0x18   : > { %s9190_s10 = scalar_select %p7814_p12, 1, 0 }
  0x19   : > { %s9192_s11 = scalar_select %p7818_p13, 1, 0 }
  0x1a   : > { %9191 = sst [smem:[#allocation22_spill]] %s9190_s10  ;;  %p6681_p1 = pneg %p7818_p13 }
  0x1b   : > { %s198_s13 = sshll.u32 %s7704_s12, 4  ;;  %s7705_s15 = smov [#allocation9]   ;;  %s199_s13 = int_to_ptr.vmem [resolvable:$true] %s198_s13 }
  0x1c   : > { %p7826_p2 = pnand %p6681_p1, %p9173_p4  ;;  %s211_s16 = sshll.u32 %s7705_s15, 4  ;;  %s7830_s16 = int_to_ptr.vmem [resolvable:$true] %s211_s16 }
  0x1d   : > { %s9194_s1 = sld [smem:[#allocation23_spill]] }
  0x1e   : > { %p7840_p3 = pneg %p7826_p2 }
  0x23   : > { %s7544_s19 = scalar_lea.hbm %s9194_s1, 8192 }
  0x24   : > { %p7545_p0 = scmp.ne.s32.totalorder %s9194_s1, %s7544_s19  ;;  %p7551_p9 = scmp.lt.u32.totalorder %s7544_s19, %s9194_s1 }
  0x26   : > { %p7547_p7 = pnand %p7840_p3, %p7545_p0 }
  0x28   : > { %p7548_p8 = pneg %p7547_p7 }
  0x2a   : > { %p7553_p10 = pnand %p7551_p9, %p7548_p8 }
  0x2c   : > { %7556 = shalt.err (!%p7553_p10)
}
  0x2d   : > { %s7557_s15 = scalar_lea.vmem %s199_s13, 8192  ;;  %p7565_p11 = scmp.lt.s32.totalorder %s199_s13, %s199_s13 }
  0x2e   : > { %p7558_p1 = scmp.ne.s32.totalorder %s199_s13, %s7557_s15  ;;  %p7566_p6 = scmp.lt.s32.totalorder %s7557_s15, %s7557_s15 }
  0x30   : > { %p7560_p4 = pnand %p7558_p1, %p7840_p3  ;;  %p7567_p13 = por %p7566_p6, %p7565_p11 }
  0x32   : > { %p7561_p12 = pneg %p7560_p4 }
  0x34   : > { %p7568_p5 = pnand %p7567_p13, %p7561_p12 }
  0x36   : > { %7571 = shalt.err (!%p7568_p5)
}
  0x37   : > { %s7706_s17 = smov 256   ;;  %s7707_s18 = smov 16  }
  0x38   : > { %6684 = dma.hbm_to_vmem [thread:$0]  (!%p7826_p2), %s9194_s1, 8192, %s199_s13, [#allocation8], %s7706_s17, %s7706_s17, %s7707_s18  }
  0x39   : > { %s7572_s12 = scalar_lea.hbm %s9168_s2, 8192 }
  0x3a   : > { %p7573_p4 = scmp.ne.s32.totalorder %s9168_s2, %s7572_s12  ;;  %p7579_p11 = scmp.lt.u32.totalorder %s7572_s12, %s9168_s2 }
  0x3c   : > { %p7575_p6 = pnand %p7573_p4, %p7840_p3 }
  0x3e   : > { %p7576_p5 = pneg %p7575_p6 }
  0x40   : > { %p7581_p12 = pnand %p7579_p11, %p7576_p5 }
  0x42   : > { %7584 = shalt.err (!%p7581_p12)
}
  0x43   : > { %s7585_s13 = scalar_lea.vmem %s7830_s16, 8192  ;;  %p7593_p8 = scmp.lt.s32.totalorder %s7830_s16, %s7830_s16 }
  0x44   : > { %p7586_p13 = scmp.ne.s32.totalorder %s7830_s16, %s7585_s13  ;;  %p7594_p9 = scmp.lt.s32.totalorder %s7585_s13, %s7585_s13 }
  0x46   : > { %p7588_p0 = pnand %p7586_p13, %p7840_p3  ;;  %p7595_p10 = por %p7594_p9, %p7593_p8 }
  0x48   : > { %p7589_p7 = pneg %p7588_p0 }
  0x4a   : > { %p7596_p1 = pnand %p7595_p10, %p7589_p7 }
  0x4c   : > { %7599 = shalt.err (!%p7596_p1)
}
  0x4d   : > { %6687 = dma.hbm_to_vmem [thread:$0]  (!%p7826_p2), %s9168_s2, 8192, %s7830_s16, [#allocation8], %s7706_s17, %s7706_s17, %s7707_s18  }
  0x4e   : > { %s7708_s10 = smov [#allocation10]   ;;  %s7600_s29 = scalar_lea.hbm %s9170_s4, 1024 }
  0x4f   : > { %s227_s20 = sshll.u32 %s7708_s10, 4  ;;  %p7601_p4 = scmp.ne.s32.totalorder %s9170_s4, %s7600_s29  ;;  %s228_s20 = int_to_ptr.vmem [resolvable:$true] %s227_s20 }
  0x50   : > { %p7607_p11 = scmp.lt.u32.totalorder %s7600_s29, %s9170_s4 }
  0x51   : > { %p7603_p6 = pnand %p7601_p4, %p7840_p3 }
  0x53   : > { %p7604_p5 = pneg %p7603_p6 }
  0x55   : > { %p7609_p12 = pnand %p7607_p11, %p7604_p5 }
  0x57   : > { %7612 = shalt.err (!%p7609_p12)
}
  0x58   : > { %s7613_s16 = scalar_lea.vmem %s228_s20, 1024  ;;  %p7621_p8 = scmp.lt.s32.totalorder %s228_s20, %s228_s20 }
  0x59   : > { %p7614_p13 = scmp.ne.s32.totalorder %s228_s20, %s7613_s16  ;;  %p7622_p9 = scmp.lt.s32.totalorder %s7613_s16, %s7613_s16 }
  0x5b   : > { %p7616_p0 = pnand %p7614_p13, %p7840_p3  ;;  %p7623_p10 = por %p7622_p9, %p7621_p8 }
  0x5d   : > { %p7617_p7 = pneg %p7616_p0 }
  0x5f   : > { %p7624_p1 = pnand %p7623_p10, %p7617_p7 }
  0x61   : > { %7627 = shalt.err (!%p7624_p1)
}
  0x62   : > { %s7709_s17 = smov 64   ;;  %s7710_s18 = smov 4  }
  0x63   : > { %6690 = dma.hbm_to_vmem [thread:$0]  (!%p7826_p2), %s9170_s4, 1024, %s228_s20, [#allocation11], %s7709_s17, %s7709_s17, %s7710_s18  }
  0x64   : > { %p5857_p4 = scmp.ge.s32.totalorder %s7702_s24, 2 }
  0x66   : > { %240 = sbr.rel (%p5857_p4) target bundleno = 124 (0x7c), region = 36 }
  0x6d   : > { %s244_s28 = sand.u32 1, %s7698_s23   ;;  %s6332_s30 = sshll.u32 %s7702_s24, 7 }
  0x6e   : > { %s5858_s14 = sshll.u32 %s244_s28, 6  ;;  %s254_s20 = scalar_lea.hbm %s9166_s0, %s6332_s30 }
  0x6f   : > { %p9196_p2 = scmp.ne.s32.totalorder %s9187_s7, 0  ;;  %s248_s29 = scalar_lea.vmem [#allocation4], %s5858_s14 }
  0x70   : > { %s267_s12 = sshll.u32 %s248_s29, 4  ;;  %s7711_s13 = smov 256   ;;  %s268_s12 = int_to_ptr.vmem [resolvable:$true] %s267_s12 }
  0x71   : > { %s6664_s26 = scalar_select %p9196_p2, [#allocation0], [#allocation15] }
  0x72   : > { %6665 = sst [smem:[#allocation14]] (%p9196_p2), %s7711_s13  ;;  %s7712_s16 = smov 128  }
  0x73   : > { %s259_s15 = sld [smem:[%s6664_s26]]   ;;  %s7713_s17 = smov 2  }
  0x74   : > { %6666 = sst [smem:[#allocation14 + $0x1]] (%p9196_p2), %s7712_s16  ;;  %s7714_s18 = smov 64  }
  0x75   : > { %6667 = sst [smem:[#allocation14 + $0x2]] (%p9196_p2), %s7713_s17  ;;  %s7715_s1 = smov 4  }
  0x76   : > { %6668 = sst [smem:[#allocation14 + $0x3]] (%p9196_p2), %s7714_s18  ;;  %s245_s14 = scalar_lea.sflag [#allocation5], %s244_s28 }
  0x77   : > { %6669 = sst [smem:[#allocation14 + $0x4]] (%p9196_p2), %s7714_s18  ;;  %s7716_s10 = smov [#allocation13]  }
  0x78   : > { %6670 = sst [smem:[#allocation14 + $0x5]] (%p9196_p2), %s7715_s1 }
  0x79   : > { %s5861_s27 = sshll.u32 %s259_s15, 26 }
  0x7a   : > { %s5862_s30 = sadd.s32 134217728, %s5861_s27 }
  0x7b   : > { %6671 = dma.general (%p9196_p2), %s254_s20, 1024, %s268_s12, %s245_s14, %s7716_s10, [#allocation14], %s5862_s30, 0  }
  0x7c PF: > { %p9197_p3 = scmp.ne.s32.totalorder %s9192_s11, 0 }
  0x7d   : > { %s7924_s19 = sand.u32 (!%p9197_p3), 1, %s7694_s22   ;;  %p9198_p6 = scmp.ne.s32.totalorder (!%p9197_p3), %s9188_s8, 0 }
  0x7e   : > { %292 = sbr.rel (%p9197_p3) target bundleno = 4685 (0x124d), region = 44  ;;  %s5864_s26 = sshll.u32 (!%p9197_p3), %s7924_s19, 6 }
  0x7f   : > { %s295_s29 = scalar_lea.sflag (!%p9197_p3), [#allocation5], %s7924_s19  ;;  %s7928_s15 = scalar_lea.vmem (!%p9197_p3), [#allocation4], %s5864_s26 }
  0x85   : > { %7673 = dma.done.wait (%p9198_p6), %s295_s29, 1024  }
  0x86   : > { %7675 = vsyncadd (%p9198_p6), %s295_s29, 4294966272  ;;  %p9199_p5 = scmp.eq.s32.totalorder %s7779_s25, 0 }
  0x88   : > { %7677 = dma.done.wait (%p9199_p5), [#allocation8], 16384   ;;  %p9200_p11 = pmov %p9199_p5 }
  0x89   : > { %p9201_p12 = pmov %p9199_p5 }
  0x8a   : > { %7679 = vsyncadd (%p9200_p11), [#allocation8], 4294950912 }
  0x8b   : > { %7681 = dma.done.wait (%p9201_p12), [#allocation11], 1024   ;;  %p9202_p13 = pmov %p9199_p5 }
  0x8c   : > { %v7717_v0 = vmov 0   ;;  %v6752_v1 = vld [vmem:[#allocation7 + $0x4] ss:$16 sps:$4 sm:$0xff]   ;;  %v6754_v2 = vld [vmem:[#allocation7 + $0xc] ss:$16 sps:$4 sm:$0xff]   ;;  %vm7719_vm0 = vmmov 0  }
  0x8d   : > { %7683 = vsyncadd (%p9202_p13), [#allocation11], 4294966272  ;;  %660 = vmatprep.mubr.bf16.mxu0 %v7717_v0  ;;  %773 = vmatprep.mubr.bf16.mxu1 %v7717_v0  ;;  %v6756_v3 = vld [vmem:[#allocation7] ss:$16 sps:$4 sm:$0xff]   ;;  %v6757_v4 = vld [vmem:[#allocation7 + $0x8] ss:$16 sps:$4 sm:$0xff]  }
  0x8e   : > { %628 = vmatprep.subr.bf16.mxu0 %v6752_v1  ;;  %741 = vmatprep.subr.bf16.mxu1 %v6754_v2  ;;  %v6758_v5 = vld [vmem:[#allocation7 + $0x24] ss:$16 sps:$4 sm:$0xff]   ;;  %v6760_v6 = vld [vmem:[#allocation7 + $0x2c] ss:$16 sps:$4 sm:$0xff]   ;;  %v6762_v7 = vld [vmem:[#allocation7 + $0x20] ss:$16 sps:$4 sm:$0xff]  }
  0x8f   : > { %629 = vmatpush1.bf16.msra.mxu0 %v6756_v3  ;;  %742 = vmatpush1.bf16.msra.mxu1 %v6757_v4  ;;  %v6763_v8 = vld [vmem:[#allocation7 + $0x28] ss:$16 sps:$4 sm:$0xff]   ;;  %v6764_v9 = vld [vmem:[#allocation7 + $0x44] ss:$16 sps:$4 sm:$0xff]   ;;  %v6766_v10 = vld [vmem:[#allocation7 + $0x4c] ss:$16 sps:$4 sm:$0xff]  }
  0x90   : > { %630 = vmatprep.subr.bf16.mxu0 %v6758_v5  ;;  %743 = vmatprep.subr.bf16.mxu1 %v6760_v6  ;;  %v6768_v11 = vld [vmem:[#allocation7 + $0x40] ss:$16 sps:$4 sm:$0xff]   ;;  %v6769_v12 = vld [vmem:[#allocation7 + $0x48] ss:$16 sps:$4 sm:$0xff]   ;;  %v6770_v13 = vld [vmem:[#allocation7 + $0x64] ss:$16 sps:$4 sm:$0xff]  }
  0x91   : > { %v6772_v14 = vld [vmem:[#allocation7 + $0x6c] ss:$16 sps:$4 sm:$0xff]   ;;  %v6774_v15 = vld [vmem:[#allocation7 + $0x60] ss:$16 sps:$4 sm:$0xff]   ;;  %v6775_v16 = vld [vmem:[#allocation7 + $0x68] ss:$16 sps:$4 sm:$0xff]  }
  0x92   : > { %v6776_v17 = vld [vmem:[#allocation7 + $0x84] ss:$16 sps:$4 sm:$0xff]   ;;  %v6778_v18 = vld [vmem:[#allocation7 + $0x8c] ss:$16 sps:$4 sm:$0xff]   ;;  %v6780_v19 = vld [vmem:[#allocation7 + $0x80] ss:$16 sps:$4 sm:$0xff]  }
  0x93   : > { %631 = vmatpush1.bf16.msra.mxu0 %v6762_v7  ;;  %744 = vmatpush1.bf16.msra.mxu1 %v6763_v8  ;;  %v6781_v20 = vld [vmem:[#allocation7 + $0x88] ss:$16 sps:$4 sm:$0xff]   ;;  %v6782_v21 = vld [vmem:[#allocation7 + $0xa4] ss:$16 sps:$4 sm:$0xff]   ;;  %v6784_v22 = vld [vmem:[#allocation7 + $0xac] ss:$16 sps:$4 sm:$0xff]  }
  0x94   : > { %632 = vmatprep.subr.bf16.mxu0 %v6764_v9  ;;  %745 = vmatprep.subr.bf16.mxu1 %v6766_v10  ;;  %v6786_v23 = vld [vmem:[#allocation7 + $0xa0] ss:$16 sps:$4 sm:$0xff]   ;;  %v6787_v24 = vld [vmem:[#allocation7 + $0xa8] ss:$16 sps:$4 sm:$0xff]   ;;  %v6788_v25 = vld [vmem:[#allocation7 + $0xc4] ss:$16 sps:$4 sm:$0xff]   ;;  %v448_v10 = vlaneseq }
  0x95   : > { %v6790_v26 = vld [vmem:[#allocation7 + $0xcc] ss:$16 sps:$4 sm:$0xff]   ;;  %v6792_v27 = vld [vmem:[#allocation7 + $0xc0] ss:$16 sps:$4 sm:$0xff]   ;;  %v6793_v28 = vld [vmem:[#allocation7 + $0xc8] ss:$16 sps:$4 sm:$0xff]  }
  0x96   : > { %v6794_v29 = vld [vmem:[#allocation7 + $0xe4] ss:$16 sps:$4 sm:$0xff]   ;;  %v6796_v30 = vld [vmem:[#allocation7 + $0xec] ss:$16 sps:$4 sm:$0xff]   ;;  %v6798_v31 = vld [vmem:[#allocation7 + $0xe0] ss:$16 sps:$4 sm:$0xff]  }
  0x97   : > { %633 = vmatpush1.bf16.msra.mxu0 %v6768_v11  ;;  %746 = vmatpush1.bf16.msra.mxu1 %v6769_v12  ;;  %v6799_v32 = vld [vmem:[#allocation7 + $0xe8] ss:$16 sps:$4 sm:$0xff]   ;;  %v7944_v33 = vld [vmem:[#allocation9 + $0x4] ss:$16 sps:$4 sm:$0xff]   ;;  %v7946_v34 = vld [vmem:[#allocation9 + $0xc] ss:$16 sps:$4 sm:$0xff]  }
  0x98   : > { %634 = vmatprep.subr.bf16.mxu0 %v6770_v13  ;;  %747 = vmatprep.subr.bf16.mxu1 %v6772_v14  ;;  %v6335_v35 = vld [vmem:[%s7928_s15] sm:$0xff]   ;;  %v7955_v38 = vld [vmem:[#allocation9 + $0x8] ss:$16 sps:$4 sm:$0xff]   ;;  %v7957_v39 = vld [vmem:[#allocation9 + $0x2c] ss:$16 sps:$4 sm:$0xff]   ;;  %v8102_v11 = vshrl.u32 %v448_v10, 7 }
  0x99   : > { %v7949_v36 = vld [vmem:[#allocation9] ss:$16 sps:$4 sm:$0xff]   ;;  %v7952_v37 = vld [vmem:[#allocation9 + $0x24] ss:$16 sps:$4 sm:$0xff]   ;;  %v7968_v42 = vld [vmem:[#allocation9 + $0x28] ss:$16 sps:$4 sm:$0xff]  }
  0x9a   : > { %v7961_v40 = vld [vmem:[#allocation9 + $0x20] ss:$16 sps:$4 sm:$0xff]   ;;  %v7965_v41 = vld [vmem:[#allocation9 + $0x44] ss:$16 sps:$4 sm:$0xff]   ;;  %v6366_v43 = vld [vmem:[%s7928_s15 + $0x8] sm:$0xff]   ;;  %v450_v12 = vsub.s32 0, %v8102_v11 }
  0x9b   : > { %635 = vmatpush1.bf16.msra.mxu0 %v6774_v15  ;;  %748 = vmatpush1.bf16.msra.mxu1 %v6775_v16  ;;  %v7973_v44 = vld [vmem:[#allocation9 + $0x40] ss:$16 sps:$4 sm:$0xff]   ;;  %v7976_v45 = vld [vmem:[#allocation9 + $0x4c] ss:$16 sps:$4 sm:$0xff]   ;;  %v7978_v46 = vld [vmem:[#allocation9 + $0x64] ss:$16 sps:$4 sm:$0xff]  }
  0x9c   : > { %636 = vmatprep.subr.bf16.mxu0 %v6776_v17  ;;  %749 = vmatprep.subr.bf16.mxu1 %v6778_v18  ;;  %v7981_v47 = vld [vmem:[#allocation9 + $0x48] ss:$16 sps:$4 sm:$0xff]   ;;  %v7983_v48 = vld [vmem:[#allocation9 + $0x6c] ss:$16 sps:$4 sm:$0xff]   ;;  %v7987_v49 = vld [vmem:[#allocation9 + $0x60] ss:$16 sps:$4 sm:$0xff]  }
  0x9d   : > { %v7991_v50 = vld [vmem:[#allocation9 + $0x84] ss:$16 sps:$4 sm:$0xff]   ;;  %v7993_v51 = vld [vmem:[#allocation9 + $0x68] ss:$16 sps:$4 sm:$0xff]   ;;  %v7998_v53 = vld [vmem:[#allocation9 + $0x80] ss:$16 sps:$4 sm:$0xff]  }
  0x9e   : > { %v6367_v52 = vld [vmem:[%s7928_s15 + $0x10] sm:$0xff]   ;;  %v8001_v54 = vld [vmem:[#allocation9 + $0x8c] ss:$16 sps:$4 sm:$0xff]   ;;  %v8005_v56 = vld [vmem:[#allocation9 + $0x88] ss:$16 sps:$4 sm:$0xff]   ;;  %v9183_v14 = vsub.s32 1, %v8102_v11 }
  0x9f   : > { %637 = vmatpush1.bf16.msra.mxu0 %v6780_v19  ;;  %750 = vmatpush1.bf16.msra.mxu1 %v6781_v20  ;;  %v8003_v55 = vld [vmem:[#allocation9 + $0xa4] ss:$16 sps:$4 sm:$0xff]   ;;  %v8008_v57 = vld [vmem:[#allocation9 + $0xac] ss:$16 sps:$4 sm:$0xff]   ;;  %v8012_v58 = vld [vmem:[#allocation9 + $0xa0] ss:$16 sps:$4 sm:$0xff]  }
  0xa0   : > { %638 = vmatprep.subr.bf16.mxu0 %v6782_v21  ;;  %751 = vmatprep.subr.bf16.mxu1 %v6784_v22  ;;  %v8016_v59 = vld [vmem:[#allocation9 + $0xc4] ss:$16 sps:$4 sm:$0xff]   ;;  %v8018_v60 = vld [vmem:[#allocation9 + $0xa8] ss:$16 sps:$4 sm:$0xff]   ;;  %v8025_v62 = vld [vmem:[#allocation9 + $0xc0] ss:$16 sps:$4 sm:$0xff]  }
  0xa1   : > { %v6368_v61 = vld [vmem:[%s7928_s15 + $0x18] sm:$0xff]   ;;  %v8030_v1 = vld [vmem:[#allocation9 + $0xe4] ss:$16 sps:$4 sm:$0xff]   ;;  %v8039_v4 = vld [vmem:[#allocation9 + $0xe0] ss:$16 sps:$4 sm:$0xff]   ;;  %v9182_v19 = vsub.s32 3, %v8102_v11 }
  0xa2   : > { %v8028_v63 = vld [vmem:[#allocation9 + $0xcc] ss:$16 sps:$4 sm:$0xff]   ;;  %v8032_v2 = vld [vmem:[#allocation9 + $0xc8] ss:$16 sps:$4 sm:$0xff]   ;;  %v6369_v6 = vld [vmem:[%s7928_s15 + $0x20] sm:$0xff]   ;;  %s5868_s20 = sshll.u32 %s7924_s19, 4 }
  0xa3   : > { %639 = vmatpush1.bf16.msra.mxu0 %v6786_v23  ;;  %752 = vmatpush1.bf16.msra.mxu1 %v6787_v24  ;;  %v8035_v3 = vld [vmem:[#allocation9 + $0xec] ss:$16 sps:$4 sm:$0xff]   ;;  %v8043_v5 = vld [vmem:[#allocation9 + $0xe8] ss:$16 sps:$4 sm:$0xff]   ;;  %v6371_v8 = vld [vmem:[%s7928_s15 + $0x30] sm:$0xff]   ;;  %s338_s16 = scalar_lea.vmem [#allocation12], %s5868_s20 }
  0xa4   : > { %640 = vmatprep.subr.bf16.mxu0 %v6788_v25  ;;  %753 = vmatprep.subr.bf16.mxu1 %v6790_v26  ;;  %v6370_v7 = vld [vmem:[%s7928_s15 + $0x28] sm:$0xff]   ;;  %v6372_v9 = vld [vmem:[%s7928_s15 + $0x38] sm:$0xff]   ;;  %v390_v13 = vld [vmem:[%s9169_s3] sm:$0xf]  ;;  %s5750_s17 = sshll.u32 %s338_s16, 4  ;;  %s6333_s18 = sshll.u32 %s7779_s25, 8  ;;  %s9117_s17 = int_to_ptr.vmem [resolvable:$true] %s5750_s17 }
  0xa5   : > { %v8111_v15 = vrot.slane %v390_v13, %v450_v12  ;;  %v8115_v16 = vrot.slane %v390_v13, %v9183_v14  ;;  %s9122_s30 = scalar_lea.hbm %s9172_s6, %s6333_s18  ;;  %s5737_s14 = scalar_lea.sflag [#allocation6], %s7924_s19 }
  0xa6   : > { %s7628_s25 = scalar_lea.vmem %s9117_s17, 256  ;;  %p9206_p7 = scmp.ne.s32.totalorder %s9189_s9, 0 }
  0xa7   : > { %641 = vmatpush1.bf16.msra.mxu0 %v6792_v27  ;;  %754 = vmatpush1.bf16.msra.mxu1 %v6793_v28  ;;  %v9181_v27 = vsub.s32 2, %v8102_v11  ;;  %p7629_p0 = scmp.ne.s32.totalorder %s9117_s17, %s7628_s25  ;;  %s7720_s10 = smov [#allocation12]  }
  0xa8   : > { %642 = vmatprep.subr.bf16.mxu0 %v6794_v29  ;;  %755 = vmatprep.subr.bf16.mxu1 %v6796_v30  ;;  %s7632_s26 = sshll.u32 %s7720_s10, 4  ;;  %s7633_s26 = int_to_ptr.vmem [resolvable:$false] %s7632_s26 }
  0xa9   : > { %p7630_p8 = pnand %p7629_p0, %p9206_p7  ;;  %s7634_s29 = scalar_lea.vmem %s7633_s26, 512 }
  0xaa   : > { %p7635_p10 = scmp.lt.s32.totalorder %s9117_s17, %s7633_s26  ;;  %p7636_p1 = scmp.lt.s32.totalorder %s7634_s29, %s7628_s25 }
  0xab   : > { %643 = vmatpush1.bf16.msra.mxu0 %v6798_v31  ;;  %756 = vmatpush1.bf16.msra.mxu1 %v6799_v32  ;;  %v8124_v32 = vrot.slane %v390_v13, %v9182_v19  ;;  %p7631_p9 = pneg %p7630_p8 }
  0xac   : > { %1118 = vmatprep.subr.bf16.mxu0 %v7944_v33  ;;  %1161 = vmatprep.subr.bf16.mxu1 %v7946_v34  ;;  %p7637_p2 = por %p7636_p1, %p7635_p10 }
  0xae   : > { %661 = vmatmul.mubr.bf16.vlgmr.msra.gmra.mrb[0].mxu0 %v6335_v35  ;;  %774 = vmatmul.mubr.bf16.vlgmr.msra.gmra.mrb[0].mxu1 %v6335_v35  ;;  %p7638_p3 = pnand %p7637_p2, %p7631_p9 }
  0xaf   : > { %1119 = vmatpush1.bf16.msra.mxu0 %v7949_v36  ;;  %670 = vmatprep.mubr.bf16.mxu0 %v7717_v0 }
  0xb0   : > { %783 = vmatprep.mubr.bf16.mxu1 %v7717_v0  ;;  %1120 = vmatprep.subr.bf16.mxu0 %v7952_v37 }
  0xb1   : > { %1162 = vmatpush1.bf16.msra.mxu1 %v7955_v38 }
  0xb2   : > { %1163 = vmatprep.subr.bf16.mxu1 %v7957_v39 }
  0xb3   : > { %1121 = vmatpush1.bf16.msra.mxu0 %v7961_v40 }
  0xb4   : > { %1122 = vmatprep.subr.bf16.mxu0 %v7965_v41 }
  0xb5   : > { %1164 = vmatpush1.bf16.msra.mxu1 %v7968_v42 }
  0xb6   : > { %671 = vmatmul.mubr.bf16.gmra.mrb[4].mxu0 %v6366_v43  ;;  %784 = vmatmul.mubr.bf16.gmra.mrb[4].mxu1 %v6366_v43 }
  0xb7   : > { %680 = vmatprep.mubr.bf16.mxu0 %v7717_v0  ;;  %793 = vmatprep.mubr.bf16.mxu1 %v7717_v0 }
  0xb8   : > { %1123 = vmatpush1.bf16.msra.mxu0 %v7973_v44  ;;  %1165 = vmatprep.subr.bf16.mxu1 %v7976_v45 }
  0xb9   : > { %1124 = vmatprep.subr.bf16.mxu0 %v7978_v46  ;;  %1166 = vmatpush1.bf16.msra.mxu1 %v7981_v47 }
  0xba   : > { %1167 = vmatprep.subr.bf16.mxu1 %v7983_v48 }
  0xbc   : > { %1125 = vmatpush1.bf16.msra.mxu0 %v7987_v49 }
  0xbd   : > { %1126 = vmatprep.subr.bf16.mxu0 %v7991_v50  ;;  %1168 = vmatpush1.bf16.msra.mxu1 %v7993_v51 }
  0xbe   : > { %681 = vmatmul.mubr.bf16.gmra.mrb[8].mxu0 %v6367_v52  ;;  %794 = vmatmul.mubr.bf16.gmra.mrb[8].mxu1 %v6367_v52 }
  0xbf   : > { %690 = vmatprep.mubr.bf16.mxu0 %v7717_v0  ;;  %803 = vmatprep.mubr.bf16.mxu1 %v7717_v0 }
  0xc0   : > { %1127 = vmatpush1.bf16.msra.mxu0 %v7998_v53  ;;  %1169 = vmatprep.subr.bf16.mxu1 %v8001_v54 }
  0xc1   : > { %1128 = vmatprep.subr.bf16.mxu0 %v8003_v55  ;;  %1170 = vmatpush1.bf16.msra.mxu1 %v8005_v56 }
  0xc2   : > { %1171 = vmatprep.subr.bf16.mxu1 %v8008_v57 }
  0xc4   : > { %1129 = vmatpush1.bf16.msra.mxu0 %v8012_v58 }
  0xc5   : > { %1130 = vmatprep.subr.bf16.mxu0 %v8016_v59  ;;  %1172 = vmatpush1.bf16.msra.mxu1 %v8018_v60 }
  0xc6   : > { %691 = vmatmul.mubr.bf16.gmra.mrb[12].mxu0 %v6368_v61  ;;  %804 = vmatmul.mubr.bf16.gmra.mrb[12].mxu1 %v6368_v61  ;;  %v8129_v61 = vrot.slane %v390_v13, %v9181_v27 }
  0xc7   : > { %700 = vmatprep.mubr.bf16.mxu0 %v7717_v0  ;;  %813 = vmatprep.mubr.bf16.mxu1 %v7717_v0 }
  0xc8   : > { %1131 = vmatpush1.bf16.msra.mxu0 %v8025_v62  ;;  %1173 = vmatprep.subr.bf16.mxu1 %v8028_v63 }
  0xc9   : > { %1132 = vmatprep.subr.bf16.mxu0 %v8030_v1  ;;  %1174 = vmatpush1.bf16.msra.mxu1 %v8032_v2 }
  0xca   : > { %1175 = vmatprep.subr.bf16.mxu1 %v8035_v3 }
  0xcc   : > { %1133 = vmatpush1.bf16.msra.mxu0 %v8039_v4 }
  0xcd   : > { %1176 = vmatpush1.bf16.msra.mxu1 %v8043_v5  ;;  %1464 = vmatprep.subr.bf16.mxu0 %v7944_v33 }
  0xce   : > { %701 = vmatmul.mubr.bf16.gmra.mrb[16].mxu0 %v6369_v6  ;;  %814 = vmatmul.mubr.bf16.gmra.mrb[16].mxu1 %v6369_v6 }
  0xcf   : > { %710 = vmatprep.mubr.bf16.mxu0 %v7717_v0  ;;  %823 = vmatprep.mubr.bf16.mxu1 %v7717_v0 }
  0xd0   : > { %1507 = vmatprep.subr.bf16.mxu1 %v7946_v34 }
  0xd6   : > { %711 = vmatmul.mubr.bf16.gmra.mrb[20].mxu0 %v6370_v7  ;;  %824 = vmatmul.mubr.bf16.gmra.mrb[20].mxu1 %v6370_v7 }
  0xd7   : > { %720 = vmatprep.mubr.bf16.mxu0 %v7717_v0  ;;  %833 = vmatprep.mubr.bf16.mxu1 %v7717_v0 }
  0xde   : > { %721 = vmatmul.mubr.bf16.gmra.mrb[24].mxu0 %v6371_v8  ;;  %834 = vmatmul.mubr.bf16.gmra.mrb[24].mxu1 %v6371_v8 }
  0xdf   : > { %730 = vmatprep.mubr.bf16.mxu0 %v7717_v0  ;;  %843 = vmatprep.mubr.bf16.mxu1 %v7717_v0 }
  0xe6   : > { %731 = vmatmul.mubr.bf16.gmra.mrb[28].mxu0 %v6372_v9  ;;  %844 = vmatmul.mubr.bf16.gmra.mrb[28].mxu1 %v6372_v9 }
  0xe7   : > { %1150 = vmatprep.mubr.bf16.mxu0 %v7717_v0  ;;  %1193 = vmatprep.mubr.bf16.mxu1 %v7717_v0 }
  0xee   : > { %1151 = vmatmul.mubr.bf16.vlgmr.msra.gmra.mrb[0].mxu0 %v7717_v0  ;;  %1194 = vmatmul.mubr.bf16.vlgmr.msra.gmra.mrb[0].mxu1 %v7717_v0 }
  0xef   : > { %1465 = vmatpush1.bf16.msra.mxu0 %v7949_v36  ;;  %1508 = vmatpush1.bf16.msra.mxu1 %v7955_v38 }
  0xf0   : > { %1466 = vmatprep.subr.bf16.mxu0 %v7952_v37  ;;  %1509 = vmatprep.subr.bf16.mxu1 %v7957_v39 }
  0xf1   : > { %1496 = vmatprep.mubr.bf16.mxu0 %v7717_v0  ;;  %1539 = vmatprep.mubr.bf16.mxu1 %v7717_v0 }
  0xf3   : > { %1467 = vmatpush1.bf16.msra.mxu0 %v7961_v40  ;;  %1510 = vmatpush1.bf16.msra.mxu1 %v7968_v42 }
  0xf4   : > { %1468 = vmatprep.subr.bf16.mxu0 %v7965_v41  ;;  %1511 = vmatprep.subr.bf16.mxu1 %v7976_v45 }
  0xf7   : > { %1469 = vmatpush1.bf16.msra.mxu0 %v7973_v44  ;;  %1512 = vmatpush1.bf16.msra.mxu1 %v7981_v47 }
  0xf8   : > { %1470 = vmatprep.subr.bf16.mxu0 %v7978_v46  ;;  %1513 = vmatprep.subr.bf16.mxu1 %v7983_v48 }
  0xfb   : > { %1471 = vmatpush1.bf16.msra.mxu0 %v7987_v49  ;;  %1514 = vmatpush1.bf16.msra.mxu1 %v7993_v51 }
  0xfc   : > { %1472 = vmatprep.subr.bf16.mxu0 %v7991_v50  ;;  %1515 = vmatprep.subr.bf16.mxu1 %v8001_v54 }
  0xff   : > { %1473 = vmatpush1.bf16.msra.mxu0 %v7998_v53  ;;  %1516 = vmatpush1.bf16.msra.mxu1 %v8005_v56 }
 0x100   : > { %1474 = vmatprep.subr.bf16.mxu0 %v8003_v55  ;;  %1517 = vmatprep.subr.bf16.mxu1 %v8008_v57 }
 0x103   : > { %1475 = vmatpush1.bf16.msra.mxu0 %v8012_v58  ;;  %1518 = vmatpush1.bf16.msra.mxu1 %v8018_v60 }
 0x104   : > { %1476 = vmatprep.subr.bf16.mxu0 %v8016_v59  ;;  %1519 = vmatprep.subr.bf16.mxu1 %v8028_v63 }
 0x107   : > { %1477 = vmatpush1.bf16.msra.mxu0 %v8025_v62  ;;  %1520 = vmatpush1.bf16.msra.mxu1 %v8032_v2 }
 0x108   : > { %1478 = vmatprep.subr.bf16.mxu0 %v8030_v1  ;;  %1521 = vmatprep.subr.bf16.mxu1 %v8035_v3 }
 0x10b   : > { %1479 = vmatpush1.bf16.msra.mxu0 %v8039_v4  ;;  %1522 = vmatpush1.bf16.msra.mxu1 %v8043_v5 }
 0x10c   : > { %1811 = vmatprep.subr.bf16.mxu0 %v7944_v33  ;;  %1854 = vmatprep.subr.bf16.mxu1 %v7946_v34 }
 0x1c1   : > { %v1152_v17 = vpop.f32.mrb[0].mxu0  ;;  %v1195_v18 = vpop.f32.mrb[0].mxu1 }
 0x1c2   : > { %v6402_v20 = vadd.f32 %v1152_v17, %v8111_v15  ;;  %v1154_v21 = vpop.f32.mrb[1].mxu0  ;;  %v1197_v22 = vpop.f32.mrb[1].mxu1  ;;  %v6434_v7 = vadd.f32 %v1195_v18, %v8129_v61 }
 0x1c3   : > { %v6403_v23 = vadd.f32 %v1154_v21, %v8115_v16  ;;  %v1156_v24 = vpop.f32.mrb[2].mxu0  ;;  %v1199_v25 = vpop.f32.mrb[2].mxu1  ;;  %v6435_v6 = vadd.f32 %v1197_v22, %v8124_v32 }
 0x1c4   : > { %v5933_v26 = vmul.f32 -1.442695, %v6402_v20  ;;  %v6404_v28 = vadd.f32 %v1156_v24, %v8111_v15  ;;  %v1158_v29 = vpop.f32.mrb[3].mxu0  ;;  %v1201_v30 = vpop.f32.mrb[3].mxu1  ;;  %v6436_v10 = vadd.f32 %v1199_v25, %v8129_v61 }
 0x1c5   : > { %v5935_v31 = vmul.f32 -1.442695, %v6403_v23  ;;  %v6405_v35 = vadd.f32 %v1158_v29, %v8115_v16  ;;  %v5937_v8 = vmul.f32 -1.442695, %v6435_v6  ;;  %v6437_v9 = vadd.f32 %v1201_v30, %v8124_v32 }
 0x1c6   : > { %7000 = vpow2.f32 %v5933_v26  ;;  %v5934_v43 = vmul.f32 -1.442695, %v6404_v28 }
 0x1c7   : > { %7002 = vpow2.f32 %v5935_v31  ;;  %v5936_v52 = vmul.f32 -1.442695, %v6405_v35  ;;  %v5938_v23 = vmul.f32 -1.442695, %v6437_v9 }
 0x1c8   : > { %7004 = vpow2.f32 %v5934_v43 }
 0x1c9   : > { %7006 = vpow2.f32 %v5936_v52 }
 0x1ca   : > { %7008 = vtanh.f32 %v6434_v7 }
 0x1cb   : > { %7010 = vpow2.f32 %v5937_v8 }
 0x1cc   : > { %7012 = vtanh.f32 %v6436_v10 }
 0x1d0   : > { %v7001_v17 = vpop.eup %7000 }
 0x1d1   : > { %v7003_v20 = vpop.eup %7002  ;;  %v1218_v21 = vadd.f32 1.0, %v7001_v17 }
 0x1d2   : > { %v1230_v24 = vadd.f32 1.0, %v7003_v20  ;;  %v7005_v13 = vpop.eup %7004 }
 0x1d3   : > { %7014 = vrcp.f32 %v1218_v21  ;;  %v1219_v22 = vadd.f32 1.0, %v7005_v13  ;;  %v7007_v26 = vpop.eup %7006 }
 0x1d4   : > { %7016 = vrcp.f32 %v1230_v24  ;;  %v1231_v18 = vadd.f32 1.0, %v7007_v26  ;;  %v7009_v28 = vpop.eup %7008 }
 0x1d5   : > { %7018 = vpow2.f32 %v5938_v23  ;;  %v7011_v29 = vpop.eup %7010 }
 0x1d6   : > { %7020 = vrcp.f32 %v1219_v22  ;;  %v7013_v25 = vpop.eup %7012  ;;  %v1244_v7 = vadd.f32 1.0, %v7011_v29 }
 0x1d7   : > { %7022 = vrcp.f32 %v1231_v18 }
 0x1d8   : > { %7024 = vrcp.f32 %v1244_v7 }
 0x1dd   : > { %v7015_v30 = vpop.eup %7014 }
 0x1de   : > { %v7017_v31 = vpop.eup %7016  ;;  %v1252_v35 = vmul.f32 %v7015_v30, %v7009_v28 }
 0x1df   : > { %v7019_v43 = vpop.eup %7018  ;;  %v1250_v52 = vmul.f32 0.0, %v7017_v31 }
 0x1e0   : > { %v7021_v6 = vpop.eup %7020  ;;  %v1245_v17 = vadd.f32 1.0, %v7019_v43 }
 0x1e1   : > { %v8135_v8 = vadd.f32 %v1252_v35, %v1250_v52  ;;  %v1253_v9 = vmul.f32 %v7021_v6, %v7013_v25  ;;  %v7023_v10 = vpop.eup %7022 }
 0x1e2   : > { %v1251_v20 = vmul.f32 0.0, %v7023_v10  ;;  %v7025_v23 = vpop.eup %7024 }
 0x1e3   : > { %7026 = vtanh.f32 %v8135_v8 }
 0x1e4   : > { %v8138_v21 = vadd.f32 %v1253_v9, %v1251_v20  ;;  %7028 = vrcp.f32 %v1245_v17 }
 0x1e6   : > { %7030 = vtanh.f32 %v8138_v21 }
 0x1ed   : > { %v7027_v24 = vpop.eup %7026 }
 0x1ee   : > { %v7029_v13 = vpop.eup %7028  ;;  %v1258_v26 = vmul.f32 %v7027_v24, %v7025_v23 }
 0x1f0   : > { %v7031_v22 = vpop.eup %7030 }
 0x1f1   : > { %v1259_v18 = vmul.f32 %v7031_v22, %v7029_v13 }
 0x1f3   : > { %v8141_v28 = vpack.c.bf16 %v1259_v18, %v1258_v26 }
 0x1f5   : > { %1497 = vmatmul.mubr.bf16.vlgmr.msra.gmra.mrb[4].mxu0 %v8141_v28  ;;  %1540 = vmatmul.mubr.bf16.vlgmr.msra.gmra.mrb[4].mxu1 %v8141_v28 }
 0x1f6   : > { %1812 = vmatpush1.bf16.msra.mxu0 %v7949_v36  ;;  %1855 = vmatpush1.bf16.msra.mxu1 %v7955_v38 }
 0x1f7   : > { %1813 = vmatprep.subr.bf16.mxu0 %v7952_v37  ;;  %1856 = vmatprep.subr.bf16.mxu1 %v7957_v39 }
 0x1f8   : > { %1843 = vmatprep.mubr.bf16.mxu0 %v7717_v0  ;;  %1886 = vmatprep.mubr.bf16.mxu1 %v7717_v0 }
 0x1fa   : > { %1814 = vmatpush1.bf16.msra.mxu0 %v7961_v40  ;;  %1857 = vmatpush1.bf16.msra.mxu1 %v7968_v42 }
 0x1fb   : > { %1815 = vmatprep.subr.bf16.mxu0 %v7965_v41  ;;  %1858 = vmatprep.subr.bf16.mxu1 %v7976_v45 }
 0x1fe   : > { %1816 = vmatpush1.bf16.msra.mxu0 %v7973_v44  ;;  %1859 = vmatpush1.bf16.msra.mxu1 %v7981_v47 }
 0x1ff   : > { %1817 = vmatprep.subr.bf16.mxu0 %v7978_v46  ;;  %1860 = vmatprep.subr.bf16.mxu1 %v7983_v48 }
 0x202   : > { %1818 = vmatpush1.bf16.msra.mxu0 %v7987_v49  ;;  %1861 = vmatpush1.bf16.msra.mxu1 %v7993_v51 }
 0x203   : > { %1819 = vmatprep.subr.bf16.mxu0 %v7991_v50  ;;  %1862 = vmatprep.subr.bf16.mxu1 %v8001_v54 }
 0x206   : > { %1820 = vmatpush1.bf16.msra.mxu0 %v7998_v53  ;;  %1863 = vmatpush1.bf16.msra.mxu1 %v8005_v56 }
 0x207   : > { %1821 = vmatprep.subr.bf16.mxu0 %v8003_v55  ;;  %1864 = vmatprep.subr.bf16.mxu1 %v8008_v57 }
 0x20a   : > { %1822 = vmatpush1.bf16.msra.mxu0 %v8012_v58  ;;  %1865 = vmatpush1.bf16.msra.mxu1 %v8018_v60 }
 0x20b   : > { %1823 = vmatprep.subr.bf16.mxu0 %v8016_v59  ;;  %1866 = vmatprep.subr.bf16.mxu1 %v8028_v63 }
 0x20e   : > { %1824 = vmatpush1.bf16.msra.mxu0 %v8025_v62  ;;  %1867 = vmatpush1.bf16.msra.mxu1 %v8032_v2 }
 0x20f   : > { %1825 = vmatprep.subr.bf16.mxu0 %v8030_v1  ;;  %1868 = vmatprep.subr.bf16.mxu1 %v8035_v3 }
 0x212   : > { %1826 = vmatpush1.bf16.msra.mxu0 %v8039_v4  ;;  %1869 = vmatpush1.bf16.msra.mxu1 %v8043_v5 }
 0x213   : > { %2158 = vmatprep.subr.bf16.mxu0 %v7944_v33  ;;  %2201 = vmatprep.subr.bf16.mxu1 %v7946_v34 }
 0x2c8   : > { %v1498_v29 = vpop.f32.mrb[4].mxu0  ;;  %v1541_v25 = vpop.f32.mrb[4].mxu1 }
 0x2c9   : > { %v6406_v30 = vadd.f32 %v1498_v29, %v8111_v15  ;;  %v1500_v31 = vpop.f32.mrb[5].mxu0  ;;  %v1543_v35 = vpop.f32.mrb[5].mxu1  ;;  %v6438_v13 = vadd.f32 %v1541_v25, %v8129_v61 }
 0x2ca   : > { %v6407_v43 = vadd.f32 %v1500_v31, %v8115_v16  ;;  %v1502_v52 = vpop.f32.mrb[6].mxu0  ;;  %v1545_v6 = vpop.f32.mrb[6].mxu1  ;;  %v6439_v24 = vadd.f32 %v1543_v35, %v8124_v32 }
 0x2cb   : > { %v5971_v7 = vmul.f32 -1.442695, %v6406_v30  ;;  %v6408_v9 = vadd.f32 %v1502_v52, %v8111_v15  ;;  %v1504_v10 = vpop.f32.mrb[7].mxu0  ;;  %v1547_v17 = vpop.f32.mrb[7].mxu1  ;;  %v6440_v18 = vadd.f32 %v1545_v6, %v8129_v61 }
 0x2cc   : > { %v5973_v20 = vmul.f32 -1.442695, %v6407_v43  ;;  %v6409_v33 = vadd.f32 %v1504_v10, %v8115_v16  ;;  %v5975_v22 = vmul.f32 -1.442695, %v6439_v24  ;;  %v6441_v26 = vadd.f32 %v1547_v17, %v8124_v32 }
 0x2cd   : > { %7032 = vpow2.f32 %v5971_v7  ;;  %v5972_v34 = vmul.f32 -1.442695, %v6408_v9 }
 0x2ce   : > { %7034 = vpow2.f32 %v5973_v20  ;;  %v5974_v23 = vmul.f32 -1.442695, %v6409_v33  ;;  %v5976_v43 = vmul.f32 -1.442695, %v6441_v26 }
 0x2cf   : > { %7036 = vpow2.f32 %v5972_v34 }
 0x2d0   : > { %7038 = vpow2.f32 %v5974_v23 }
 0x2d1   : > { %7040 = vtanh.f32 %v6438_v13 }
 0x2d2   : > { %7042 = vpow2.f32 %v5975_v22 }
 0x2d3   : > { %7044 = vtanh.f32 %v6440_v18 }
 0x2d7   : > { %v7033_v29 = vpop.eup %7032 }
 0x2d8   : > { %v7035_v30 = vpop.eup %7034  ;;  %v1564_v31 = vadd.f32 1.0, %v7033_v29 }
 0x2d9   : > { %v1576_v52 = vadd.f32 1.0, %v7035_v30  ;;  %v7037_v7 = vpop.eup %7036 }
 0x2da   : > { %7046 = vrcp.f32 %v1564_v31  ;;  %v1565_v35 = vadd.f32 1.0, %v7037_v7  ;;  %v7039_v9 = vpop.eup %7038 }
 0x2db   : > { %7048 = vrcp.f32 %v1576_v52  ;;  %v1577_v25 = vadd.f32 1.0, %v7039_v9  ;;  %v7041_v10 = vpop.eup %7040 }
 0x2dc   : > { %7050 = vpow2.f32 %v5976_v43  ;;  %v7043_v17 = vpop.eup %7042 }
 0x2dd   : > { %7052 = vrcp.f32 %v1565_v35  ;;  %v7045_v6 = vpop.eup %7044  ;;  %v1590_v22 = vadd.f32 1.0, %v7043_v17 }
 0x2de   : > { %7054 = vrcp.f32 %v1577_v25 }
 0x2df   : > { %7056 = vrcp.f32 %v1590_v22 }
 0x2e4   : > { %v7047_v20 = vpop.eup %7046 }
 0x2e5   : > { %v7049_v33 = vpop.eup %7048  ;;  %v1598_v34 = vmul.f32 %v7047_v20, %v7041_v10 }
 0x2e6   : > { %v7051_v23 = vpop.eup %7050  ;;  %v1596_v24 = vmul.f32 %v7049_v33, %v8135_v8 }
 0x2e7   : > { %v7053_v13 = vpop.eup %7052  ;;  %v1591_v30 = vadd.f32 1.0, %v7051_v23 }
 0x2e8   : > { %v8188_v26 = vadd.f32 %v1598_v34, %v1596_v24  ;;  %v1599_v18 = vmul.f32 %v7053_v13, %v7045_v6  ;;  %v7055_v29 = vpop.eup %7054 }
 0x2e9   : > { %v1597_v31 = vmul.f32 %v7055_v29, %v8138_v21  ;;  %v7057_v52 = vpop.eup %7056 }
 0x2ea   : > { %7058 = vtanh.f32 %v8188_v26 }
 0x2eb   : > { %v8192_v43 = vadd.f32 %v1599_v18, %v1597_v31  ;;  %7060 = vrcp.f32 %v1591_v30 }
 0x2ed   : > { %7062 = vtanh.f32 %v8192_v43 }
 0x2f4   : > { %v7059_v7 = vpop.eup %7058 }
 0x2f5   : > { %v7061_v8 = vpop.eup %7060  ;;  %v1604_v9 = vmul.f32 %v7059_v7, %v7057_v52 }
 0x2f7   : > { %v7063_v35 = vpop.eup %7062 }
 0x2f8   : > { %v1605_v25 = vmul.f32 %v7063_v35, %v7061_v8 }
 0x2fa   : > { %v8195_v10 = vpack.c.bf16 %v1605_v25, %v1604_v9 }
 0x2fc   : > { %1844 = vmatmul.mubr.bf16.vlgmr.msra.gmra.mrb[8].mxu0 %v8195_v10  ;;  %1887 = vmatmul.mubr.bf16.vlgmr.msra.gmra.mrb[8].mxu1 %v8195_v10 }
 0x2fd   : > { %2159 = vmatpush1.bf16.msra.mxu0 %v7949_v36  ;;  %2202 = vmatpush1.bf16.msra.mxu1 %v7955_v38 }
 0x2fe   : > { %2160 = vmatprep.subr.bf16.mxu0 %v7952_v37  ;;  %2203 = vmatprep.subr.bf16.mxu1 %v7957_v39 }
 0x2ff   : > { %2190 = vmatprep.mubr.bf16.mxu0 %v7717_v0  ;;  %2233 = vmatprep.mubr.bf16.mxu1 %v7717_v0 }
 0x301   : > { %2161 = vmatpush1.bf16.msra.mxu0 %v7961_v40  ;;  %2204 = vmatpush1.bf16.msra.mxu1 %v7968_v42 }
 0x302   : > { %2162 = vmatprep.subr.bf16.mxu0 %v7965_v41  ;;  %2205 = vmatprep.subr.bf16.mxu1 %v7976_v45 }
 0x305   : > { %2163 = vmatpush1.bf16.msra.mxu0 %v7973_v44  ;;  %2206 = vmatpush1.bf16.msra.mxu1 %v7981_v47 }
 0x306   : > { %2164 = vmatprep.subr.bf16.mxu0 %v7978_v46  ;;  %2207 = vmatprep.subr.bf16.mxu1 %v7983_v48 }
 0x309   : > { %2165 = vmatpush1.bf16.msra.mxu0 %v7987_v49  ;;  %2208 = vmatpush1.bf16.msra.mxu1 %v7993_v51 }
 0x30a   : > { %2166 = vmatprep.subr.bf16.mxu0 %v7991_v50  ;;  %2209 = vmatprep.subr.bf16.mxu1 %v8001_v54 }
 0x30d   : > { %2167 = vmatpush1.bf16.msra.mxu0 %v7998_v53  ;;  %2210 = vmatpush1.bf16.msra.mxu1 %v8005_v56 }
 0x30e   : > { %2168 = vmatprep.subr.bf16.mxu0 %v8003_v55  ;;  %2211 = vmatprep.subr.bf16.mxu1 %v8008_v57 }
 0x311   : > { %2169 = vmatpush1.bf16.msra.mxu0 %v8012_v58  ;;  %2212 = vmatpush1.bf16.msra.mxu1 %v8018_v60 }
 0x312   : > { %2170 = vmatprep.subr.bf16.mxu0 %v8016_v59  ;;  %2213 = vmatprep.subr.bf16.mxu1 %v8028_v63 }
 0x315   : > { %2171 = vmatpush1.bf16.msra.mxu0 %v8025_v62  ;;  %2214 = vmatpush1.bf16.msra.mxu1 %v8032_v2 }
 0x316   : > { %2172 = vmatprep.subr.bf16.mxu0 %v8030_v1  ;;  %2215 = vmatprep.subr.bf16.mxu1 %v8035_v3 }
 0x319   : > { %2173 = vmatpush1.bf16.msra.mxu0 %v8039_v4  ;;  %2216 = vmatpush1.bf16.msra.mxu1 %v8043_v5 }
 0x3cf   : > { %v1845_v36 = vpop.f32.mrb[8].mxu0  ;;  %v1888_v37 = vpop.f32.mrb[8].mxu1 }
 0x3d0   : > { %v6410_v38 = vadd.f32 %v1845_v36, %v8111_v15  ;;  %v1847_v39 = vpop.f32.mrb[9].mxu0  ;;  %v1890_v40 = vpop.f32.mrb[9].mxu1  ;;  %v6442_v55 = vadd.f32 %v1888_v37, %v8129_v61 }
 0x3d1   : > { %v6411_v41 = vadd.f32 %v1847_v39, %v8115_v16  ;;  %v1849_v42 = vpop.f32.mrb[10].mxu0  ;;  %v1892_v44 = vpop.f32.mrb[10].mxu1  ;;  %v6443_v54 = vadd.f32 %v1890_v40, %v8124_v32  ;;  %v8257_v39 = vld [vmem:[#allocation9] ss:$16 sps:$4 sm:$0xff]   ;;  %v8259_v40 = vld [vmem:[#allocation9 + $0x8] ss:$16 sps:$4 sm:$0xff]  }
 0x3d2   : > { %v6009_v45 = vmul.f32 -1.442695, %v6410_v38  ;;  %v6412_v46 = vadd.f32 %v1849_v42, %v8111_v15  ;;  %v1851_v47 = vpop.f32.mrb[11].mxu0  ;;  %v1894_v48 = vpop.f32.mrb[11].mxu1  ;;  %v6444_v58 = vadd.f32 %v1892_v44, %v8129_v61  ;;  %v8255_v38 = vld [vmem:[#allocation9 + $0xc] ss:$16 sps:$4 sm:$0xff]  }
 0x3d3   : > { %v6011_v49 = vmul.f32 -1.442695, %v6411_v41  ;;  %v6413_v50 = vadd.f32 %v1851_v47, %v8115_v16  ;;  %v6013_v56 = vmul.f32 -1.442695, %v6443_v54  ;;  %v6445_v57 = vadd.f32 %v1894_v48, %v8124_v32  ;;  %2548 = vmatprep.subr.bf16.mxu1 %v8255_v38  ;;  %v8265_v41 = vld [vmem:[#allocation9 + $0x24] ss:$16 sps:$4 sm:$0xff]  }
 0x3d4   : > { %7064 = vpow2.f32 %v6009_v45  ;;  %v6010_v51 = vmul.f32 -1.442695, %v6412_v46  ;;  %v8267_v42 = vld [vmem:[#allocation9 + $0x2c] ss:$16 sps:$4 sm:$0xff]   ;;  %v8269_v44 = vld [vmem:[#allocation9 + $0x20] ss:$16 sps:$4 sm:$0xff]  }
 0x3d5   : > { %7066 = vpow2.f32 %v6011_v49  ;;  %v6012_v53 = vmul.f32 -1.442695, %v6413_v50  ;;  %v6014_v63 = vmul.f32 -1.442695, %v6445_v57  ;;  %v8271_v45 = vld [vmem:[#allocation9 + $0x28] ss:$16 sps:$4 sm:$0xff]  }
 0x3d6   : > { %7068 = vpow2.f32 %v6010_v51  ;;  %v8277_v46 = vld [vmem:[#allocation9 + $0x44] ss:$16 sps:$4 sm:$0xff]   ;;  %v8279_v47 = vld [vmem:[#allocation9 + $0x4c] ss:$16 sps:$4 sm:$0xff]   ;;  %v8281_v48 = vld [vmem:[#allocation9 + $0x40] ss:$16 sps:$4 sm:$0xff]  }
 0x3d7   : > { %7070 = vpow2.f32 %v6012_v53  ;;  %v8283_v49 = vld [vmem:[#allocation9 + $0x48] ss:$16 sps:$4 sm:$0xff]   ;;  %v8289_v50 = vld [vmem:[#allocation9 + $0x64] ss:$16 sps:$4 sm:$0xff]   ;;  %v8291_v51 = vld [vmem:[#allocation9 + $0x6c] ss:$16 sps:$4 sm:$0xff]  }
 0x3d8   : > { %7072 = vtanh.f32 %v6442_v55  ;;  %v8293_v53 = vld [vmem:[#allocation9 + $0x60] ss:$16 sps:$4 sm:$0xff]   ;;  %v8295_v54 = vld [vmem:[#allocation9 + $0x68] ss:$16 sps:$4 sm:$0xff]   ;;  %v8301_v55 = vld [vmem:[#allocation9 + $0x84] ss:$16 sps:$4 sm:$0xff]  }
 0x3d9   : > { %7074 = vpow2.f32 %v6013_v56  ;;  %v8303_v56 = vld [vmem:[#allocation9 + $0x8c] ss:$16 sps:$4 sm:$0xff]   ;;  %v8305_v57 = vld [vmem:[#allocation9 + $0x80] ss:$16 sps:$4 sm:$0xff]  }
 0x3da   : > { %7076 = vtanh.f32 %v6444_v58  ;;  %v8307_v58 = vld [vmem:[#allocation9 + $0x88] ss:$16 sps:$4 sm:$0xff]  }
 0x3de   : > { %v7065_v59 = vpop.eup %7064 }
 0x3df   : > { %v7067_v60 = vpop.eup %7066  ;;  %v1911_v62 = vadd.f32 1.0, %v7065_v59  ;;  %v8311_v59 = vld [vmem:[#allocation9 + $0xa4] ss:$16 sps:$4 sm:$0xff]  }
 0x3e0   : > { %v1923_v1 = vadd.f32 1.0, %v7067_v60  ;;  %v7069_v2 = vpop.eup %7068  ;;  %v8313_v60 = vld [vmem:[#allocation9 + $0xac] ss:$16 sps:$4 sm:$0xff]  }
 0x3e1   : > { %7078 = vrcp.f32 %v1911_v62  ;;  %v1912_v3 = vadd.f32 1.0, %v7069_v2  ;;  %v7071_v4 = vpop.eup %7070  ;;  %v8317_v62 = vld [vmem:[#allocation9 + $0xa0] ss:$16 sps:$4 sm:$0xff]   ;;  %v8325_v2 = vld [vmem:[#allocation9 + $0xcc] ss:$16 sps:$4 sm:$0xff]  }
 0x3e2   : > { %7080 = vrcp.f32 %v1923_v1  ;;  %v1924_v5 = vadd.f32 1.0, %v7071_v4  ;;  %v7073_v21 = vpop.eup %7072  ;;  %v8323_v1 = vld [vmem:[#allocation9 + $0xc4] ss:$16 sps:$4 sm:$0xff]   ;;  %v8331_v4 = vld [vmem:[#allocation9 + $0xc8] ss:$16 sps:$4 sm:$0xff]  }
 0x3e3   : > { %7082 = vpow2.f32 %v6014_v63  ;;  %v7075_v17 = vpop.eup %7074  ;;  %v8319_v63 = vld [vmem:[#allocation9 + $0xa8] ss:$16 sps:$4 sm:$0xff]  }
 0x3e4   : > { %7084 = vrcp.f32 %v1912_v3  ;;  %v7077_v6 = vpop.eup %7076  ;;  %v1937_v22 = vadd.f32 1.0, %v7075_v17  ;;  %v8329_v3 = vld [vmem:[#allocation9 + $0xc0] ss:$16 sps:$4 sm:$0xff]  }
 0x3e5   : > { %7086 = vrcp.f32 %v1924_v5  ;;  %v8335_v5 = vld [vmem:[#allocation9 + $0xe4] ss:$16 sps:$4 sm:$0xff]   ;;  %v8341_v17 = vld [vmem:[#allocation9 + $0xe0] ss:$16 sps:$4 sm:$0xff]  }
 0x3e6   : > { %7088 = vrcp.f32 %v1937_v22 }
 0x3eb   : > { %v7079_v20 = vpop.eup %7078 }
 0x3ec   : > { %v7081_v33 = vpop.eup %7080  ;;  %v1945_v34 = vmul.f32 %v7079_v20, %v7073_v21  ;;  %v8337_v21 = vld [vmem:[#allocation9 + $0xec] ss:$16 sps:$4 sm:$0xff]  }
 0x3ed   : > { %v7083_v23 = vpop.eup %7082  ;;  %v1943_v24 = vmul.f32 %v7081_v33, %v8188_v26 }
 0x3ee   : > { %v7085_v13 = vpop.eup %7084  ;;  %v1938_v31 = vadd.f32 1.0, %v7083_v23 }
 0x3ef   : > { %v8240_v18 = vadd.f32 %v1945_v34, %v1943_v24  ;;  %v1946_v29 = vmul.f32 %v7085_v13, %v7077_v6  ;;  %v7087_v30 = vpop.eup %7086  ;;  %v8343_v6 = vld [vmem:[#allocation9 + $0xe8] ss:$16 sps:$4 sm:$0xff]  }
 0x3f0   : > { %v1944_v52 = vmul.f32 %v7087_v30, %v8192_v43  ;;  %v7089_v8 = vpop.eup %7088  ;;  %v8253_v43 = vld [vmem:[#allocation9 + $0x4] ss:$16 sps:$4 sm:$0xff]  }
 0x3f1   : > { %7090 = vtanh.f32 %v8240_v18  ;;  %2505 = vmatprep.subr.bf16.mxu0 %v8253_v43 }
 0x3f2   : > { %v8244_v7 = vadd.f32 %v1946_v29, %v1944_v52  ;;  %7092 = vrcp.f32 %v1938_v31 }
 0x3f4   : > { %7094 = vtanh.f32 %v8244_v7 }
 0x3fb   : > { %v7091_v35 = vpop.eup %7090 }
 0x3fc   : > { %v7093_v26 = vpop.eup %7092  ;;  %v1951_v25 = vmul.f32 %v7091_v35, %v7089_v8 }
 0x3fe   : > { %v7095_v9 = vpop.eup %7094 }
 0x3ff   : > { %v1952_v36 = vmul.f32 %v7095_v9, %v7093_v26 }
 0x401   : > { %v8247_v37 = vpack.c.bf16 %v1952_v36, %v1951_v25 }
 0x403   : > { %2191 = vmatmul.mubr.bf16.vlgmr.msra.gmra.mrb[12].mxu0 %v8247_v37  ;;  %2234 = vmatmul.mubr.bf16.vlgmr.msra.gmra.mrb[12].mxu1 %v8247_v37 }
 0x404   : > { %2537 = vmatprep.mubr.bf16.mxu0 %v7717_v0  ;;  %2580 = vmatprep.mubr.bf16.mxu1 %v7717_v0 }
 0x405   : > { %2506 = vmatpush1.bf16.msra.mxu0 %v8257_v39  ;;  %2549 = vmatpush1.bf16.msra.mxu1 %v8259_v40 }
 0x406   : > { %2507 = vmatprep.subr.bf16.mxu0 %v8265_v41  ;;  %2550 = vmatprep.subr.bf16.mxu1 %v8267_v42 }
 0x409   : > { %2508 = vmatpush1.bf16.msra.mxu0 %v8269_v44  ;;  %2551 = vmatpush1.bf16.msra.mxu1 %v8271_v45 }
 0x40a   : > { %2509 = vmatprep.subr.bf16.mxu0 %v8277_v46  ;;  %2552 = vmatprep.subr.bf16.mxu1 %v8279_v47 }
 0x40d   : > { %2510 = vmatpush1.bf16.msra.mxu0 %v8281_v48  ;;  %2553 = vmatpush1.bf16.msra.mxu1 %v8283_v49 }
 0x40e   : > { %2511 = vmatprep.subr.bf16.mxu0 %v8289_v50  ;;  %2554 = vmatprep.subr.bf16.mxu1 %v8291_v51 }
 0x411   : > { %2512 = vmatpush1.bf16.msra.mxu0 %v8293_v53  ;;  %2555 = vmatpush1.bf16.msra.mxu1 %v8295_v54 }
 0x412   : > { %2513 = vmatprep.subr.bf16.mxu0 %v8301_v55  ;;  %2556 = vmatprep.subr.bf16.mxu1 %v8303_v56 }
 0x415   : > { %2514 = vmatpush1.bf16.msra.mxu0 %v8305_v57  ;;  %2557 = vmatpush1.bf16.msra.mxu1 %v8307_v58 }
 0x416   : > { %2515 = vmatprep.subr.bf16.mxu0 %v8311_v59  ;;  %2558 = vmatprep.subr.bf16.mxu1 %v8313_v60 }
 0x419   : > { %2516 = vmatpush1.bf16.msra.mxu0 %v8317_v62  ;;  %2559 = vmatpush1.bf16.msra.mxu1 %v8319_v63 }
 0x41a   : > { %2517 = vmatprep.subr.bf16.mxu0 %v8323_v1  ;;  %2560 = vmatprep.subr.bf16.mxu1 %v8325_v2 }
 0x41d   : > { %2518 = vmatpush1.bf16.msra.mxu0 %v8329_v3  ;;  %2561 = vmatpush1.bf16.msra.mxu1 %v8331_v4 }
 0x41e   : > { %2519 = vmatprep.subr.bf16.mxu0 %v8335_v5  ;;  %2562 = vmatprep.subr.bf16.mxu1 %v8337_v21 }
 0x421   : > { %2520 = vmatpush1.bf16.msra.mxu0 %v8341_v17  ;;  %2563 = vmatpush1.bf16.msra.mxu1 %v8343_v6 }
 0x422   : > { %2852 = vmatprep.subr.bf16.mxu0 %v8253_v43  ;;  %2895 = vmatprep.subr.bf16.mxu1 %v8255_v38 }
 0x4d6   : > { %v2192_v20 = vpop.f32.mrb[12].mxu0  ;;  %v2235_v33 = vpop.f32.mrb[12].mxu1 }
 0x4d7   : > { %v6414_v34 = vadd.f32 %v2192_v20, %v8111_v15  ;;  %v2194_v23 = vpop.f32.mrb[13].mxu0  ;;  %v2237_v24 = vpop.f32.mrb[13].mxu1  ;;  %v6446_v20 = vadd.f32 %v2235_v33, %v8129_v61 }
 0x4d8   : > { %v6415_v13 = vadd.f32 %v2194_v23, %v8115_v16  ;;  %v2196_v22 = vpop.f32.mrb[14].mxu0  ;;  %v2239_v29 = vpop.f32.mrb[14].mxu1  ;;  %v6447_v36 = vadd.f32 %v2237_v24, %v8124_v32 }
 0x4d9   : > { %v6047_v30 = vmul.f32 -1.442695, %v6414_v34  ;;  %v6416_v31 = vadd.f32 %v2196_v22, %v8111_v15  ;;  %v2198_v52 = vpop.f32.mrb[15].mxu0  ;;  %v2241_v8 = vpop.f32.mrb[15].mxu1  ;;  %v6448_v22 = vadd.f32 %v2239_v29, %v8129_v61 }
 0x4da   : > { %v6049_v35 = vmul.f32 -1.442695, %v6415_v13  ;;  %v6417_v26 = vadd.f32 %v2198_v52, %v8115_v16  ;;  %v6051_v23 = vmul.f32 -1.442695, %v6447_v36  ;;  %v6449_v34 = vadd.f32 %v2241_v8, %v8124_v32 }
 0x4db   : > { %7096 = vpow2.f32 %v6047_v30  ;;  %v6048_v9 = vmul.f32 -1.442695, %v6416_v31 }
 0x4dc   : > { %7098 = vpow2.f32 %v6049_v35  ;;  %v6050_v25 = vmul.f32 -1.442695, %v6417_v26  ;;  %v6052_v30 = vmul.f32 -1.442695, %v6449_v34 }
 0x4dd   : > { %7100 = vpow2.f32 %v6048_v9 }
 0x4de   : > { %7102 = vpow2.f32 %v6050_v25 }
 0x4df   : > { %7104 = vtanh.f32 %v6446_v20 }
 0x4e0   : > { %7106 = vpow2.f32 %v6051_v23 }
 0x4e1   : > { %7108 = vtanh.f32 %v6448_v22 }
 0x4e5   : > { %v7097_v27 = vpop.eup %7096 }
 0x4e6   : > { %v7099_v13 = vpop.eup %7098  ;;  %v2258_v19 = vadd.f32 1.0, %v7097_v27 }
 0x4e7   : > { %v2270_v31 = vadd.f32 1.0, %v7099_v13  ;;  %v7101_v52 = vpop.eup %7100 }
 0x4e8   : > { %7110 = vrcp.f32 %v2258_v19  ;;  %v2259_v24 = vadd.f32 1.0, %v7101_v52  ;;  %v7103_v35 = vpop.eup %7102 }
 0x4e9   : > { %7112 = vrcp.f32 %v2270_v31  ;;  %v2271_v33 = vadd.f32 1.0, %v7103_v35  ;;  %v7105_v8 = vpop.eup %7104 }
 0x4ea   : > { %7114 = vpow2.f32 %v6052_v30  ;;  %v7107_v26 = vpop.eup %7106 }
 0x4eb   : > { %7116 = vrcp.f32 %v2259_v24  ;;  %v7109_v29 = vpop.eup %7108  ;;  %v2284_v34 = vadd.f32 1.0, %v7107_v26 }
 0x4ec   : > { %7118 = vrcp.f32 %v2271_v33 }
 0x4ed   : > { %7120 = vrcp.f32 %v2284_v34 }
 0x4f2   : > { %v7111_v9 = vpop.eup %7110 }
 0x4f3   : > { %v7113_v25 = vpop.eup %7112  ;;  %v2292_v36 = vmul.f32 %v7111_v9, %v7105_v8 }
 0x4f4   : > { %v7115_v27 = vpop.eup %7114  ;;  %v2290_v20 = vmul.f32 %v7113_v25, %v8240_v18 }
 0x4f5   : > { %v7117_v23 = vpop.eup %7116  ;;  %v2285_v31 = vadd.f32 1.0, %v7115_v27 }
 0x4f6   : > { %v8360_v22 = vadd.f32 %v2292_v36, %v2290_v20  ;;  %v2293_v19 = vmul.f32 %v7117_v23, %v7109_v29  ;;  %v7119_v13 = vpop.eup %7118 }
 0x4f7   : > { %v2291_v30 = vmul.f32 %v7119_v13, %v8244_v7  ;;  %v7121_v24 = vpop.eup %7120 }
 0x4f8   : > { %7122 = vtanh.f32 %v8360_v22 }
 0x4f9   : > { %v8364_v52 = vadd.f32 %v2293_v19, %v2291_v30  ;;  %7124 = vrcp.f32 %v2285_v31 }
 0x4fb   : > { %7126 = vtanh.f32 %v8364_v52 }
 0x502   : > { %v7123_v35 = vpop.eup %7122 }
 0x503   : > { %v7125_v18 = vpop.eup %7124  ;;  %v2298_v8 = vmul.f32 %v7123_v35, %v7121_v24 }
 0x505   : > { %v7127_v33 = vpop.eup %7126 }
 0x506   : > { %v2299_v26 = vmul.f32 %v7127_v33, %v7125_v18 }
 0x508   : > { %v8367_v9 = vpack.c.bf16 %v2299_v26, %v2298_v8 }
 0x50a   : > { %2538 = vmatmul.mubr.bf16.vlgmr.msra.gmra.mrb[16].mxu0 %v8367_v9  ;;  %2581 = vmatmul.mubr.bf16.vlgmr.msra.gmra.mrb[16].mxu1 %v8367_v9 }
 0x50b   : > { %2853 = vmatpush1.bf16.msra.mxu0 %v8257_v39  ;;  %2896 = vmatpush1.bf16.msra.mxu1 %v8259_v40 }
 0x50c   : > { %2854 = vmatprep.subr.bf16.mxu0 %v8265_v41  ;;  %2897 = vmatprep.subr.bf16.mxu1 %v8267_v42 }
 0x50d   : > { %2884 = vmatprep.mubr.bf16.mxu0 %v7717_v0  ;;  %2927 = vmatprep.mubr.bf16.mxu1 %v7717_v0 }
 0x50f   : > { %2855 = vmatpush1.bf16.msra.mxu0 %v8269_v44  ;;  %2898 = vmatpush1.bf16.msra.mxu1 %v8271_v45 }
 0x510   : > { %2856 = vmatprep.subr.bf16.mxu0 %v8277_v46  ;;  %2899 = vmatprep.subr.bf16.mxu1 %v8279_v47 }
 0x513   : > { %2857 = vmatpush1.bf16.msra.mxu0 %v8281_v48  ;;  %2900 = vmatpush1.bf16.msra.mxu1 %v8283_v49 }
 0x514   : > { %2858 = vmatprep.subr.bf16.mxu0 %v8289_v50  ;;  %2901 = vmatprep.subr.bf16.mxu1 %v8291_v51 }
 0x517   : > { %2859 = vmatpush1.bf16.msra.mxu0 %v8293_v53  ;;  %2902 = vmatpush1.bf16.msra.mxu1 %v8295_v54 }
 0x518   : > { %2860 = vmatprep.subr.bf16.mxu0 %v8301_v55  ;;  %2903 = vmatprep.subr.bf16.mxu1 %v8303_v56 }
 0x51b   : > { %2861 = vmatpush1.bf16.msra.mxu0 %v8305_v57  ;;  %2904 = vmatpush1.bf16.msra.mxu1 %v8307_v58 }
 0x51c   : > { %2862 = vmatprep.subr.bf16.mxu0 %v8311_v59  ;;  %2905 = vmatprep.subr.bf16.mxu1 %v8313_v60 }
 0x51f   : > { %2863 = vmatpush1.bf16.msra.mxu0 %v8317_v62  ;;  %2906 = vmatpush1.bf16.msra.mxu1 %v8319_v63 }
 0x520   : > { %2864 = vmatprep.subr.bf16.mxu0 %v8323_v1  ;;  %2907 = vmatprep.subr.bf16.mxu1 %v8325_v2 }
 0x523   : > { %2865 = vmatpush1.bf16.msra.mxu0 %v8329_v3  ;;  %2908 = vmatpush1.bf16.msra.mxu1 %v8331_v4 }
 0x524   : > { %2866 = vmatprep.subr.bf16.mxu0 %v8335_v5  ;;  %2909 = vmatprep.subr.bf16.mxu1 %v8337_v21 }
 0x527   : > { %2867 = vmatpush1.bf16.msra.mxu0 %v8341_v17  ;;  %2910 = vmatpush1.bf16.msra.mxu1 %v8343_v6 }
 0x528   : > { %3199 = vmatprep.subr.bf16.mxu0 %v8253_v43  ;;  %3242 = vmatprep.subr.bf16.mxu1 %v8255_v38 }
 0x5dd   : > { %v2539_v7 = vpop.f32.mrb[16].mxu0  ;;  %v2582_v29 = vpop.f32.mrb[16].mxu1 }
 0x5de   : > { %v6418_v25 = vadd.f32 %v2539_v7, %v8111_v15  ;;  %v2541_v36 = vpop.f32.mrb[17].mxu0  ;;  %v2584_v27 = vpop.f32.mrb[17].mxu1  ;;  %v6450_v26 = vadd.f32 %v2582_v29, %v8129_v61 }
 0x5df   : > { %v6419_v20 = vadd.f32 %v2541_v36, %v8115_v16  ;;  %v2543_v23 = vpop.f32.mrb[18].mxu0  ;;  %v2586_v34 = vpop.f32.mrb[18].mxu1  ;;  %v6451_v8 = vadd.f32 %v2584_v27, %v8124_v32 }
 0x5e0   : > { %v6085_v19 = vmul.f32 -1.442695, %v6418_v25  ;;  %v6420_v13 = vadd.f32 %v2543_v23, %v8111_v15  ;;  %v2545_v31 = vpop.f32.mrb[19].mxu0  ;;  %v2588_v30 = vpop.f32.mrb[19].mxu1  ;;  %v6452_v36 = vadd.f32 %v2586_v34, %v8129_v61 }
 0x5e1   : > { %v6087_v24 = vmul.f32 -1.442695, %v6419_v20  ;;  %v6421_v35 = vadd.f32 %v2545_v31, %v8115_v16  ;;  %v6089_v7 = vmul.f32 -1.442695, %v6451_v8  ;;  %v6453_v25 = vadd.f32 %v2588_v30, %v8124_v32 }
 0x5e2   : > { %7128 = vpow2.f32 %v6085_v19  ;;  %v6086_v18 = vmul.f32 -1.442695, %v6420_v13 }
 0x5e3   : > { %7130 = vpow2.f32 %v6087_v24  ;;  %v6088_v33 = vmul.f32 -1.442695, %v6421_v35  ;;  %v6090_v19 = vmul.f32 -1.442695, %v6453_v25 }
 0x5e4   : > { %7132 = vpow2.f32 %v6086_v18 }
 0x5e5   : > { %7134 = vpow2.f32 %v6088_v33 }
 0x5e6   : > { %7136 = vtanh.f32 %v6450_v26 }
 0x5e7   : > { %7138 = vpow2.f32 %v6089_v7 }
 0x5e8   : > { %7140 = vtanh.f32 %v6452_v36 }
 0x5ec   : > { %v7129_v23 = vpop.eup %7128 }
 0x5ed   : > { %v7131_v20 = vpop.eup %7130  ;;  %v2605_v14 = vadd.f32 1.0, %v7129_v23 }
 0x5ee   : > { %v2617_v13 = vadd.f32 1.0, %v7131_v20  ;;  %v7133_v31 = vpop.eup %7132 }
 0x5ef   : > { %7142 = vrcp.f32 %v2605_v14  ;;  %v2606_v27 = vadd.f32 1.0, %v7133_v31  ;;  %v7135_v24 = vpop.eup %7134 }
 0x5f0   : > { %7144 = vrcp.f32 %v2617_v13  ;;  %v2618_v29 = vadd.f32 1.0, %v7135_v24  ;;  %v7137_v30 = vpop.eup %7136 }
 0x5f1   : > { %7146 = vpow2.f32 %v6090_v19  ;;  %v7139_v35 = vpop.eup %7138 }
 0x5f2   : > { %7148 = vrcp.f32 %v2606_v27  ;;  %v7141_v34 = vpop.eup %7140  ;;  %v2631_v36 = vadd.f32 1.0, %v7139_v35 }
 0x5f3   : > { %7150 = vrcp.f32 %v2618_v29 }
 0x5f4   : > { %7152 = vrcp.f32 %v2631_v36 }
 0x5f9   : > { %v7143_v18 = vpop.eup %7142 }
 0x5fa   : > { %v7145_v33 = vpop.eup %7144  ;;  %v2639_v8 = vmul.f32 %v7143_v18, %v7137_v30 }
 0x5fb   : > { %v7147_v26 = vpop.eup %7146  ;;  %v2637_v7 = vmul.f32 %v7145_v33, %v8360_v22 }
 0x5fc   : > { %v7149_v25 = vpop.eup %7148  ;;  %v2632_v13 = vadd.f32 1.0, %v7147_v26 }
 0x5fd   : > { %v8414_v23 = vadd.f32 %v2639_v8, %v2637_v7  ;;  %v2640_v14 = vmul.f32 %v7149_v25, %v7141_v34  ;;  %v7151_v20 = vpop.eup %7150 }
 0x5fe   : > { %v2638_v19 = vmul.f32 %v7151_v20, %v8364_v52  ;;  %v7153_v27 = vpop.eup %7152 }
 0x5ff   : > { %7154 = vtanh.f32 %v8414_v23 }
 0x600   : > { %v8418_v31 = vadd.f32 %v2640_v14, %v2638_v19  ;;  %7156 = vrcp.f32 %v2632_v13 }
 0x602   : > { %7158 = vtanh.f32 %v8418_v31 }
 0x609   : > { %v7155_v24 = vpop.eup %7154 }
 0x60a   : > { %v7157_v22 = vpop.eup %7156  ;;  %v2645_v30 = vmul.f32 %v7155_v24, %v7153_v27 }
 0x60c   : > { %v7159_v29 = vpop.eup %7158 }
 0x60d   : > { %v2646_v35 = vmul.f32 %v7159_v29, %v7157_v22 }
 0x60f   : > { %v8421_v18 = vpack.c.bf16 %v2646_v35, %v2645_v30 }
 0x611   : > { %2885 = vmatmul.mubr.bf16.vlgmr.msra.gmra.mrb[20].mxu0 %v8421_v18  ;;  %2928 = vmatmul.mubr.bf16.vlgmr.msra.gmra.mrb[20].mxu1 %v8421_v18 }
 0x612   : > { %3200 = vmatpush1.bf16.msra.mxu0 %v8257_v39  ;;  %3243 = vmatpush1.bf16.msra.mxu1 %v8259_v40 }
 0x613   : > { %3201 = vmatprep.subr.bf16.mxu0 %v8265_v41  ;;  %3244 = vmatprep.subr.bf16.mxu1 %v8267_v42 }
 0x614   : > { %3231 = vmatprep.mubr.bf16.mxu0 %v7717_v0  ;;  %3274 = vmatprep.mubr.bf16.mxu1 %v7717_v0 }
 0x616   : > { %3202 = vmatpush1.bf16.msra.mxu0 %v8269_v44  ;;  %3245 = vmatpush1.bf16.msra.mxu1 %v8271_v45 }
 0x617   : > { %3203 = vmatprep.subr.bf16.mxu0 %v8277_v46  ;;  %3246 = vmatprep.subr.bf16.mxu1 %v8279_v47 }
 0x61a   : > { %3204 = vmatpush1.bf16.msra.mxu0 %v8281_v48  ;;  %3247 = vmatpush1.bf16.msra.mxu1 %v8283_v49 }
 0x61b   : > { %3205 = vmatprep.subr.bf16.mxu0 %v8289_v50  ;;  %3248 = vmatprep.subr.bf16.mxu1 %v8291_v51 }
 0x61e   : > { %3206 = vmatpush1.bf16.msra.mxu0 %v8293_v53  ;;  %3249 = vmatpush1.bf16.msra.mxu1 %v8295_v54 }
 0x61f   : > { %3207 = vmatprep.subr.bf16.mxu0 %v8301_v55  ;;  %3250 = vmatprep.subr.bf16.mxu1 %v8303_v56 }
 0x622   : > { %3208 = vmatpush1.bf16.msra.mxu0 %v8305_v57  ;;  %3251 = vmatpush1.bf16.msra.mxu1 %v8307_v58 }
 0x623   : > { %3209 = vmatprep.subr.bf16.mxu0 %v8311_v59  ;;  %3252 = vmatprep.subr.bf16.mxu1 %v8313_v60 }
 0x626   : > { %3210 = vmatpush1.bf16.msra.mxu0 %v8317_v62  ;;  %3253 = vmatpush1.bf16.msra.mxu1 %v8319_v63 }
 0x627   : > { %3211 = vmatprep.subr.bf16.mxu0 %v8323_v1  ;;  %3254 = vmatprep.subr.bf16.mxu1 %v8325_v2 }
 0x62a   : > { %3212 = vmatpush1.bf16.msra.mxu0 %v8329_v3  ;;  %3255 = vmatpush1.bf16.msra.mxu1 %v8331_v4 }
 0x62b   : > { %3213 = vmatprep.subr.bf16.mxu0 %v8335_v5  ;;  %3256 = vmatprep.subr.bf16.mxu1 %v8337_v21 }
 0x62e   : > { %3214 = vmatpush1.bf16.msra.mxu0 %v8341_v17  ;;  %3257 = vmatpush1.bf16.msra.mxu1 %v8343_v6 }
 0x62f   : > { %3546 = vmatprep.subr.bf16.mxu0 %v8253_v43  ;;  %3589 = vmatprep.subr.bf16.mxu1 %v8255_v38 }
 0x6e4   : > { %v2886_v52 = vpop.f32.mrb[20].mxu0  ;;  %v2929_v34 = vpop.f32.mrb[20].mxu1 }
 0x6e5   : > { %v6422_v33 = vadd.f32 %v2886_v52, %v8111_v15  ;;  %v2888_v8 = vpop.f32.mrb[21].mxu0  ;;  %v2931_v26 = vpop.f32.mrb[21].mxu1  ;;  %v6454_v29 = vadd.f32 %v2929_v34, %v8129_v61 }
 0x6e6   : > { %v6423_v7 = vadd.f32 %v2888_v8, %v8115_v16  ;;  %v2890_v25 = vpop.f32.mrb[22].mxu0  ;;  %v2933_v36 = vpop.f32.mrb[22].mxu1  ;;  %v6455_v22 = vadd.f32 %v2931_v26, %v8124_v32 }
 0x6e7   : > { %v6123_v14 = vmul.f32 -1.442695, %v6422_v33  ;;  %v6424_v20 = vadd.f32 %v2890_v25, %v8111_v15  ;;  %v2892_v13 = vpop.f32.mrb[23].mxu0  ;;  %v2935_v19 = vpop.f32.mrb[23].mxu1  ;;  %v6456_v52 = vadd.f32 %v2933_v36, %v8129_v61 }
 0x6e8   : > { %v6125_v27 = vmul.f32 -1.442695, %v6423_v7  ;;  %v6425_v43 = vadd.f32 %v2892_v13, %v8115_v16  ;;  %v6127_v30 = vmul.f32 -1.442695, %v6455_v22  ;;  %v6457_v35 = vadd.f32 %v2935_v19, %v8124_v32 }
 0x6e9   : > { %7160 = vpow2.f32 %v6123_v14  ;;  %v6124_v38 = vmul.f32 -1.442695, %v6424_v20 }
 0x6ea   : > { %7162 = vpow2.f32 %v6125_v27  ;;  %v6126_v24 = vmul.f32 -1.442695, %v6425_v43  ;;  %v6128_v25 = vmul.f32 -1.442695, %v6457_v35 }
 0x6eb   : > { %7164 = vpow2.f32 %v6124_v38 }
 0x6ec   : > { %7166 = vpow2.f32 %v6126_v24 }
 0x6ed   : > { %7168 = vtanh.f32 %v6454_v29 }
 0x6ee   : > { %7170 = vpow2.f32 %v6127_v30 }
 0x6ef   : > { %7172 = vtanh.f32 %v6456_v52 }
 0x6f3   : > { %v7161_v33 = vpop.eup %7160 }
 0x6f4   : > { %v7163_v8 = vpop.eup %7162  ;;  %v2952_v7 = vadd.f32 1.0, %v7161_v33 }
 0x6f5   : > { %v2964_v14 = vadd.f32 1.0, %v7163_v8  ;;  %v7165_v20 = vpop.eup %7164 }
 0x6f6   : > { %7174 = vrcp.f32 %v2952_v7  ;;  %v2953_v26 = vadd.f32 1.0, %v7165_v20  ;;  %v7167_v13 = vpop.eup %7166 }
 0x6f7   : > { %7176 = vrcp.f32 %v2964_v14  ;;  %v2965_v34 = vadd.f32 1.0, %v7167_v13  ;;  %v7169_v19 = vpop.eup %7168 }
 0x6f8   : > { %7178 = vpow2.f32 %v6128_v25  ;;  %v7171_v27 = vpop.eup %7170 }
 0x6f9   : > { %7180 = vrcp.f32 %v2953_v26  ;;  %v7173_v36 = vpop.eup %7172  ;;  %v2978_v35 = vadd.f32 1.0, %v7171_v27 }
 0x6fa   : > { %7182 = vrcp.f32 %v2965_v34 }
 0x6fb   : > { %7184 = vrcp.f32 %v2978_v35 }
 0x700   : > { %v7175_v43 = vpop.eup %7174 }
 0x701   : > { %v7177_v38 = vpop.eup %7176  ;;  %v2986_v24 = vmul.f32 %v7175_v43, %v7169_v19 }
 0x702   : > { %v7179_v22 = vpop.eup %7178  ;;  %v2984_v29 = vmul.f32 %v7177_v38, %v8414_v23 }
 0x703   : > { %v7181_v30 = vpop.eup %7180  ;;  %v2979_v7 = vadd.f32 1.0, %v7179_v22 }
 0x704   : > { %v8468_v52 = vadd.f32 %v2986_v24, %v2984_v29  ;;  %v2987_v33 = vmul.f32 %v7181_v30, %v7173_v36  ;;  %v7183_v8 = vpop.eup %7182 }
 0x705   : > { %v2985_v25 = vmul.f32 %v7183_v8, %v8418_v31  ;;  %v7185_v20 = vpop.eup %7184 }
 0x706   : > { %7186 = vtanh.f32 %v8468_v52 }
 0x707   : > { %v8472_v14 = vadd.f32 %v2987_v33, %v2985_v25  ;;  %7188 = vrcp.f32 %v2979_v7 }
 0x709   : > { %7190 = vtanh.f32 %v8472_v14 }
 0x710   : > { %v7187_v26 = vpop.eup %7186 }
 0x711   : > { %v7189_v23 = vpop.eup %7188  ;;  %v2992_v34 = vmul.f32 %v7187_v26, %v7185_v20 }
 0x713   : > { %v7191_v13 = vpop.eup %7190 }
 0x714   : > { %v2993_v19 = vmul.f32 %v7191_v13, %v7189_v23 }
 0x716   : > { %v8475_v27 = vpack.c.bf16 %v2993_v19, %v2992_v34 }
 0x718   : > { %3232 = vmatmul.mubr.bf16.vlgmr.msra.gmra.mrb[24].mxu0 %v8475_v27  ;;  %3275 = vmatmul.mubr.bf16.vlgmr.msra.gmra.mrb[24].mxu1 %v8475_v27 }
 0x719   : > { %3547 = vmatpush1.bf16.msra.mxu0 %v8257_v39  ;;  %3590 = vmatpush1.bf16.msra.mxu1 %v8259_v40  ;;  %v6898_v39 = vld [vmem:[#allocation7 + $0x104] ss:$16 sps:$4 sm:$0xff]   ;;  %v6901_v40 = vld [vmem:[#allocation7 + $0x10c] ss:$16 sps:$4 sm:$0xff]  }
 0x71a   : > { %3548 = vmatprep.subr.bf16.mxu0 %v8265_v41  ;;  %3591 = vmatprep.subr.bf16.mxu1 %v8267_v42 }
 0x71b   : > { %3578 = vmatprep.mubr.bf16.mxu0 %v7717_v0  ;;  %3621 = vmatprep.mubr.bf16.mxu1 %v7717_v0 }
 0x71d   : > { %3549 = vmatpush1.bf16.msra.mxu0 %v8269_v44  ;;  %3592 = vmatpush1.bf16.msra.mxu1 %v8271_v45 }
 0x71e   : > { %3550 = vmatprep.subr.bf16.mxu0 %v8277_v46  ;;  %3593 = vmatprep.subr.bf16.mxu1 %v8279_v47 }
 0x721   : > { %3551 = vmatpush1.bf16.msra.mxu0 %v8281_v48  ;;  %3594 = vmatpush1.bf16.msra.mxu1 %v8283_v49 }
 0x722   : > { %3552 = vmatprep.subr.bf16.mxu0 %v8289_v50  ;;  %3595 = vmatprep.subr.bf16.mxu1 %v8291_v51 }
 0x725   : > { %3553 = vmatpush1.bf16.msra.mxu0 %v8293_v53  ;;  %3596 = vmatpush1.bf16.msra.mxu1 %v8295_v54 }
 0x726   : > { %3554 = vmatprep.subr.bf16.mxu0 %v8301_v55  ;;  %3597 = vmatprep.subr.bf16.mxu1 %v8303_v56 }
 0x729   : > { %3555 = vmatpush1.bf16.msra.mxu0 %v8305_v57  ;;  %3598 = vmatpush1.bf16.msra.mxu1 %v8307_v58 }
 0x72a   : > { %3556 = vmatprep.subr.bf16.mxu0 %v8311_v59  ;;  %3599 = vmatprep.subr.bf16.mxu1 %v8313_v60 }
 0x72d   : > { %3557 = vmatpush1.bf16.msra.mxu0 %v8317_v62  ;;  %3600 = vmatpush1.bf16.msra.mxu1 %v8319_v63 }
 0x72e   : > { %3558 = vmatprep.subr.bf16.mxu0 %v8323_v1  ;;  %3601 = vmatprep.subr.bf16.mxu1 %v8325_v2 }
 0x731   : > { %3559 = vmatpush1.bf16.msra.mxu0 %v8329_v3  ;;  %3602 = vmatpush1.bf16.msra.mxu1 %v8331_v4 }
 0x732   : > { %3560 = vmatprep.subr.bf16.mxu0 %v8335_v5  ;;  %3603 = vmatprep.subr.bf16.mxu1 %v8337_v21 }
 0x735   : > { %3561 = vmatpush1.bf16.msra.mxu0 %v8341_v17  ;;  %3604 = vmatpush1.bf16.msra.mxu1 %v8343_v6 }
 0x736   : > { %3931 = vmatprep.subr.bf16.mxu0 %v6898_v39  ;;  %4044 = vmatprep.subr.bf16.mxu1 %v6901_v40 }
 0x7eb   : > { %v3233_v41 = vpop.f32.mrb[24].mxu0  ;;  %v3276_v42 = vpop.f32.mrb[24].mxu1 }
 0x7ec   : > { %v6426_v44 = vadd.f32 %v3233_v41, %v8111_v15  ;;  %v3235_v45 = vpop.f32.mrb[25].mxu0  ;;  %v3278_v46 = vpop.f32.mrb[25].mxu1  ;;  %v6458_v60 = vadd.f32 %v3276_v42, %v8129_v61 }
 0x7ed   : > { %v6427_v47 = vadd.f32 %v3235_v45, %v8115_v16  ;;  %v3237_v48 = vpop.f32.mrb[26].mxu0  ;;  %v3280_v49 = vpop.f32.mrb[26].mxu1  ;;  %v6459_v59 = vadd.f32 %v3278_v46, %v8124_v32  ;;  %v6899_v45 = vld [vmem:[#allocation7 + $0x108] ss:$16 sps:$4 sm:$0xff]  }
 0x7ee   : > { %v6161_v50 = vmul.f32 -1.442695, %v6426_v44  ;;  %v6428_v51 = vadd.f32 %v3237_v48, %v8111_v15  ;;  %v3239_v53 = vpop.f32.mrb[27].mxu0  ;;  %v3282_v54 = vpop.f32.mrb[27].mxu1  ;;  %v6460_v1 = vadd.f32 %v3280_v49, %v8129_v61  ;;  %v6896_v44 = vld [vmem:[#allocation7 + $0x100] ss:$16 sps:$4 sm:$0xff]  }
 0x7ef   : > { %v6163_v55 = vmul.f32 -1.442695, %v6427_v47  ;;  %v6429_v56 = vadd.f32 %v3239_v53, %v8115_v16  ;;  %v6165_v62 = vmul.f32 -1.442695, %v6459_v59  ;;  %v6461_v63 = vadd.f32 %v3282_v54, %v8124_v32  ;;  %v6904_v47 = vld [vmem:[#allocation7 + $0x124] ss:$16 sps:$4 sm:$0xff]  }
 0x7f0   : > { %7192 = vpow2.f32 %v6161_v50  ;;  %v6162_v57 = vmul.f32 -1.442695, %v6428_v51  ;;  %v6902_v48 = vld [vmem:[#allocation7 + $0x120] ss:$16 sps:$4 sm:$0xff]   ;;  %v6905_v49 = vld [vmem:[#allocation7 + $0x128] ss:$16 sps:$4 sm:$0xff]  }
 0x7f1   : > { %7194 = vpow2.f32 %v6163_v55  ;;  %v6164_v58 = vmul.f32 -1.442695, %v6429_v56  ;;  %v6166_v5 = vmul.f32 -1.442695, %v6461_v63  ;;  %v6910_v50 = vld [vmem:[#allocation7 + $0x144] ss:$16 sps:$4 sm:$0xff]  }
 0x7f2   : > { %7196 = vpow2.f32 %v6162_v57  ;;  %v6913_v51 = vld [vmem:[#allocation7 + $0x14c] ss:$16 sps:$4 sm:$0xff]   ;;  %v6908_v53 = vld [vmem:[#allocation7 + $0x140] ss:$16 sps:$4 sm:$0xff]   ;;  %v6911_v54 = vld [vmem:[#allocation7 + $0x148] ss:$16 sps:$4 sm:$0xff]  }
 0x7f3   : > { %7198 = vpow2.f32 %v6164_v58  ;;  %v6916_v55 = vld [vmem:[#allocation7 + $0x164] ss:$16 sps:$4 sm:$0xff]   ;;  %v6919_v56 = vld [vmem:[#allocation7 + $0x16c] ss:$16 sps:$4 sm:$0xff]   ;;  %v6914_v57 = vld [vmem:[#allocation7 + $0x160] ss:$16 sps:$4 sm:$0xff]  }
 0x7f4   : > { %7200 = vtanh.f32 %v6458_v60  ;;  %v6917_v58 = vld [vmem:[#allocation7 + $0x168] ss:$16 sps:$4 sm:$0xff]   ;;  %v6922_v59 = vld [vmem:[#allocation7 + $0x184] ss:$16 sps:$4 sm:$0xff]   ;;  %v6925_v60 = vld [vmem:[#allocation7 + $0x18c] ss:$16 sps:$4 sm:$0xff]  }
 0x7f5   : > { %7202 = vpow2.f32 %v6165_v62  ;;  %v6920_v62 = vld [vmem:[#allocation7 + $0x180] ss:$16 sps:$4 sm:$0xff]   ;;  %v6923_v63 = vld [vmem:[#allocation7 + $0x188] ss:$16 sps:$4 sm:$0xff]  }
 0x7f6   : > { %7204 = vtanh.f32 %v6460_v1  ;;  %v6928_v1 = vld [vmem:[#allocation7 + $0x1a4] ss:$16 sps:$4 sm:$0xff]  }
 0x7fa   : > { %v7193_v2 = vpop.eup %7192 }
 0x7fb   : > { %v7195_v3 = vpop.eup %7194  ;;  %v3299_v4 = vadd.f32 1.0, %v7193_v2  ;;  %v6931_v2 = vld [vmem:[#allocation7 + $0x1ac] ss:$16 sps:$4 sm:$0xff]  }
 0x7fc   : > { %v3311_v21 = vadd.f32 1.0, %v7195_v3  ;;  %v7197_v17 = vpop.eup %7196  ;;  %v6926_v3 = vld [vmem:[#allocation7 + $0x1a0] ss:$16 sps:$4 sm:$0xff]  }
 0x7fd   : > { %7206 = vrcp.f32 %v3299_v4  ;;  %v3300_v6 = vadd.f32 1.0, %v7197_v17  ;;  %v7199_v31 = vpop.eup %7198  ;;  %v6929_v4 = vld [vmem:[#allocation7 + $0x1a8] ss:$16 sps:$4 sm:$0xff]   ;;  %v6932_v17 = vld [vmem:[#allocation7 + $0x1c0] ss:$16 sps:$4 sm:$0xff]  }
 0x7fe   : > { %7208 = vrcp.f32 %v3311_v21  ;;  %v3312_v36 = vadd.f32 1.0, %v7199_v31  ;;  %v7201_v43 = vpop.eup %7200  ;;  %v6937_v21 = vld [vmem:[#allocation7 + $0x1cc] ss:$16 sps:$4 sm:$0xff]   ;;  %v6940_v31 = vld [vmem:[#allocation7 + $0x1e4] ss:$16 sps:$4 sm:$0xff]  }
 0x7ff   : > { %7210 = vpow2.f32 %v6166_v5  ;;  %v7203_v38 = vpop.eup %7202  ;;  %v6934_v5 = vld [vmem:[#allocation7 + $0x1c4] ss:$16 sps:$4 sm:$0xff]  }
 0x800   : > { %7212 = vrcp.f32 %v3300_v6  ;;  %v7205_v24 = vpop.eup %7204  ;;  %v3325_v7 = vadd.f32 1.0, %v7203_v38  ;;  %v6935_v6 = vld [vmem:[#allocation7 + $0x1c8] ss:$16 sps:$4 sm:$0xff]  }
 0x801   : > { %7214 = vrcp.f32 %v3312_v36  ;;  %v6943_v36 = vld [vmem:[#allocation7 + $0x1ec] ss:$16 sps:$4 sm:$0xff]   ;;  %v6941_v38 = vld [vmem:[#allocation7 + $0x1e8] ss:$16 sps:$4 sm:$0xff]  }
 0x802   : > { %7216 = vrcp.f32 %v3325_v7  ;;  %v8597_v7 = vld [vmem:[#allocation9 + $0x16c] ss:$16 sps:$4 sm:$0xff]  }
 0x807   : > { %v7207_v22 = vpop.eup %7206 }
 0x808   : > { %v7209_v29 = vpop.eup %7208  ;;  %v3333_v30 = vmul.f32 %v7207_v22, %v7201_v43  ;;  %v6938_v43 = vld [vmem:[#allocation7 + $0x1e0] ss:$16 sps:$4 sm:$0xff]  }
 0x809   : > { %v7211_v35 = vpop.eup %7210  ;;  %v3331_v33 = vmul.f32 %v7209_v29, %v8468_v52  ;;  %v8536_v22 = vld [vmem:[#allocation9 + $0x100] ss:$16 sps:$4 sm:$0xff]   ;;  %v8583_v29 = vld [vmem:[#allocation9 + $0x128] ss:$16 sps:$4 sm:$0xff]  }
 0x80a   : > { %v7213_v8 = vpop.eup %7212  ;;  %v3326_v23 = vadd.f32 1.0, %v7211_v35  ;;  %v8588_v35 = vld [vmem:[#allocation9 + $0x14c] ss:$16 sps:$4 sm:$0xff]  }
 0x80b   : > { %v8520_v25 = vadd.f32 %v3333_v30, %v3331_v33  ;;  %v3334_v20 = vmul.f32 %v7213_v8, %v7205_v24  ;;  %v7215_v26 = vpop.eup %7214  ;;  %v8533_v24 = vld [vmem:[#allocation9 + $0x104] ss:$16 sps:$4 sm:$0xff]   ;;  %v8586_v30 = vld [vmem:[#allocation9 + $0x140] ss:$16 sps:$4 sm:$0xff]   ;;  %v8594_v8 = vld [vmem:[#allocation9 + $0x148] ss:$16 sps:$4 sm:$0xff]  }
 0x80c   : > { %v3332_v13 = vmul.f32 %v7215_v26, %v8472_v14  ;;  %v7217_v19 = vpop.eup %7216  ;;  %v6907_v14 = vld [vmem:[#allocation7 + $0x12c] ss:$16 sps:$4 sm:$0xff]   ;;  %v8591_v33 = vld [vmem:[#allocation9 + $0x164] ss:$16 sps:$4 sm:$0xff]  }
 0x80d   : > { %7218 = vtanh.f32 %v8520_v25  ;;  %v8603_v26 = vld [vmem:[#allocation9 + $0x184] ss:$16 sps:$4 sm:$0xff]  }
 0x80e   : > { %v8524_v34 = vadd.f32 %v3334_v20, %v3332_v13  ;;  %7220 = vrcp.f32 %v3326_v23  ;;  %v8600_v20 = vld [vmem:[#allocation9 + $0x160] ss:$16 sps:$4 sm:$0xff]   ;;  %v8606_v23 = vld [vmem:[#allocation9 + $0x168] ss:$16 sps:$4 sm:$0xff]   ;;  %v8609_v13 = vld [vmem:[#allocation9 + $0x18c] ss:$16 sps:$4 sm:$0xff]  }
 0x810   : > { %7222 = vtanh.f32 %v8524_v34 }
 0x817   : > { %v7219_v39 = vpop.eup %7218 }
 0x818   : > { %v7221_v52 = vpop.eup %7220  ;;  %v3339_v41 = vmul.f32 %v7219_v39, %v7217_v19  ;;  %v8612_v19 = vld [vmem:[#allocation9 + $0x180] ss:$16 sps:$4 sm:$0xff]   ;;  %v8615_v39 = vld [vmem:[#allocation9 + $0x1a4] ss:$16 sps:$4 sm:$0xff]  }
 0x81a   : > { %v7223_v40 = vpop.eup %7222 }
 0x81b   : > { %v3340_v42 = vmul.f32 %v7223_v40, %v7221_v52  ;;  %v8618_v52 = vld [vmem:[#allocation9 + $0x188] ss:$16 sps:$4 sm:$0xff]   ;;  %v8621_v40 = vld [vmem:[#allocation9 + $0x1ac] ss:$16 sps:$4 sm:$0xff]  }
 0x81d   : > { %v8527_v46 = vpack.c.bf16 %v3340_v42, %v3339_v41  ;;  %v8624_v41 = vld [vmem:[#allocation9 + $0x1a0] ss:$16 sps:$4 sm:$0xff]   ;;  %v8627_v42 = vld [vmem:[#allocation9 + $0x1c4] ss:$16 sps:$4 sm:$0xff]  }
 0x81f   : > { %3579 = vmatmul.mubr.bf16.vlgmr.msra.gmra.mrb[28].mxu0 %v8527_v46  ;;  %3622 = vmatmul.mubr.bf16.vlgmr.msra.gmra.mrb[28].mxu1 %v8527_v46 }
 0x820   : > { %3932 = vmatpush1.bf16.msra.mxu0 %v6896_v44  ;;  %4045 = vmatpush1.bf16.msra.mxu1 %v6899_v45  ;;  %v8630_v44 = vld [vmem:[#allocation9 + $0x1a8] ss:$16 sps:$4 sm:$0xff]   ;;  %v8634_v45 = vld [vmem:[#allocation9 + $0x1c0] ss:$16 sps:$4 sm:$0xff]  }
 0x821   : > { %3933 = vmatprep.subr.bf16.mxu0 %v6904_v47  ;;  %4046 = vmatprep.subr.bf16.mxu1 %v6907_v14  ;;  %v8640_v47 = vld [vmem:[#allocation9 + $0x1cc] ss:$16 sps:$4 sm:$0xff]   ;;  %v8642_v14 = vld [vmem:[#allocation9 + $0x1c8] ss:$16 sps:$4 sm:$0xff]  }
 0x822   : > { %3963 = vmatprep.mubr.bf16.mxu0 %v7717_v0  ;;  %4076 = vmatprep.mubr.bf16.mxu1 %v7717_v0 }
 0x824   : > { %3934 = vmatpush1.bf16.msra.mxu0 %v6902_v48  ;;  %4047 = vmatpush1.bf16.msra.mxu1 %v6905_v49  ;;  %v8644_v48 = vld [vmem:[#allocation9 + $0x1ec] ss:$16 sps:$4 sm:$0xff]   ;;  %v8648_v49 = vld [vmem:[#allocation9 + $0x1e0] ss:$16 sps:$4 sm:$0xff]  }
 0x825   : > { %3935 = vmatprep.subr.bf16.mxu0 %v6910_v50  ;;  %4048 = vmatprep.subr.bf16.mxu1 %v6913_v51  ;;  %v8652_v50 = vld [vmem:[#allocation9 + $0x1e8] ss:$16 sps:$4 sm:$0xff]  }
 0x828   : > { %3936 = vmatpush1.bf16.msra.mxu0 %v6908_v53  ;;  %4049 = vmatpush1.bf16.msra.mxu1 %v6911_v54 }
 0x829   : > { %3937 = vmatprep.subr.bf16.mxu0 %v6916_v55  ;;  %4050 = vmatprep.subr.bf16.mxu1 %v6919_v56 }
 0x82c   : > { %3938 = vmatpush1.bf16.msra.mxu0 %v6914_v57  ;;  %4051 = vmatpush1.bf16.msra.mxu1 %v6917_v58 }
 0x82d   : > { %3939 = vmatprep.subr.bf16.mxu0 %v6922_v59  ;;  %4052 = vmatprep.subr.bf16.mxu1 %v6925_v60 }
 0x830   : > { %3940 = vmatpush1.bf16.msra.mxu0 %v6920_v62  ;;  %4053 = vmatpush1.bf16.msra.mxu1 %v6923_v63 }
 0x831   : > { %3941 = vmatprep.subr.bf16.mxu0 %v6928_v1  ;;  %4054 = vmatprep.subr.bf16.mxu1 %v6931_v2 }
 0x834   : > { %3942 = vmatpush1.bf16.msra.mxu0 %v6926_v3  ;;  %4055 = vmatpush1.bf16.msra.mxu1 %v6929_v4 }
 0x835   : > { %3943 = vmatprep.subr.bf16.mxu0 %v6934_v5  ;;  %4056 = vmatprep.subr.bf16.mxu1 %v6937_v21 }
 0x838   : > { %3944 = vmatpush1.bf16.msra.mxu0 %v6932_v17  ;;  %4057 = vmatpush1.bf16.msra.mxu1 %v6935_v6 }
 0x839   : > { %3945 = vmatprep.subr.bf16.mxu0 %v6940_v31  ;;  %4058 = vmatprep.subr.bf16.mxu1 %v6943_v36 }
 0x83c   : > { %3946 = vmatpush1.bf16.msra.mxu0 %v6938_v43  ;;  %4059 = vmatpush1.bf16.msra.mxu1 %v6941_v38 }
 0x83d   : > { %4422 = vmatprep.subr.bf16.mxu0 %v8533_v24 }
 0x83f   : > { %3964 = vmatmul.mubr.bf16.vlgmr.msra.gmra.mrb[32].mxu0 %v8141_v28  ;;  %4077 = vmatmul.mubr.bf16.vlgmr.msra.gmra.mrb[32].mxu1 %v8141_v28  ;;  %v8567_v28 = vld [vmem:[#allocation9 + $0x10c] ss:$16 sps:$4 sm:$0xff]  }
 0x840   : > { %3973 = vmatprep.mubr.bf16.mxu0 %v7717_v0  ;;  %4086 = vmatprep.mubr.bf16.mxu1 %v7717_v0 }
 0x841   : > { %4423 = vmatpush1.bf16.msra.mxu0 %v8536_v22  ;;  %4465 = vmatprep.subr.bf16.mxu1 %v8567_v28 }
 0x847   : > { %3974 = vmatmul.mubr.bf16.gmra.mrb[36].mxu0 %v8195_v10  ;;  %4087 = vmatmul.mubr.bf16.gmra.mrb[36].mxu1 %v8195_v10  ;;  %v8569_v10 = vld [vmem:[#allocation9 + $0x108] ss:$16 sps:$4 sm:$0xff]  }
 0x848   : > { %3983 = vmatprep.mubr.bf16.mxu0 %v7717_v0  ;;  %4096 = vmatprep.mubr.bf16.mxu1 %v7717_v0 }
 0x849   : > { %4466 = vmatpush1.bf16.msra.mxu1 %v8569_v10 }
 0x84f   : > { %3984 = vmatmul.mubr.bf16.gmra.mrb[40].mxu0 %v8247_v37  ;;  %4097 = vmatmul.mubr.bf16.gmra.mrb[40].mxu1 %v8247_v37  ;;  %v8573_v37 = vld [vmem:[#allocation9 + $0x124] ss:$16 sps:$4 sm:$0xff]  }
 0x850   : > { %3993 = vmatprep.mubr.bf16.mxu0 %v7717_v0  ;;  %4106 = vmatprep.mubr.bf16.mxu1 %v7717_v0 }
 0x851   : > { %4424 = vmatprep.subr.bf16.mxu0 %v8573_v37 }
 0x857   : > { %3994 = vmatmul.mubr.bf16.gmra.mrb[44].mxu0 %v8367_v9  ;;  %4107 = vmatmul.mubr.bf16.gmra.mrb[44].mxu1 %v8367_v9  ;;  %v8575_v9 = vld [vmem:[#allocation9 + $0x12c] ss:$16 sps:$4 sm:$0xff]  }
 0x858   : > { %4003 = vmatprep.mubr.bf16.mxu0 %v7717_v0  ;;  %4116 = vmatprep.mubr.bf16.mxu1 %v7717_v0 }
 0x859   : > { %4467 = vmatprep.subr.bf16.mxu1 %v8575_v9 }
 0x85a   : > { %4468 = vmatpush1.bf16.msra.mxu1 %v8583_v29 }
 0x85b   : > { %4469 = vmatprep.subr.bf16.mxu1 %v8588_v35 }
 0x85e   : > { %4470 = vmatpush1.bf16.msra.mxu1 %v8594_v8 }
 0x85f   : > { %4004 = vmatmul.mubr.bf16.gmra.mrb[48].mxu0 %v8421_v18  ;;  %4117 = vmatmul.mubr.bf16.gmra.mrb[48].mxu1 %v8421_v18  ;;  %v8577_v18 = vld [vmem:[#allocation9 + $0x120] ss:$16 sps:$4 sm:$0xff]  }
 0x860   : > { %4013 = vmatprep.mubr.bf16.mxu0 %v7717_v0  ;;  %4126 = vmatprep.mubr.bf16.mxu1 %v7717_v0 }
 0x861   : > { %4425 = vmatpush1.bf16.msra.mxu0 %v8577_v18  ;;  %4471 = vmatprep.subr.bf16.mxu1 %v8597_v7 }
 0x862   : > { %4472 = vmatpush1.bf16.msra.mxu1 %v8606_v23 }
 0x863   : > { %4473 = vmatprep.subr.bf16.mxu1 %v8609_v13 }
 0x866   : > { %4474 = vmatpush1.bf16.msra.mxu1 %v8618_v52 }
 0x867   : > { %4014 = vmatmul.mubr.bf16.gmra.mrb[52].mxu0 %v8475_v27  ;;  %4127 = vmatmul.mubr.bf16.gmra.mrb[52].mxu1 %v8475_v27  ;;  %v8579_v27 = vld [vmem:[#allocation9 + $0x144] ss:$16 sps:$4 sm:$0xff]  }
 0x868   : > { %4023 = vmatprep.mubr.bf16.mxu0 %v7717_v0  ;;  %4136 = vmatprep.mubr.bf16.mxu1 %v7717_v0 }
 0x869   : > { %4426 = vmatprep.subr.bf16.mxu0 %v8579_v27  ;;  %4475 = vmatprep.subr.bf16.mxu1 %v8621_v40 }
 0x86a   : > { %4427 = vmatpush1.bf16.msra.mxu0 %v8586_v30  ;;  %4476 = vmatpush1.bf16.msra.mxu1 %v8630_v44 }
 0x86b   : > { %4428 = vmatprep.subr.bf16.mxu0 %v8591_v33  ;;  %4477 = vmatprep.subr.bf16.mxu1 %v8640_v47 }
 0x86e   : > { %4429 = vmatpush1.bf16.msra.mxu0 %v8600_v20  ;;  %4478 = vmatpush1.bf16.msra.mxu1 %v8642_v14 }
 0x86f   : > { %4024 = vmatmul.mubr.bf16.gmra.mrb[56].mxu0 %v8527_v46  ;;  %4137 = vmatmul.mubr.bf16.gmra.mrb[56].mxu1 %v8527_v46  ;;  %v8638_v46 = vld [vmem:[#allocation9 + $0x1e4] ss:$16 sps:$4 sm:$0xff]  }
 0x870   : > { %4033 = vmatprep.mubr.bf16.mxu0 %v7717_v0  ;;  %4146 = vmatprep.mubr.bf16.mxu1 %v7717_v0 }
 0x871   : > { %4430 = vmatprep.subr.bf16.mxu0 %v8603_v26  ;;  %4479 = vmatprep.subr.bf16.mxu1 %v8644_v48 }
 0x872   : > { %4431 = vmatpush1.bf16.msra.mxu0 %v8612_v19  ;;  %4480 = vmatpush1.bf16.msra.mxu1 %v8652_v50 }
 0x873   : > { %4432 = vmatprep.subr.bf16.mxu0 %v8615_v39  ;;  %4616 = vmatprep.subr.bf16.mxu1 %v8567_v28 }
 0x876   : > { %4433 = vmatpush1.bf16.msra.mxu0 %v8624_v41 }
 0x877   : > { %4434 = vmatprep.subr.bf16.mxu0 %v8627_v42 }
 0x87a   : > { %4435 = vmatpush1.bf16.msra.mxu0 %v8634_v45 }
 0x87b   : > { %4436 = vmatprep.subr.bf16.mxu0 %v8638_v46 }
 0x87e   : > { %4437 = vmatpush1.bf16.msra.mxu0 %v8648_v49 }
 0x87f   : > { %4573 = vmatprep.subr.bf16.mxu0 %v8533_v24 }
 0x8f2   : > { %v3580_v51 = vpop.f32.mrb[28].mxu0  ;;  %v3623_v53 = vpop.f32.mrb[28].mxu1 }
 0x8f3   : > { %v6430_v54 = vadd.f32 %v3580_v51, %v8111_v15  ;;  %v3582_v55 = vpop.f32.mrb[29].mxu0  ;;  %v3625_v56 = vpop.f32.mrb[29].mxu1  ;;  %v6462_v17 = vadd.f32 %v3623_v53, %v8129_v61 }
 0x8f4   : > { %v6431_v57 = vadd.f32 %v3582_v55, %v8115_v16  ;;  %v3584_v58 = vpop.f32.mrb[30].mxu0  ;;  %v3627_v59 = vpop.f32.mrb[30].mxu1  ;;  %v6463_v21 = vadd.f32 %v3625_v56, %v8124_v32 }
 0x8f5   : > { %v6199_v60 = vmul.f32 -1.442695, %v6430_v54  ;;  %v6432_v62 = vadd.f32 %v3584_v58, %v8111_v15  ;;  %v3586_v63 = vpop.f32.mrb[31].mxu0  ;;  %v3629_v1 = vpop.f32.mrb[31].mxu1  ;;  %v6464_v15 = vadd.f32 %v3627_v59, %v8129_v61 }
 0x8f6   : > { %v6201_v2 = vmul.f32 -1.442695, %v6431_v57  ;;  %v6433_v3 = vadd.f32 %v3586_v63, %v8115_v16  ;;  %v6203_v6 = vmul.f32 -1.442695, %v6463_v21  ;;  %v6465_v31 = vadd.f32 %v3629_v1, %v8124_v32 }
 0x8f7   : > { %7224 = vpow2.f32 %v6199_v60  ;;  %v6200_v4 = vmul.f32 -1.442695, %v6432_v62 }
 0x8f8   : > { %7226 = vpow2.f32 %v6201_v2  ;;  %v6202_v5 = vmul.f32 -1.442695, %v6433_v3  ;;  %v6204_v16 = vmul.f32 -1.442695, %v6465_v31 }
 0x8f9   : > { %7228 = vpow2.f32 %v6200_v4 }
 0x8fa   : > { %7230 = vpow2.f32 %v6202_v5 }
 0x8fb   : > { %7232 = vtanh.f32 %v6462_v17 }
 0x8fc   : > { %7234 = vpow2.f32 %v6203_v6 }
 0x8fd   : > { %7236 = vtanh.f32 %v6464_v15 }
 0x901   : > { %v7225_v36 = vpop.eup %7224 }
 0x902   : > { %v7227_v43 = vpop.eup %7226  ;;  %v3646_v38 = vadd.f32 1.0, %v7225_v36 }
 0x903   : > { %v3658_v51 = vadd.f32 1.0, %v7227_v43  ;;  %v7229_v54 = vpop.eup %7228 }
 0x904   : > { %7238 = vrcp.f32 %v3646_v38  ;;  %v3647_v55 = vadd.f32 1.0, %v7229_v54  ;;  %v7231_v56 = vpop.eup %7230  ;;  %v9203_v54 = vsub.s32 1, %v8102_v11 }
 0x905   : > { %7240 = vrcp.f32 %v3658_v51  ;;  %v3659_v53 = vadd.f32 1.0, %v7231_v56  ;;  %v7233_v32 = vpop.eup %7232 }
 0x906   : > { %7242 = vpow2.f32 %v6204_v16  ;;  %v7235_v57 = vpop.eup %7234 }
 0x907   : > { %7244 = vrcp.f32 %v3647_v55  ;;  %v7237_v61 = vpop.eup %7236  ;;  %v3672_v62 = vadd.f32 1.0, %v7235_v57 }
 0x908   : > { %7246 = vrcp.f32 %v3659_v53 }
 0x909   : > { %7248 = vrcp.f32 %v3672_v62 }
 0x90e   : > { %v7239_v58 = vpop.eup %7238 }
 0x90f   : > { %v7241_v59 = vpop.eup %7240  ;;  %v3680_v60 = vmul.f32 %v7239_v58, %v7233_v32 }
 0x910   : > { %v7243_v63 = vpop.eup %7242  ;;  %v3678_v1 = vmul.f32 %v7241_v59, %v8520_v25  ;;  %v6205_v25 = vld [vmem:[%s9169_s3 + $0x4] sm:$0xf] }
 0x911   : > { %v7245_v2 = vpop.eup %7244  ;;  %v3673_v21 = vadd.f32 1.0, %v7243_v63  ;;  %v8716_v55 = vrot.slane %v6205_v25, %v9203_v54 }
 0x912   : > { %v3681_v3 = vmul.f32 %v7245_v2, %v7237_v61  ;;  %v3682_v4 = vadd.f32 %v3680_v60, %v3678_v1  ;;  %v7247_v5 = vpop.eup %7246 }
 0x913   : > { %v3679_v17 = vmul.f32 %v7247_v5, %v8524_v34  ;;  %v7249_v31 = vpop.eup %7248  ;;  %v8712_v34 = vrot.slane %v6205_v25, %v450_v12 }
 0x914   : > { %7250 = vtanh.f32 %v3682_v4 }
 0x915   : > { %v3683_v6 = vadd.f32 %v3681_v3, %v3679_v17  ;;  %7252 = vrcp.f32 %v3673_v21  ;;  %v9204_v3 = vsub.s32 3, %v8102_v11 }
 0x917   : > { %7254 = vtanh.f32 %v3683_v6  ;;  %v8723_v4 = vrot.slane %v6205_v25, %v9204_v3  ;;  %v9205_v6 = vsub.s32 2, %v8102_v11 }
 0x91e   : > { %v7251_v15 = vpop.eup %7250 }
 0x91f   : > { %v3686_v36 = vmul.f32 %v7251_v15, %v7249_v31  ;;  %v7253_v43 = vpop.eup %7252  ;;  %v8728_v31 = vrot.slane %v6205_v25, %v9205_v6 }
 0x921   : > { %v7255_v38 = vpop.eup %7254 }
 0x922   : > { %v3687_v16 = vmul.f32 %v7255_v38, %v7253_v43 }
 0x924   : > { %v3716_v51 = vpack.c.bf16 %v3687_v16, %v3686_v36 }
 0x926   : > { %4034 = vmatmul.mubr.bf16.gmra.mrb[60].mxu0 %v3716_v51  ;;  %4147 = vmatmul.mubr.bf16.gmra.mrb[60].mxu1 %v3716_v51 }
 0x927   : > { %4454 = vmatprep.mubr.bf16.mxu0 %v7717_v0  ;;  %4497 = vmatprep.mubr.bf16.mxu1 %v7717_v0 }
 0x92e   : > { %4455 = vmatmul.mubr.bf16.vlgmr.msra.gmra.mrb[32].mxu0 %v7717_v0  ;;  %4498 = vmatmul.mubr.bf16.vlgmr.msra.gmra.mrb[32].mxu1 %v7717_v0 }
 0x92f   : > { %4574 = vmatpush1.bf16.msra.mxu0 %v8536_v22  ;;  %4617 = vmatpush1.bf16.msra.mxu1 %v8569_v10 }
 0x930   : > { %4575 = vmatprep.subr.bf16.mxu0 %v8573_v37  ;;  %4618 = vmatprep.subr.bf16.mxu1 %v8575_v9 }
 0x931   : > { %4605 = vmatprep.mubr.bf16.mxu0 %v7717_v0  ;;  %4648 = vmatprep.mubr.bf16.mxu1 %v7717_v0 }
 0x933   : > { %4576 = vmatpush1.bf16.msra.mxu0 %v8577_v18  ;;  %4619 = vmatpush1.bf16.msra.mxu1 %v8583_v29 }
 0x934   : > { %4577 = vmatprep.subr.bf16.mxu0 %v8579_v27  ;;  %4620 = vmatprep.subr.bf16.mxu1 %v8588_v35 }
 0x937   : > { %4578 = vmatpush1.bf16.msra.mxu0 %v8586_v30  ;;  %4621 = vmatpush1.bf16.msra.mxu1 %v8594_v8 }
 0x938   : > { %4579 = vmatprep.subr.bf16.mxu0 %v8591_v33  ;;  %4622 = vmatprep.subr.bf16.mxu1 %v8597_v7 }
 0x93b   : > { %4580 = vmatpush1.bf16.msra.mxu0 %v8600_v20  ;;  %4623 = vmatpush1.bf16.msra.mxu1 %v8606_v23 }
 0x93c   : > { %4581 = vmatprep.subr.bf16.mxu0 %v8603_v26  ;;  %4624 = vmatprep.subr.bf16.mxu1 %v8609_v13 }
 0x93f   : > { %4582 = vmatpush1.bf16.msra.mxu0 %v8612_v19  ;;  %4625 = vmatpush1.bf16.msra.mxu1 %v8618_v52 }
 0x940   : > { %4583 = vmatprep.subr.bf16.mxu0 %v8615_v39  ;;  %4626 = vmatprep.subr.bf16.mxu1 %v8621_v40 }
 0x943   : > { %4584 = vmatpush1.bf16.msra.mxu0 %v8624_v41  ;;  %4627 = vmatpush1.bf16.msra.mxu1 %v8630_v44 }
 0x944   : > { %4585 = vmatprep.subr.bf16.mxu0 %v8627_v42  ;;  %4628 = vmatprep.subr.bf16.mxu1 %v8640_v47 }
 0x947   : > { %4586 = vmatpush1.bf16.msra.mxu0 %v8634_v45  ;;  %4629 = vmatpush1.bf16.msra.mxu1 %v8642_v14 }
 0x948   : > { %4587 = vmatprep.subr.bf16.mxu0 %v8638_v46  ;;  %4630 = vmatprep.subr.bf16.mxu1 %v8644_v48 }
 0x94b   : > { %4588 = vmatpush1.bf16.msra.mxu0 %v8648_v49  ;;  %4631 = vmatpush1.bf16.msra.mxu1 %v8652_v50 }
 0x94c   : > { %4724 = vmatprep.subr.bf16.mxu0 %v8533_v24  ;;  %4767 = vmatprep.subr.bf16.mxu1 %v8567_v28 }
 0xa01   : > { %v4456_v56 = vpop.f32.mrb[32].mxu0  ;;  %v4499_v53 = vpop.f32.mrb[32].mxu1 }
 0xa02   : > { %v6466_v32 = vadd.f32 %v4456_v56, %v8712_v34  ;;  %v4458_v57 = vpop.f32.mrb[33].mxu0  ;;  %v4501_v61 = vpop.f32.mrb[33].mxu1  ;;  %v6498_v36 = vadd.f32 %v4499_v53, %v8728_v31 }
 0xa03   : > { %v6467_v58 = vadd.f32 %v4458_v57, %v8716_v55  ;;  %v4460_v59 = vpop.f32.mrb[34].mxu0  ;;  %v4503_v60 = vpop.f32.mrb[34].mxu1  ;;  %v6499_v15 = vadd.f32 %v4501_v61, %v8723_v4 }
 0xa04   : > { %v6270_v62 = vmul.f32 -1.442695, %v6466_v32  ;;  %v6468_v63 = vadd.f32 %v4460_v59, %v8712_v34  ;;  %v4462_v1 = vpop.f32.mrb[35].mxu0  ;;  %v4505_v12 = vpop.f32.mrb[35].mxu1  ;;  %v6500_v16 = vadd.f32 %v4503_v60, %v8728_v31 }
 0xa05   : > { %v6272_v2 = vmul.f32 -1.442695, %v6467_v58  ;;  %v6469_v5 = vadd.f32 %v4462_v1, %v8716_v55  ;;  %v6274_v43 = vmul.f32 -1.442695, %v6499_v15  ;;  %v6501_v38 = vadd.f32 %v4505_v12, %v8723_v4 }
 0xa06   : > { %7256 = vpow2.f32 %v6270_v62  ;;  %v6271_v21 = vmul.f32 -1.442695, %v6468_v63 }
 0xa07   : > { %7258 = vpow2.f32 %v6272_v2  ;;  %v6273_v17 = vmul.f32 -1.442695, %v6469_v5  ;;  %v6275_v32 = vmul.f32 -1.442695, %v6501_v38 }
 0xa08   : > { %7260 = vpow2.f32 %v6271_v21 }
 0xa09   : > { %7262 = vpow2.f32 %v6273_v17 }
 0xa0a   : > { %7264 = vtanh.f32 %v6498_v36 }
 0xa0b   : > { %7266 = vpow2.f32 %v6274_v43 }
 0xa0c   : > { %7268 = vtanh.f32 %v6500_v16 }
 0xa10   : > { %v7257_v51 = vpop.eup %7256 }
 0xa11   : > { %v7259_v54 = vpop.eup %7258  ;;  %v4522_v56 = vadd.f32 1.0, %v7257_v51 }
 0xa12   : > { %v4534_v11 = vadd.f32 1.0, %v7259_v54  ;;  %v7261_v25 = vpop.eup %7260 }
 0xa13   : > { %7270 = vrcp.f32 %v4522_v56  ;;  %v4523_v57 = vadd.f32 1.0, %v7261_v25  ;;  %v7263_v61 = vpop.eup %7262 }
 0xa14   : > { %7272 = vrcp.f32 %v4534_v11  ;;  %v4535_v53 = vadd.f32 1.0, %v7263_v61  ;;  %v7265_v58 = vpop.eup %7264 }
 0xa15   : > { %7274 = vpow2.f32 %v6275_v32  ;;  %v7267_v59 = vpop.eup %7266 }
 0xa16   : > { %7276 = vrcp.f32 %v4523_v57  ;;  %v7269_v60 = vpop.eup %7268  ;;  %v4548_v5 = vadd.f32 1.0, %v7267_v59 }
 0xa17   : > { %7278 = vrcp.f32 %v4535_v53 }
 0xa18   : > { %7280 = vrcp.f32 %v4548_v5 }
 0xa1d   : > { %v7271_v62 = vpop.eup %7270 }
 0xa1e   : > { %v7273_v63 = vpop.eup %7272  ;;  %v4556_v1 = vmul.f32 %v7271_v62, %v7265_v58 }
 0xa1f   : > { %v7275_v12 = vpop.eup %7274  ;;  %v4554_v2 = vmul.f32 0.0, %v7273_v63 }
 0xa20   : > { %v7277_v3 = vpop.eup %7276  ;;  %v4549_v15 = vadd.f32 1.0, %v7275_v12 }
 0xa21   : > { %v8734_v21 = vadd.f32 %v4556_v1, %v4554_v2  ;;  %v4557_v17 = vmul.f32 %v7277_v3, %v7269_v60  ;;  %v7279_v6 = vpop.eup %7278 }
 0xa22   : > { %v4555_v36 = vmul.f32 0.0, %v7279_v6  ;;  %v7281_v38 = vpop.eup %7280 }
 0xa23   : > { %7282 = vtanh.f32 %v8734_v21 }
 0xa24   : > { %v8737_v43 = vadd.f32 %v4557_v17, %v4555_v36  ;;  %7284 = vrcp.f32 %v4549_v15 }
 0xa26   : > { %7286 = vtanh.f32 %v8737_v43 }
 0xa2d   : > { %v7283_v16 = vpop.eup %7282 }
 0xa2e   : > { %v7285_v51 = vpop.eup %7284  ;;  %v4562_v56 = vmul.f32 %v7283_v16, %v7281_v38 }
 0xa30   : > { %v7287_v54 = vpop.eup %7286 }
 0xa31   : > { %v4563_v32 = vmul.f32 %v7287_v54, %v7285_v51 }
 0xa33   : > { %v4572_v11 = vpack.c.bf16 %v4563_v32, %v4562_v56 }
 0xa35   : > { %4606 = vmatmul.mubr.bf16.vlgmr.msra.gmra.mrb[36].mxu0 %v4572_v11  ;;  %4649 = vmatmul.mubr.bf16.vlgmr.msra.gmra.mrb[36].mxu1 %v4572_v11 }
 0xa36   : > { %4725 = vmatpush1.bf16.msra.mxu0 %v8536_v22  ;;  %4768 = vmatpush1.bf16.msra.mxu1 %v8569_v10 }
 0xa37   : > { %4726 = vmatprep.subr.bf16.mxu0 %v8573_v37  ;;  %4769 = vmatprep.subr.bf16.mxu1 %v8575_v9 }
 0xa38   : > { %4756 = vmatprep.mubr.bf16.mxu0 %v7717_v0  ;;  %4799 = vmatprep.mubr.bf16.mxu1 %v7717_v0 }
 0xa3a   : > { %4727 = vmatpush1.bf16.msra.mxu0 %v8577_v18  ;;  %4770 = vmatpush1.bf16.msra.mxu1 %v8583_v29 }
 0xa3b   : > { %4728 = vmatprep.subr.bf16.mxu0 %v8579_v27  ;;  %4771 = vmatprep.subr.bf16.mxu1 %v8588_v35 }
 0xa3e   : > { %4729 = vmatpush1.bf16.msra.mxu0 %v8586_v30  ;;  %4772 = vmatpush1.bf16.msra.mxu1 %v8594_v8 }
 0xa3f   : > { %4730 = vmatprep.subr.bf16.mxu0 %v8591_v33  ;;  %4773 = vmatprep.subr.bf16.mxu1 %v8597_v7 }
 0xa42   : > { %4731 = vmatpush1.bf16.msra.mxu0 %v8600_v20  ;;  %4774 = vmatpush1.bf16.msra.mxu1 %v8606_v23 }
 0xa43   : > { %4732 = vmatprep.subr.bf16.mxu0 %v8603_v26  ;;  %4775 = vmatprep.subr.bf16.mxu1 %v8609_v13 }
 0xa46   : > { %4733 = vmatpush1.bf16.msra.mxu0 %v8612_v19  ;;  %4776 = vmatpush1.bf16.msra.mxu1 %v8618_v52 }
 0xa47   : > { %4734 = vmatprep.subr.bf16.mxu0 %v8615_v39  ;;  %4777 = vmatprep.subr.bf16.mxu1 %v8621_v40 }
 0xa4a   : > { %4735 = vmatpush1.bf16.msra.mxu0 %v8624_v41  ;;  %4778 = vmatpush1.bf16.msra.mxu1 %v8630_v44 }
 0xa4b   : > { %4736 = vmatprep.subr.bf16.mxu0 %v8627_v42  ;;  %4779 = vmatprep.subr.bf16.mxu1 %v8640_v47 }
 0xa4e   : > { %4737 = vmatpush1.bf16.msra.mxu0 %v8634_v45  ;;  %4780 = vmatpush1.bf16.msra.mxu1 %v8642_v14 }
 0xa4f   : > { %4738 = vmatprep.subr.bf16.mxu0 %v8638_v46  ;;  %4781 = vmatprep.subr.bf16.mxu1 %v8644_v48 }
 0xa52   : > { %4739 = vmatpush1.bf16.msra.mxu0 %v8648_v49  ;;  %4782 = vmatpush1.bf16.msra.mxu1 %v8652_v50 }
 0xa53   : > { %4875 = vmatprep.subr.bf16.mxu0 %v8533_v24  ;;  %4918 = vmatprep.subr.bf16.mxu1 %v8567_v28 }
 0xb08   : > { %v4607_v25 = vpop.f32.mrb[36].mxu0  ;;  %v4650_v57 = vpop.f32.mrb[36].mxu1 }
 0xb09   : > { %v6470_v61 = vadd.f32 %v4607_v25, %v8712_v34  ;;  %v4609_v53 = vpop.f32.mrb[37].mxu0  ;;  %v4652_v58 = vpop.f32.mrb[37].mxu1  ;;  %v6502_v36 = vadd.f32 %v4650_v57, %v8728_v31 }
 0xb0a   : > { %v6471_v59 = vadd.f32 %v4609_v53, %v8716_v55  ;;  %v4611_v60 = vpop.f32.mrb[38].mxu0  ;;  %v4654_v62 = vpop.f32.mrb[38].mxu1  ;;  %v6503_v15 = vadd.f32 %v4652_v58, %v8723_v4 }
 0xb0b   : > { %v6276_v63 = vmul.f32 -1.442695, %v6470_v61  ;;  %v6472_v1 = vadd.f32 %v4611_v60, %v8712_v34  ;;  %v4613_v12 = vpop.f32.mrb[39].mxu0  ;;  %v4656_v2 = vpop.f32.mrb[39].mxu1  ;;  %v6504_v51 = vadd.f32 %v4654_v62, %v8728_v31 }
 0xb0c   : > { %v6278_v3 = vmul.f32 -1.442695, %v6471_v59  ;;  %v6473_v5 = vadd.f32 %v4613_v12, %v8716_v55  ;;  %v6280_v38 = vmul.f32 -1.442695, %v6503_v15  ;;  %v6505_v16 = vadd.f32 %v4656_v2, %v8723_v4 }
 0xb0d   : > { %7288 = vpow2.f32 %v6276_v63  ;;  %v6277_v17 = vmul.f32 -1.442695, %v6472_v1 }
 0xb0e   : > { %7290 = vpow2.f32 %v6278_v3  ;;  %v6279_v6 = vmul.f32 -1.442695, %v6473_v5  ;;  %v6281_v11 = vmul.f32 -1.442695, %v6505_v16 }
 0xb0f   : > { %7292 = vpow2.f32 %v6277_v17 }
 0xb10   : > { %7294 = vpow2.f32 %v6279_v6 }
 0xb11   : > { %7296 = vtanh.f32 %v6502_v36 }
 0xb12   : > { %7298 = vpow2.f32 %v6280_v38 }
 0xb13   : > { %7300 = vtanh.f32 %v6504_v51 }
 0xb17   : > { %v7289_v54 = vpop.eup %7288 }
 0xb18   : > { %v7291_v56 = vpop.eup %7290  ;;  %v4673_v32 = vadd.f32 1.0, %v7289_v54 }
 0xb19   : > { %v4685_v25 = vadd.f32 1.0, %v7291_v56  ;;  %v7293_v61 = vpop.eup %7292 }
 0xb1a   : > { %7302 = vrcp.f32 %v4673_v32  ;;  %v4674_v53 = vadd.f32 1.0, %v7293_v61  ;;  %v7295_v58 = vpop.eup %7294 }
 0xb1b   : > { %7304 = vrcp.f32 %v4685_v25  ;;  %v4686_v57 = vadd.f32 1.0, %v7295_v58  ;;  %v7297_v59 = vpop.eup %7296 }
 0xb1c   : > { %7306 = vpow2.f32 %v6281_v11  ;;  %v7299_v60 = vpop.eup %7298 }
 0xb1d   : > { %7308 = vrcp.f32 %v4674_v53  ;;  %v7301_v62 = vpop.eup %7300  ;;  %v4699_v17 = vadd.f32 1.0, %v7299_v60 }
 0xb1e   : > { %7310 = vrcp.f32 %v4686_v57 }
 0xb1f   : > { %7312 = vrcp.f32 %v4699_v17 }
 0xb24   : > { %v7303_v63 = vpop.eup %7302 }
 0xb25   : > { %v7305_v1 = vpop.eup %7304  ;;  %v4707_v12 = vmul.f32 %v7303_v63, %v7297_v59 }
 0xb26   : > { %v7307_v2 = vpop.eup %7306  ;;  %v4705_v3 = vmul.f32 %v7305_v1, %v8734_v21 }
 0xb27   : > { %v7309_v5 = vpop.eup %7308  ;;  %v4700_v38 = vadd.f32 1.0, %v7307_v2 }
 0xb28   : > { %v8783_v6 = vadd.f32 %v4707_v12, %v4705_v3  ;;  %v4708_v15 = vmul.f32 %v7309_v5, %v7301_v62  ;;  %v7311_v36 = vpop.eup %7310 }
 0xb29   : > { %v4706_v16 = vmul.f32 %v7311_v36, %v8737_v43  ;;  %v7313_v54 = vpop.eup %7312 }
 0xb2a   : > { %7314 = vtanh.f32 %v8783_v6 }
 0xb2b   : > { %v8787_v51 = vadd.f32 %v4708_v15, %v4706_v16  ;;  %7316 = vrcp.f32 %v4700_v38 }
 0xb2d   : > { %7318 = vtanh.f32 %v8787_v51 }
 0xb34   : > { %v7315_v56 = vpop.eup %7314 }
 0xb35   : > { %v7317_v21 = vpop.eup %7316  ;;  %v4713_v11 = vmul.f32 %v7315_v56, %v7313_v54 }
 0xb37   : > { %v7319_v32 = vpop.eup %7318 }
 0xb38   : > { %v4714_v25 = vmul.f32 %v7319_v32, %v7317_v21 }
 0xb3a   : > { %v4723_v61 = vpack.c.bf16 %v4714_v25, %v4713_v11 }
 0xb3c   : > { %4757 = vmatmul.mubr.bf16.vlgmr.msra.gmra.mrb[40].mxu0 %v4723_v61  ;;  %4800 = vmatmul.mubr.bf16.vlgmr.msra.gmra.mrb[40].mxu1 %v4723_v61 }
 0xb3d   : > { %4876 = vmatpush1.bf16.msra.mxu0 %v8536_v22  ;;  %4919 = vmatpush1.bf16.msra.mxu1 %v8569_v10 }
 0xb3e   : > { %4877 = vmatprep.subr.bf16.mxu0 %v8573_v37  ;;  %4920 = vmatprep.subr.bf16.mxu1 %v8575_v9 }
 0xb3f   : > { %4907 = vmatprep.mubr.bf16.mxu0 %v7717_v0  ;;  %4950 = vmatprep.mubr.bf16.mxu1 %v7717_v0 }
 0xb41   : > { %4878 = vmatpush1.bf16.msra.mxu0 %v8577_v18  ;;  %4921 = vmatpush1.bf16.msra.mxu1 %v8583_v29 }
 0xb42   : > { %4879 = vmatprep.subr.bf16.mxu0 %v8579_v27  ;;  %4922 = vmatprep.subr.bf16.mxu1 %v8588_v35 }
 0xb45   : > { %4880 = vmatpush1.bf16.msra.mxu0 %v8586_v30  ;;  %4923 = vmatpush1.bf16.msra.mxu1 %v8594_v8 }
 0xb46   : > { %4881 = vmatprep.subr.bf16.mxu0 %v8591_v33  ;;  %4924 = vmatprep.subr.bf16.mxu1 %v8597_v7 }
 0xb49   : > { %4882 = vmatpush1.bf16.msra.mxu0 %v8600_v20  ;;  %4925 = vmatpush1.bf16.msra.mxu1 %v8606_v23 }
 0xb4a   : > { %4883 = vmatprep.subr.bf16.mxu0 %v8603_v26  ;;  %4926 = vmatprep.subr.bf16.mxu1 %v8609_v13 }
 0xb4d   : > { %4884 = vmatpush1.bf16.msra.mxu0 %v8612_v19  ;;  %4927 = vmatpush1.bf16.msra.mxu1 %v8618_v52 }
 0xb4e   : > { %4885 = vmatprep.subr.bf16.mxu0 %v8615_v39  ;;  %4928 = vmatprep.subr.bf16.mxu1 %v8621_v40 }
 0xb51   : > { %4886 = vmatpush1.bf16.msra.mxu0 %v8624_v41  ;;  %4929 = vmatpush1.bf16.msra.mxu1 %v8630_v44 }
 0xb52   : > { %4887 = vmatprep.subr.bf16.mxu0 %v8627_v42  ;;  %4930 = vmatprep.subr.bf16.mxu1 %v8640_v47 }
 0xb55   : > { %4888 = vmatpush1.bf16.msra.mxu0 %v8634_v45  ;;  %4931 = vmatpush1.bf16.msra.mxu1 %v8642_v14 }
 0xb56   : > { %4889 = vmatprep.subr.bf16.mxu0 %v8638_v46  ;;  %4932 = vmatprep.subr.bf16.mxu1 %v8644_v48 }
 0xb59   : > { %4890 = vmatpush1.bf16.msra.mxu0 %v8648_v49  ;;  %4933 = vmatpush1.bf16.msra.mxu1 %v8652_v50 }
 0xb5a   : > { %5026 = vmatprep.subr.bf16.mxu0 %v8533_v24  ;;  %5069 = vmatprep.subr.bf16.mxu1 %v8567_v28 }
 0xc0f   : > { %v4758_v43 = vpop.f32.mrb[40].mxu0  ;;  %v4801_v53 = vpop.f32.mrb[40].mxu1 }
 0xc10   : > { %v6474_v58 = vadd.f32 %v4758_v43, %v8712_v34  ;;  %v4760_v57 = vpop.f32.mrb[41].mxu0  ;;  %v4803_v59 = vpop.f32.mrb[41].mxu1  ;;  %v6506_v38 = vadd.f32 %v4801_v53, %v8728_v31 }
 0xc11   : > { %v6475_v60 = vadd.f32 %v4760_v57, %v8716_v55  ;;  %v4762_v62 = vpop.f32.mrb[42].mxu0  ;;  %v4805_v63 = vpop.f32.mrb[42].mxu1  ;;  %v6507_v36 = vadd.f32 %v4803_v59, %v8723_v4 }
 0xc12   : > { %v6282_v1 = vmul.f32 -1.442695, %v6474_v58  ;;  %v6476_v12 = vadd.f32 %v4762_v62, %v8712_v34  ;;  %v4764_v2 = vpop.f32.mrb[43].mxu0  ;;  %v4807_v3 = vpop.f32.mrb[43].mxu1  ;;  %v6508_v56 = vadd.f32 %v4805_v63, %v8728_v31 }
 0xc13   : > { %v6284_v5 = vmul.f32 -1.442695, %v6475_v60  ;;  %v6477_v24 = vadd.f32 %v4764_v2, %v8716_v55  ;;  %v6286_v16 = vmul.f32 -1.442695, %v6507_v36  ;;  %v6509_v54 = vadd.f32 %v4807_v3, %v8723_v4 }
 0xc14   : > { %7320 = vpow2.f32 %v6282_v1  ;;  %v6283_v17 = vmul.f32 -1.442695, %v6476_v12 }
 0xc15   : > { %7322 = vpow2.f32 %v6284_v5  ;;  %v6285_v15 = vmul.f32 -1.442695, %v6477_v24  ;;  %v6287_v25 = vmul.f32 -1.442695, %v6509_v54 }
 0xc16   : > { %7324 = vpow2.f32 %v6283_v17 }
 0xc17   : > { %7326 = vpow2.f32 %v6285_v15 }
 0xc18   : > { %7328 = vtanh.f32 %v6506_v38 }
 0xc19   : > { %7330 = vpow2.f32 %v6286_v16 }
 0xc1a   : > { %7332 = vtanh.f32 %v6508_v56 }
 0xc1e   : > { %v7321_v21 = vpop.eup %7320 }
 0xc1f   : > { %v7323_v32 = vpop.eup %7322  ;;  %v4824_v11 = vadd.f32 1.0, %v7321_v21 }
 0xc20   : > { %v4836_v61 = vadd.f32 1.0, %v7323_v32  ;;  %v7325_v43 = vpop.eup %7324 }
 0xc21   : > { %7334 = vrcp.f32 %v4824_v11  ;;  %v4825_v58 = vadd.f32 1.0, %v7325_v43  ;;  %v7327_v57 = vpop.eup %7326 }
 0xc22   : > { %7336 = vrcp.f32 %v4836_v61  ;;  %v4837_v53 = vadd.f32 1.0, %v7327_v57  ;;  %v7329_v59 = vpop.eup %7328 }
 0xc23   : > { %7338 = vpow2.f32 %v6287_v25  ;;  %v7331_v60 = vpop.eup %7330 }
 0xc24   : > { %7340 = vrcp.f32 %v4825_v58  ;;  %v7333_v62 = vpop.eup %7332  ;;  %v4850_v24 = vadd.f32 1.0, %v7331_v60 }
 0xc25   : > { %7342 = vrcp.f32 %v4837_v53 }
 0xc26   : > { %7344 = vrcp.f32 %v4850_v24 }
 0xc2b   : > { %v7335_v63 = vpop.eup %7334 }
 0xc2c   : > { %v7337_v1 = vpop.eup %7336  ;;  %v4858_v12 = vmul.f32 %v7335_v63, %v7329_v59 }
 0xc2d   : > { %v7339_v2 = vpop.eup %7338  ;;  %v4856_v3 = vmul.f32 %v7337_v1, %v8783_v6 }
 0xc2e   : > { %v7341_v5 = vpop.eup %7340  ;;  %v4851_v38 = vadd.f32 1.0, %v7339_v2 }
 0xc2f   : > { %v8833_v17 = vadd.f32 %v4858_v12, %v4856_v3  ;;  %v4859_v15 = vmul.f32 %v7341_v5, %v7333_v62  ;;  %v7343_v36 = vpop.eup %7342 }
 0xc30   : > { %v4857_v16 = vmul.f32 %v7343_v36, %v8787_v51  ;;  %v7345_v56 = vpop.eup %7344 }
 0xc31   : > { %7346 = vtanh.f32 %v8833_v17 }
 0xc32   : > { %v8837_v54 = vadd.f32 %v4859_v15, %v4857_v16  ;;  %7348 = vrcp.f32 %v4851_v38 }
 0xc34   : > { %7350 = vtanh.f32 %v8837_v54 }
 0xc3b   : > { %v7347_v21 = vpop.eup %7346 }
 0xc3c   : > { %v7349_v6 = vpop.eup %7348  ;;  %v4864_v11 = vmul.f32 %v7347_v21, %v7345_v56 }
 0xc3e   : > { %v7351_v32 = vpop.eup %7350 }
 0xc3f   : > { %v4865_v25 = vmul.f32 %v7351_v32, %v7349_v6  ;;  %v8892_v32 = vld [vmem:[#allocation9 + $0x100] ss:$16 sps:$4 sm:$0xff]  }
 0xc41   : > { %v4874_v61 = vpack.c.bf16 %v4865_v25, %v4864_v11  ;;  %v8898_v11 = vld [vmem:[#allocation9 + $0x124] ss:$16 sps:$4 sm:$0xff]   ;;  %v8901_v25 = vld [vmem:[#allocation9 + $0x12c] ss:$16 sps:$4 sm:$0xff]  }
 0xc43   : > { %4908 = vmatmul.mubr.bf16.vlgmr.msra.gmra.mrb[44].mxu0 %v4874_v61  ;;  %4951 = vmatmul.mubr.bf16.vlgmr.msra.gmra.mrb[44].mxu1 %v4874_v61  ;;  %v8906_v61 = vld [vmem:[#allocation9 + $0x120] ss:$16 sps:$4 sm:$0xff]  }
 0xc44   : > { %5027 = vmatpush1.bf16.msra.mxu0 %v8536_v22  ;;  %5070 = vmatpush1.bf16.msra.mxu1 %v8569_v10  ;;  %v8872_v22 = vld [vmem:[#allocation9 + $0x104] ss:$16 sps:$4 sm:$0xff]  }
 0xc45   : > { %5028 = vmatprep.subr.bf16.mxu0 %v8573_v37  ;;  %5071 = vmatprep.subr.bf16.mxu1 %v8575_v9 }
 0xc46   : > { %5058 = vmatprep.mubr.bf16.mxu0 %v7717_v0  ;;  %5101 = vmatprep.mubr.bf16.mxu1 %v7717_v0 }
 0xc48   : > { %5029 = vmatpush1.bf16.msra.mxu0 %v8577_v18  ;;  %5072 = vmatpush1.bf16.msra.mxu1 %v8583_v29 }
 0xc49   : > { %5030 = vmatprep.subr.bf16.mxu0 %v8579_v27  ;;  %5073 = vmatprep.subr.bf16.mxu1 %v8588_v35 }
 0xc4c   : > { %5031 = vmatpush1.bf16.msra.mxu0 %v8586_v30  ;;  %5074 = vmatpush1.bf16.msra.mxu1 %v8594_v8 }
 0xc4d   : > { %5032 = vmatprep.subr.bf16.mxu0 %v8591_v33  ;;  %5075 = vmatprep.subr.bf16.mxu1 %v8597_v7 }
 0xc50   : > { %5033 = vmatpush1.bf16.msra.mxu0 %v8600_v20  ;;  %5076 = vmatpush1.bf16.msra.mxu1 %v8606_v23 }
 0xc51   : > { %5034 = vmatprep.subr.bf16.mxu0 %v8603_v26  ;;  %5077 = vmatprep.subr.bf16.mxu1 %v8609_v13 }
 0xc54   : > { %5035 = vmatpush1.bf16.msra.mxu0 %v8612_v19  ;;  %5078 = vmatpush1.bf16.msra.mxu1 %v8618_v52 }
 0xc55   : > { %5036 = vmatprep.subr.bf16.mxu0 %v8615_v39  ;;  %5079 = vmatprep.subr.bf16.mxu1 %v8621_v40 }
 0xc58   : > { %5037 = vmatpush1.bf16.msra.mxu0 %v8624_v41  ;;  %5080 = vmatpush1.bf16.msra.mxu1 %v8630_v44 }
 0xc59   : > { %5038 = vmatprep.subr.bf16.mxu0 %v8627_v42  ;;  %5081 = vmatprep.subr.bf16.mxu1 %v8640_v47 }
 0xc5c   : > { %5039 = vmatpush1.bf16.msra.mxu0 %v8634_v45  ;;  %5082 = vmatpush1.bf16.msra.mxu1 %v8642_v14 }
 0xc5d   : > { %5040 = vmatprep.subr.bf16.mxu0 %v8638_v46  ;;  %5083 = vmatprep.subr.bf16.mxu1 %v8644_v48 }
 0xc60   : > { %5041 = vmatpush1.bf16.msra.mxu0 %v8648_v49  ;;  %5084 = vmatpush1.bf16.msra.mxu1 %v8652_v50 }
 0xc61   : > { %5177 = vmatprep.subr.bf16.mxu0 %v8872_v22  ;;  %5220 = vmatprep.subr.bf16.mxu1 %v8567_v28 }
 0xd16   : > { %v4909_v10 = vpop.f32.mrb[44].mxu0  ;;  %v4952_v37 = vpop.f32.mrb[44].mxu1 }
 0xd17   : > { %v6478_v9 = vadd.f32 %v4909_v10, %v8712_v34  ;;  %v4911_v18 = vpop.f32.mrb[45].mxu0  ;;  %v4954_v27 = vpop.f32.mrb[45].mxu1  ;;  %v6510_v39 = vadd.f32 %v4952_v37, %v8728_v31  ;;  %v8909_v10 = vld [vmem:[#allocation9 + $0x128] ss:$16 sps:$4 sm:$0xff]   ;;  %v8912_v37 = vld [vmem:[#allocation9 + $0x144] ss:$16 sps:$4 sm:$0xff]  }
 0xd18   : > { %v6479_v29 = vadd.f32 %v4911_v18, %v8716_v55  ;;  %v4913_v30 = vpop.f32.mrb[46].mxu0  ;;  %v4956_v35 = vpop.f32.mrb[46].mxu1  ;;  %v6511_v19 = vadd.f32 %v4954_v27, %v8723_v4  ;;  %v8918_v18 = vld [vmem:[#allocation9 + $0x140] ss:$16 sps:$4 sm:$0xff]   ;;  %v8921_v27 = vld [vmem:[#allocation9 + $0x148] ss:$16 sps:$4 sm:$0xff]  }
 0xd19   : > { %v6288_v33 = vmul.f32 -1.442695, %v6478_v9  ;;  %v6480_v8 = vadd.f32 %v4913_v30, %v8712_v34  ;;  %v4915_v7 = vpop.f32.mrb[47].mxu0  ;;  %v4958_v20 = vpop.f32.mrb[47].mxu1  ;;  %v6512_v41 = vadd.f32 %v4956_v35, %v8728_v31  ;;  %v8915_v9 = vld [vmem:[#allocation9 + $0x14c] ss:$16 sps:$4 sm:$0xff]  }
 0xd1a   : > { %v6290_v26 = vmul.f32 -1.442695, %v6479_v29  ;;  %v6481_v23 = vadd.f32 %v4915_v7, %v8716_v55  ;;  %v6292_v52 = vmul.f32 -1.442695, %v6511_v19  ;;  %v6513_v40 = vadd.f32 %v4958_v20, %v8723_v4  ;;  %v8924_v29 = vld [vmem:[#allocation9 + $0x164] ss:$16 sps:$4 sm:$0xff]  }
 0xd1b   : > { %7352 = vpow2.f32 %v6288_v33  ;;  %v6289_v28 = vmul.f32 -1.442695, %v6480_v8  ;;  %v8927_v30 = vld [vmem:[#allocation9 + $0x16c] ss:$16 sps:$4 sm:$0xff]   ;;  %v8930_v35 = vld [vmem:[#allocation9 + $0x160] ss:$16 sps:$4 sm:$0xff]  }
 0xd1c   : > { %7354 = vpow2.f32 %v6290_v26  ;;  %v6291_v13 = vmul.f32 -1.442695, %v6481_v23  ;;  %v6293_v46 = vmul.f32 -1.442695, %v6513_v40  ;;  %v8933_v33 = vld [vmem:[#allocation9 + $0x168] ss:$16 sps:$4 sm:$0xff]  }
 0xd1d   : > { %7356 = vpow2.f32 %v6289_v28  ;;  %v8936_v8 = vld [vmem:[#allocation9 + $0x184] ss:$16 sps:$4 sm:$0xff]   ;;  %v8939_v7 = vld [vmem:[#allocation9 + $0x18c] ss:$16 sps:$4 sm:$0xff]   ;;  %v8942_v20 = vld [vmem:[#allocation9 + $0x180] ss:$16 sps:$4 sm:$0xff]  }
 0xd1e   : > { %7358 = vpow2.f32 %v6291_v13  ;;  %v8945_v26 = vld [vmem:[#allocation9 + $0x188] ss:$16 sps:$4 sm:$0xff]   ;;  %v8948_v23 = vld [vmem:[#allocation9 + $0x1a4] ss:$16 sps:$4 sm:$0xff]   ;;  %v8951_v28 = vld [vmem:[#allocation9 + $0x1ac] ss:$16 sps:$4 sm:$0xff]  }
 0xd1f   : > { %7360 = vtanh.f32 %v6510_v39  ;;  %v8954_v13 = vld [vmem:[#allocation9 + $0x1a0] ss:$16 sps:$4 sm:$0xff]   ;;  %v8957_v19 = vld [vmem:[#allocation9 + $0x1a8] ss:$16 sps:$4 sm:$0xff]   ;;  %v8960_v39 = vld [vmem:[#allocation9 + $0x1c4] ss:$16 sps:$4 sm:$0xff]  }
 0xd20   : > { %7362 = vpow2.f32 %v6292_v52  ;;  %v8963_v52 = vld [vmem:[#allocation9 + $0x1cc] ss:$16 sps:$4 sm:$0xff]   ;;  %v8966_v40 = vld [vmem:[#allocation9 + $0x1c0] ss:$16 sps:$4 sm:$0xff]  }
 0xd21   : > { %7364 = vtanh.f32 %v6512_v41  ;;  %v8969_v41 = vld [vmem:[#allocation9 + $0x1c8] ss:$16 sps:$4 sm:$0xff]  }
 0xd25   : > { %v7353_v42 = vpop.eup %7352 }
 0xd26   : > { %v7355_v44 = vpop.eup %7354  ;;  %v4975_v45 = vadd.f32 1.0, %v7353_v42  ;;  %v8972_v42 = vld [vmem:[#allocation9 + $0x1e4] ss:$16 sps:$4 sm:$0xff]  }
 0xd27   : > { %v4987_v47 = vadd.f32 1.0, %v7355_v44  ;;  %v7357_v14 = vpop.eup %7356  ;;  %v8975_v44 = vld [vmem:[#allocation9 + $0x1ec] ss:$16 sps:$4 sm:$0xff]  }
 0xd28   : > { %7366 = vrcp.f32 %v4975_v45  ;;  %v4976_v48 = vadd.f32 1.0, %v7357_v14  ;;  %v7359_v49 = vpop.eup %7358  ;;  %v8978_v45 = vld [vmem:[#allocation9 + $0x1e0] ss:$16 sps:$4 sm:$0xff]  }
 0xd29   : > { %7368 = vrcp.f32 %v4987_v47  ;;  %v4988_v50 = vadd.f32 1.0, %v7359_v49  ;;  %v7361_v51 = vpop.eup %7360  ;;  %v8985_v47 = vld [vmem:[#allocation9 + $0x10c] ss:$16 sps:$4 sm:$0xff]  }
 0xd2a   : > { %7370 = vpow2.f32 %v6293_v46  ;;  %v7363_v43 = vpop.eup %7362  ;;  %v8981_v46 = vld [vmem:[#allocation9 + $0x1e8] ss:$16 sps:$4 sm:$0xff]  }
 0xd2b   : > { %7372 = vrcp.f32 %v4976_v48  ;;  %v7365_v58 = vpop.eup %7364  ;;  %v5001_v1 = vadd.f32 1.0, %v7363_v43 }
 0xd2c   : > { %7374 = vrcp.f32 %v4988_v50 }
 0xd2d   : > { %7376 = vrcp.f32 %v5001_v1 }
 0xd32   : > { %v7367_v57 = vpop.eup %7366 }
 0xd33   : > { %v7369_v53 = vpop.eup %7368  ;;  %v5009_v59 = vmul.f32 %v7367_v57, %v7361_v51 }
 0xd34   : > { %v7371_v60 = vpop.eup %7370  ;;  %v5007_v62 = vmul.f32 %v7369_v53, %v8833_v17 }
 0xd35   : > { %v7373_v63 = vpop.eup %7372  ;;  %v5002_v5 = vadd.f32 1.0, %v7371_v60 }
 0xd36   : > { %v8885_v12 = vadd.f32 %v5009_v59, %v5007_v62  ;;  %v5010_v2 = vmul.f32 %v7373_v63, %v7365_v58  ;;  %v7375_v3 = vpop.eup %7374 }
 0xd37   : > { %v5008_v24 = vmul.f32 %v7375_v3, %v8837_v54  ;;  %v7377_v36 = vpop.eup %7376  ;;  %v8895_v54 = vld [vmem:[#allocation9 + $0x108] ss:$16 sps:$4 sm:$0xff]  }
 0xd38   : > { %7378 = vtanh.f32 %v8885_v12 }
 0xd39   : > { %v8889_v15 = vadd.f32 %v5010_v2, %v5008_v24  ;;  %7380 = vrcp.f32 %v5002_v5 }
 0xd3b   : > { %7382 = vtanh.f32 %v8889_v15 }
 0xd42   : > { %v7379_v38 = vpop.eup %7378 }
 0xd43   : > { %v7381_v17 = vpop.eup %7380  ;;  %v5015_v56 = vmul.f32 %v7379_v38, %v7377_v36 }
 0xd45   : > { %v7383_v16 = vpop.eup %7382 }
 0xd46   : > { %v5016_v21 = vmul.f32 %v7383_v16, %v7381_v17 }
 0xd48   : > { %v5025_v6 = vpack.c.bf16 %v5016_v21, %v5015_v56 }
 0xd4a   : > { %5059 = vmatmul.mubr.bf16.vlgmr.msra.gmra.mrb[48].mxu0 %v5025_v6  ;;  %5102 = vmatmul.mubr.bf16.vlgmr.msra.gmra.mrb[48].mxu1 %v5025_v6 }
 0xd4b   : > { %5178 = vmatpush1.bf16.msra.mxu0 %v8892_v32  ;;  %5221 = vmatpush1.bf16.msra.mxu1 %v8895_v54 }
 0xd4c   : > { %5179 = vmatprep.subr.bf16.mxu0 %v8898_v11  ;;  %5222 = vmatprep.subr.bf16.mxu1 %v8901_v25 }
 0xd4d   : > { %5209 = vmatprep.mubr.bf16.mxu0 %v7717_v0  ;;  %5252 = vmatprep.mubr.bf16.mxu1 %v7717_v0 }
 0xd4f   : > { %5180 = vmatpush1.bf16.msra.mxu0 %v8906_v61  ;;  %5223 = vmatpush1.bf16.msra.mxu1 %v8909_v10 }
 0xd50   : > { %5181 = vmatprep.subr.bf16.mxu0 %v8912_v37  ;;  %5224 = vmatprep.subr.bf16.mxu1 %v8915_v9 }
 0xd53   : > { %5182 = vmatpush1.bf16.msra.mxu0 %v8918_v18  ;;  %5225 = vmatpush1.bf16.msra.mxu1 %v8921_v27 }
 0xd54   : > { %5183 = vmatprep.subr.bf16.mxu0 %v8924_v29  ;;  %5226 = vmatprep.subr.bf16.mxu1 %v8927_v30 }
 0xd57   : > { %5184 = vmatpush1.bf16.msra.mxu0 %v8930_v35  ;;  %5227 = vmatpush1.bf16.msra.mxu1 %v8933_v33 }
 0xd58   : > { %5185 = vmatprep.subr.bf16.mxu0 %v8936_v8  ;;  %5228 = vmatprep.subr.bf16.mxu1 %v8939_v7 }
 0xd5b   : > { %5186 = vmatpush1.bf16.msra.mxu0 %v8942_v20  ;;  %5229 = vmatpush1.bf16.msra.mxu1 %v8945_v26 }
 0xd5c   : > { %5187 = vmatprep.subr.bf16.mxu0 %v8948_v23  ;;  %5230 = vmatprep.subr.bf16.mxu1 %v8951_v28 }
 0xd5f   : > { %5188 = vmatpush1.bf16.msra.mxu0 %v8954_v13  ;;  %5231 = vmatpush1.bf16.msra.mxu1 %v8957_v19 }
 0xd60   : > { %5189 = vmatprep.subr.bf16.mxu0 %v8960_v39  ;;  %5232 = vmatprep.subr.bf16.mxu1 %v8963_v52 }
 0xd63   : > { %5190 = vmatpush1.bf16.msra.mxu0 %v8966_v40  ;;  %5233 = vmatpush1.bf16.msra.mxu1 %v8969_v41 }
 0xd64   : > { %5191 = vmatprep.subr.bf16.mxu0 %v8972_v42  ;;  %5234 = vmatprep.subr.bf16.mxu1 %v8975_v44 }
 0xd67   : > { %5192 = vmatpush1.bf16.msra.mxu0 %v8978_v45  ;;  %5235 = vmatpush1.bf16.msra.mxu1 %v8981_v46 }
 0xd68   : > { %5328 = vmatprep.subr.bf16.mxu0 %v8872_v22  ;;  %5371 = vmatprep.subr.bf16.mxu1 %v8985_v47 }
 0xe1d   : > { %v5060_v14 = vpop.f32.mrb[48].mxu0  ;;  %v5103_v48 = vpop.f32.mrb[48].mxu1 }
 0xe1e   : > { %v6482_v49 = vadd.f32 %v5060_v14, %v8712_v34  ;;  %v5062_v50 = vpop.f32.mrb[49].mxu0  ;;  %v5105_v51 = vpop.f32.mrb[49].mxu1  ;;  %v6514_v24 = vadd.f32 %v5103_v48, %v8728_v31 }
 0xe1f   : > { %v6483_v43 = vadd.f32 %v5062_v50, %v8716_v55  ;;  %v5064_v58 = vpop.f32.mrb[50].mxu0  ;;  %v5107_v57 = vpop.f32.mrb[50].mxu1  ;;  %v6515_v5 = vadd.f32 %v5105_v51, %v8723_v4 }
 0xe20   : > { %v6294_v53 = vmul.f32 -1.442695, %v6482_v49  ;;  %v6484_v59 = vadd.f32 %v5064_v58, %v8712_v34  ;;  %v5066_v60 = vpop.f32.mrb[51].mxu0  ;;  %v5109_v62 = vpop.f32.mrb[51].mxu1  ;;  %v6516_v17 = vadd.f32 %v5107_v57, %v8728_v31 }
 0xe21   : > { %v6296_v63 = vmul.f32 -1.442695, %v6483_v43  ;;  %v6485_v1 = vadd.f32 %v5066_v60, %v8716_v55  ;;  %v6298_v36 = vmul.f32 -1.442695, %v6515_v5  ;;  %v6517_v38 = vadd.f32 %v5109_v62, %v8723_v4 }
 0xe22   : > { %7384 = vpow2.f32 %v6294_v53  ;;  %v6295_v2 = vmul.f32 -1.442695, %v6484_v59 }
 0xe23   : > { %7386 = vpow2.f32 %v6296_v63  ;;  %v6297_v3 = vmul.f32 -1.442695, %v6485_v1  ;;  %v6299_v6 = vmul.f32 -1.442695, %v6517_v38 }
 0xe24   : > { %7388 = vpow2.f32 %v6295_v2 }
 0xe25   : > { %7390 = vpow2.f32 %v6297_v3 }
 0xe26   : > { %7392 = vtanh.f32 %v6514_v24 }
 0xe27   : > { %7394 = vpow2.f32 %v6298_v36 }
 0xe28   : > { %7396 = vtanh.f32 %v6516_v17 }
 0xe2c   : > { %v7385_v16 = vpop.eup %7384 }
 0xe2d   : > { %v7387_v56 = vpop.eup %7386  ;;  %v5126_v21 = vadd.f32 1.0, %v7385_v16 }
 0xe2e   : > { %v5138_v14 = vadd.f32 1.0, %v7387_v56  ;;  %v7389_v49 = vpop.eup %7388 }
 0xe2f   : > { %7398 = vrcp.f32 %v5126_v21  ;;  %v5127_v50 = vadd.f32 1.0, %v7389_v49  ;;  %v7391_v51 = vpop.eup %7390 }
 0xe30   : > { %7400 = vrcp.f32 %v5138_v14  ;;  %v5139_v48 = vadd.f32 1.0, %v7391_v51  ;;  %v7393_v43 = vpop.eup %7392 }
 0xe31   : > { %7402 = vpow2.f32 %v6299_v6  ;;  %v7395_v58 = vpop.eup %7394 }
 0xe32   : > { %7404 = vrcp.f32 %v5127_v50  ;;  %v7397_v57 = vpop.eup %7396  ;;  %v5152_v2 = vadd.f32 1.0, %v7395_v58 }
 0xe33   : > { %7406 = vrcp.f32 %v5139_v48 }
 0xe34   : > { %7408 = vrcp.f32 %v5152_v2 }
 0xe39   : > { %v7399_v53 = vpop.eup %7398 }
 0xe3a   : > { %v7401_v59 = vpop.eup %7400  ;;  %v5160_v60 = vmul.f32 %v7399_v53, %v7393_v43 }
 0xe3b   : > { %v7403_v62 = vpop.eup %7402  ;;  %v5158_v63 = vmul.f32 %v7401_v59, %v8885_v12 }
 0xe3c   : > { %v7405_v1 = vpop.eup %7404  ;;  %v5153_v36 = vadd.f32 1.0, %v7403_v62 }
 0xe3d   : > { %v8997_v3 = vadd.f32 %v5160_v60, %v5158_v63  ;;  %v5161_v5 = vmul.f32 %v7405_v1, %v7397_v57  ;;  %v7407_v24 = vpop.eup %7406 }
 0xe3e   : > { %v5159_v38 = vmul.f32 %v7407_v24, %v8889_v15  ;;  %v7409_v16 = vpop.eup %7408 }
 0xe3f   : > { %7410 = vtanh.f32 %v8997_v3 }
 0xe40   : > { %v9001_v17 = vadd.f32 %v5161_v5, %v5159_v38  ;;  %7412 = vrcp.f32 %v5153_v36 }
 0xe42   : > { %7414 = vtanh.f32 %v9001_v17 }
 0xe49   : > { %v7411_v56 = vpop.eup %7410 }
 0xe4a   : > { %v7413_v12 = vpop.eup %7412  ;;  %v5166_v6 = vmul.f32 %v7411_v56, %v7409_v16 }
 0xe4c   : > { %v7415_v21 = vpop.eup %7414 }
 0xe4d   : > { %v5167_v14 = vmul.f32 %v7415_v21, %v7413_v12 }
 0xe4f   : > { %v5176_v49 = vpack.c.bf16 %v5167_v14, %v5166_v6 }
 0xe51   : > { %5210 = vmatmul.mubr.bf16.vlgmr.msra.gmra.mrb[52].mxu0 %v5176_v49  ;;  %5253 = vmatmul.mubr.bf16.vlgmr.msra.gmra.mrb[52].mxu1 %v5176_v49 }
 0xe52   : > { %5329 = vmatpush1.bf16.msra.mxu0 %v8892_v32  ;;  %5372 = vmatpush1.bf16.msra.mxu1 %v8895_v54 }
 0xe53   : > { %5330 = vmatprep.subr.bf16.mxu0 %v8898_v11  ;;  %5373 = vmatprep.subr.bf16.mxu1 %v8901_v25 }
 0xe54   : > { %5360 = vmatprep.mubr.bf16.mxu0 %v7717_v0  ;;  %5403 = vmatprep.mubr.bf16.mxu1 %v7717_v0 }
 0xe56   : > { %5331 = vmatpush1.bf16.msra.mxu0 %v8906_v61  ;;  %5374 = vmatpush1.bf16.msra.mxu1 %v8909_v10 }
 0xe57   : > { %5332 = vmatprep.subr.bf16.mxu0 %v8912_v37  ;;  %5375 = vmatprep.subr.bf16.mxu1 %v8915_v9 }
 0xe5a   : > { %5333 = vmatpush1.bf16.msra.mxu0 %v8918_v18  ;;  %5376 = vmatpush1.bf16.msra.mxu1 %v8921_v27 }
 0xe5b   : > { %5334 = vmatprep.subr.bf16.mxu0 %v8924_v29  ;;  %5377 = vmatprep.subr.bf16.mxu1 %v8927_v30 }
 0xe5e   : > { %5335 = vmatpush1.bf16.msra.mxu0 %v8930_v35  ;;  %5378 = vmatpush1.bf16.msra.mxu1 %v8933_v33 }
 0xe5f   : > { %5336 = vmatprep.subr.bf16.mxu0 %v8936_v8  ;;  %5379 = vmatprep.subr.bf16.mxu1 %v8939_v7 }
 0xe62   : > { %5337 = vmatpush1.bf16.msra.mxu0 %v8942_v20  ;;  %5380 = vmatpush1.bf16.msra.mxu1 %v8945_v26 }
 0xe63   : > { %5338 = vmatprep.subr.bf16.mxu0 %v8948_v23  ;;  %5381 = vmatprep.subr.bf16.mxu1 %v8951_v28 }
 0xe66   : > { %5339 = vmatpush1.bf16.msra.mxu0 %v8954_v13  ;;  %5382 = vmatpush1.bf16.msra.mxu1 %v8957_v19 }
 0xe67   : > { %5340 = vmatprep.subr.bf16.mxu0 %v8960_v39  ;;  %5383 = vmatprep.subr.bf16.mxu1 %v8963_v52 }
 0xe6a   : > { %5341 = vmatpush1.bf16.msra.mxu0 %v8966_v40  ;;  %5384 = vmatpush1.bf16.msra.mxu1 %v8969_v41 }
 0xe6b   : > { %5342 = vmatprep.subr.bf16.mxu0 %v8972_v42  ;;  %5385 = vmatprep.subr.bf16.mxu1 %v8975_v44 }
 0xe6e   : > { %5343 = vmatpush1.bf16.msra.mxu0 %v8978_v45  ;;  %5386 = vmatpush1.bf16.msra.mxu1 %v8981_v46 }
 0xe6f   : > { %5479 = vmatprep.subr.bf16.mxu0 %v8872_v22  ;;  %5522 = vmatprep.subr.bf16.mxu1 %v8985_v47 }
 0xf24   : > { %v5211_v15 = vpop.f32.mrb[52].mxu0  ;;  %v5254_v50 = vpop.f32.mrb[52].mxu1 }
 0xf25   : > { %v6486_v51 = vadd.f32 %v5211_v15, %v8712_v34  ;;  %v5213_v48 = vpop.f32.mrb[53].mxu0  ;;  %v5256_v43 = vpop.f32.mrb[53].mxu1  ;;  %v6518_v24 = vadd.f32 %v5254_v50, %v8728_v31 }
 0xf26   : > { %v6487_v58 = vadd.f32 %v5213_v48, %v8716_v55  ;;  %v5215_v57 = vpop.f32.mrb[54].mxu0  ;;  %v5258_v53 = vpop.f32.mrb[54].mxu1  ;;  %v6519_v5 = vadd.f32 %v5256_v43, %v8723_v4 }
 0xf27   : > { %v6300_v59 = vmul.f32 -1.442695, %v6486_v51  ;;  %v6488_v60 = vadd.f32 %v5215_v57, %v8712_v34  ;;  %v5217_v62 = vpop.f32.mrb[55].mxu0  ;;  %v5260_v63 = vpop.f32.mrb[55].mxu1  ;;  %v6520_v16 = vadd.f32 %v5258_v53, %v8728_v31 }
 0xf28   : > { %v6302_v1 = vmul.f32 -1.442695, %v6487_v58  ;;  %v6489_v22 = vadd.f32 %v5217_v62, %v8716_v55  ;;  %v6304_v36 = vmul.f32 -1.442695, %v6519_v5  ;;  %v6521_v38 = vadd.f32 %v5260_v63, %v8723_v4 }
 0xf29   : > { %7416 = vpow2.f32 %v6300_v59  ;;  %v6301_v47 = vmul.f32 -1.442695, %v6488_v60 }
 0xf2a   : > { %7418 = vpow2.f32 %v6302_v1  ;;  %v6303_v2 = vmul.f32 -1.442695, %v6489_v22  ;;  %v6305_v6 = vmul.f32 -1.442695, %v6521_v38 }
 0xf2b   : > { %7420 = vpow2.f32 %v6301_v47 }
 0xf2c   : > { %7422 = vpow2.f32 %v6303_v2 }
 0xf2d   : > { %7424 = vtanh.f32 %v6518_v24 }
 0xf2e   : > { %7426 = vpow2.f32 %v6304_v36 }
 0xf2f   : > { %7428 = vtanh.f32 %v6520_v16 }
 0xf33   : > { %v7417_v56 = vpop.eup %7416 }
 0xf34   : > { %v7419_v12 = vpop.eup %7418  ;;  %v5277_v21 = vadd.f32 1.0, %v7417_v56 }
 0xf35   : > { %v5289_v14 = vadd.f32 1.0, %v7419_v12  ;;  %v7421_v49 = vpop.eup %7420 }
 0xf36   : > { %7430 = vrcp.f32 %v5277_v21  ;;  %v5278_v15 = vadd.f32 1.0, %v7421_v49  ;;  %v7423_v51 = vpop.eup %7422 }
 0xf37   : > { %7432 = vrcp.f32 %v5289_v14  ;;  %v5290_v50 = vadd.f32 1.0, %v7423_v51  ;;  %v7425_v48 = vpop.eup %7424 }
 0xf38   : > { %7434 = vpow2.f32 %v6305_v6  ;;  %v7427_v43 = vpop.eup %7426 }
 0xf39   : > { %7436 = vrcp.f32 %v5278_v15  ;;  %v7429_v58 = vpop.eup %7428  ;;  %v5303_v1 = vadd.f32 1.0, %v7427_v43 }
 0xf3a   : > { %7438 = vrcp.f32 %v5290_v50 }
 0xf3b   : > { %7440 = vrcp.f32 %v5303_v1 }
 0xf40   : > { %v7431_v57 = vpop.eup %7430 }
 0xf41   : > { %v7433_v53 = vpop.eup %7432  ;;  %v5311_v59 = vmul.f32 %v7431_v57, %v7425_v48 }
 0xf42   : > { %v7435_v60 = vpop.eup %7434  ;;  %v5309_v62 = vmul.f32 %v7433_v53, %v8997_v3 }
 0xf43   : > { %v7437_v63 = vpop.eup %7436  ;;  %v5304_v5 = vadd.f32 1.0, %v7435_v60 }
 0xf44   : > { %v9047_v22 = vadd.f32 %v5311_v59, %v5309_v62  ;;  %v5312_v47 = vmul.f32 %v7437_v63, %v7429_v58  ;;  %v7439_v2 = vpop.eup %7438 }
 0xf45   : > { %v5310_v24 = vmul.f32 %v7439_v2, %v9001_v17  ;;  %v7441_v38 = vpop.eup %7440 }
 0xf46   : > { %7442 = vtanh.f32 %v9047_v22 }
 0xf47   : > { %v9051_v36 = vadd.f32 %v5312_v47, %v5310_v24  ;;  %7444 = vrcp.f32 %v5304_v5 }
 0xf49   : > { %7446 = vtanh.f32 %v9051_v36 }
 0xf50   : > { %v7443_v16 = vpop.eup %7442 }
 0xf51   : > { %v7445_v3 = vpop.eup %7444  ;;  %v5317_v12 = vmul.f32 %v7443_v16, %v7441_v38  ;;  %v6992_v16 = vld [vmem:[#allocation10] sm:$0xff]  }
 0xf53   : > { %v7447_v56 = vpop.eup %7446 }
 0xf54   : > { %v5318_v21 = vmul.f32 %v7447_v56, %v7445_v3  ;;  %v7718_v3 = vmov 0.0   ;;  %v6994_v56 = vld [vmem:[#allocation10 + $0x10] sm:$0xff]  }
 0xf56   : > { %v5327_v6 = vpack.c.bf16 %v5318_v21, %v5317_v12  ;;  %v6995_v12 = vld [vmem:[#allocation10 + $0x18] sm:$0xff]   ;;  %v6996_v21 = vld [vmem:[#allocation10 + $0x20] sm:$0xff]  }
 0xf58   : > { %5361 = vmatmul.mubr.bf16.vlgmr.msra.gmra.mrb[56].mxu0 %v5327_v6  ;;  %5404 = vmatmul.mubr.bf16.vlgmr.msra.gmra.mrb[56].mxu1 %v5327_v6  ;;  %v6997_v6 = vld [vmem:[#allocation10 + $0x28] sm:$0xff]  }
 0xf59   : > { %5480 = vmatpush1.bf16.msra.mxu0 %v8892_v32  ;;  %5523 = vmatpush1.bf16.msra.mxu1 %v8895_v54 }
 0xf5a   : > { %5481 = vmatprep.subr.bf16.mxu0 %v8898_v11  ;;  %5524 = vmatprep.subr.bf16.mxu1 %v8901_v25 }
 0xf5b   : > { %5511 = vmatprep.mubr.bf16.mxu0 %v7717_v0  ;;  %5554 = vmatprep.mubr.bf16.mxu1 %v7717_v0 }
 0xf5d   : > { %5482 = vmatpush1.bf16.msra.mxu0 %v8906_v61  ;;  %5525 = vmatpush1.bf16.msra.mxu1 %v8909_v10 }
 0xf5e   : > { %5483 = vmatprep.subr.bf16.mxu0 %v8912_v37  ;;  %5526 = vmatprep.subr.bf16.mxu1 %v8915_v9 }
 0xf61   : > { %5484 = vmatpush1.bf16.msra.mxu0 %v8918_v18  ;;  %5527 = vmatpush1.bf16.msra.mxu1 %v8921_v27 }
 0xf62   : > { %5485 = vmatprep.subr.bf16.mxu0 %v8924_v29  ;;  %5528 = vmatprep.subr.bf16.mxu1 %v8927_v30 }
 0xf65   : > { %5486 = vmatpush1.bf16.msra.mxu0 %v8930_v35  ;;  %5529 = vmatpush1.bf16.msra.mxu1 %v8933_v33 }
 0xf66   : > { %5487 = vmatprep.subr.bf16.mxu0 %v8936_v8  ;;  %5530 = vmatprep.subr.bf16.mxu1 %v8939_v7 }
 0xf69   : > { %5488 = vmatpush1.bf16.msra.mxu0 %v8942_v20  ;;  %5531 = vmatpush1.bf16.msra.mxu1 %v8945_v26 }
 0xf6a   : > { %5489 = vmatprep.subr.bf16.mxu0 %v8948_v23  ;;  %5532 = vmatprep.subr.bf16.mxu1 %v8951_v28 }
 0xf6d   : > { %5490 = vmatpush1.bf16.msra.mxu0 %v8954_v13  ;;  %5533 = vmatpush1.bf16.msra.mxu1 %v8957_v19 }
 0xf6e   : > { %5491 = vmatprep.subr.bf16.mxu0 %v8960_v39  ;;  %5534 = vmatprep.subr.bf16.mxu1 %v8963_v52 }
 0xf71   : > { %5492 = vmatpush1.bf16.msra.mxu0 %v8966_v40  ;;  %5535 = vmatpush1.bf16.msra.mxu1 %v8969_v41 }
 0xf72   : > { %5493 = vmatprep.subr.bf16.mxu0 %v8972_v42  ;;  %5536 = vmatprep.subr.bf16.mxu1 %v8975_v44 }
 0xf75   : > { %5494 = vmatpush1.bf16.msra.mxu0 %v8978_v45  ;;  %5537 = vmatpush1.bf16.msra.mxu1 %v8981_v46 }
 0xf76   : > { %6382 = vmatprep.subr.bf16.mxu0 %v7718_v3 }
0x102b   : > { %v5362_v0 = vpop.f32.mrb[56].mxu0  ;;  %v5405_v32 = vpop.f32.mrb[56].mxu1 }
0x102c   : > { %v6490_v54 = vadd.f32 %v5362_v0, %v8712_v34  ;;  %v5364_v11 = vpop.f32.mrb[57].mxu0  ;;  %v5407_v25 = vpop.f32.mrb[57].mxu1  ;;  %v6522_v20 = vadd.f32 %v5405_v32, %v8728_v31  ;;  %v6998_v0 = vld [vmem:[#allocation10 + $0x30] sm:$0xff]   ;;  %v6999_v32 = vld [vmem:[#allocation10 + $0x38] sm:$0xff]  }
0x102d   : > { %v6491_v61 = vadd.f32 %v5364_v11, %v8716_v55  ;;  %v5366_v10 = vpop.f32.mrb[58].mxu0  ;;  %v5409_v37 = vpop.f32.mrb[58].mxu1  ;;  %v6523_v7 = vadd.f32 %v5407_v25, %v8723_v4 }
0x102e   : > { %v6306_v9 = vmul.f32 -1.442695, %v6490_v54  ;;  %v6492_v18 = vadd.f32 %v5366_v10, %v8712_v34  ;;  %v5368_v27 = vpop.f32.mrb[59].mxu0  ;;  %v5411_v29 = vpop.f32.mrb[59].mxu1  ;;  %v6524_v28 = vadd.f32 %v5409_v37, %v8728_v31 }
0x102f   : > { %v6308_v30 = vmul.f32 -1.442695, %v6491_v61  ;;  %v6493_v35 = vadd.f32 %v5368_v27, %v8716_v55  ;;  %v6310_v26 = vmul.f32 -1.442695, %v6523_v7  ;;  %v6525_v23 = vadd.f32 %v5411_v29, %v8723_v4 }
0x1030   : > { %7448 = vpow2.f32 %v6306_v9  ;;  %v6307_v33 = vmul.f32 -1.442695, %v6492_v18 }
0x1031   : > { %7450 = vpow2.f32 %v6308_v30  ;;  %v6309_v8 = vmul.f32 -1.442695, %v6493_v35  ;;  %v6311_v52 = vmul.f32 -1.442695, %v6525_v23 }
0x1032   : > { %7452 = vpow2.f32 %v6307_v33 }
0x1033   : > { %7454 = vpow2.f32 %v6309_v8 }
0x1034   : > { %7456 = vtanh.f32 %v6522_v20 }
0x1035   : > { %7458 = vpow2.f32 %v6310_v26 }
0x1036   : > { %7460 = vtanh.f32 %v6524_v28 }
0x103a   : > { %v7449_v13 = vpop.eup %7448 }
0x103b   : > { %v7451_v19 = vpop.eup %7450  ;;  %v5428_v39 = vadd.f32 1.0, %v7449_v13 }
0x103c   : > { %v5440_v40 = vadd.f32 1.0, %v7451_v19  ;;  %v7453_v41 = vpop.eup %7452 }
0x103d   : > { %7462 = vrcp.f32 %v5428_v39  ;;  %v5429_v42 = vadd.f32 1.0, %v7453_v41  ;;  %v7455_v44 = vpop.eup %7454 }
0x103e   : > { %7464 = vrcp.f32 %v5440_v40  ;;  %v5441_v45 = vadd.f32 1.0, %v7455_v44  ;;  %v7457_v46 = vpop.eup %7456 }
0x103f   : > { %7466 = vpow2.f32 %v6311_v52  ;;  %v7459_v17 = vpop.eup %7458 }
0x1040   : > { %7468 = vrcp.f32 %v5429_v42  ;;  %v7461_v14 = vpop.eup %7460  ;;  %v5454_v58 = vadd.f32 1.0, %v7459_v17 }
0x1041   : > { %7470 = vrcp.f32 %v5441_v45 }
0x1042   : > { %7472 = vrcp.f32 %v5454_v58 }
0x1047   : > { %v7463_v49 = vpop.eup %7462 }
0x1048   : > { %v7465_v15 = vpop.eup %7464  ;;  %v5462_v51 = vmul.f32 %v7463_v49, %v7457_v46 }
0x1049   : > { %v7467_v50 = vpop.eup %7466  ;;  %v5460_v48 = vmul.f32 %v7465_v15, %v9047_v22 }
0x104a   : > { %v7469_v43 = vpop.eup %7468  ;;  %v5455_v60 = vadd.f32 1.0, %v7467_v50 }
0x104b   : > { %v9095_v57 = vadd.f32 %v5462_v51, %v5460_v48  ;;  %v5463_v53 = vmul.f32 %v7469_v43, %v7461_v14  ;;  %v7471_v59 = vpop.eup %7470 }
0x104c   : > { %v5461_v62 = vmul.f32 %v7471_v59, %v9051_v36  ;;  %v7473_v1 = vpop.eup %7472  ;;  %v6993_v36 = vld [vmem:[#allocation10 + $0x8] sm:$0xff]  }
0x104d   : > { %7474 = vtanh.f32 %v9095_v57 }
0x104e   : > { %v9099_v63 = vadd.f32 %v5463_v53, %v5461_v62  ;;  %7476 = vrcp.f32 %v5455_v60 }
0x1050   : > { %7478 = vtanh.f32 %v9099_v63 }
0x1057   : > { %v7475_v47 = vpop.eup %7474 }
0x1058   : > { %v7477_v22 = vpop.eup %7476  ;;  %v5468_v5 = vmul.f32 %v7475_v47, %v7473_v1 }
0x105a   : > { %v7479_v2 = vpop.eup %7478 }
0x105b   : > { %v5469_v24 = vmul.f32 %v7479_v2, %v7477_v22 }
0x105d   : > { %v5478_v38 = vpack.c.bf16 %v5469_v24, %v5468_v5 }
0x105f   : > { %5512 = vmatmul.mubr.bf16.vlgmr.msra.gmra.mrb[60].mxu0 %v5478_v38  ;;  %5555 = vmatmul.mubr.bf16.vlgmr.msra.gmra.mrb[60].mxu1 %v5478_v38  ;;  %v6318_v38 = vld [vmem:[%s9171_s5] ss:$0 sm:$0xff] }
0x1060   : > { %6383 = vmatpush3.bf16.msra.mxu0 %v6992_v16  ;;  %6398 = vmatprep.mubr.msk.bf16.mxu0 %vm7719_vm0, %v7718_v3 }
0x1061   : > { %6384 = vmatprep.subr.bf16.mxu0 %v7718_v3 }
0x1064   : > { %6385 = vmatpush3.bf16.msra.mxu0 %v6993_v36 }
0x1065   : > { %6386 = vmatprep.subr.bf16.mxu0 %v7718_v3 }
0x1068   : > { %6387 = vmatpush3.bf16.msra.mxu0 %v6994_v56 }
0x1069   : > { %6388 = vmatprep.subr.bf16.mxu0 %v7718_v3 }
0x106c   : > { %6389 = vmatpush3.bf16.msra.mxu0 %v6995_v12 }
0x106d   : > { %6390 = vmatprep.subr.bf16.mxu0 %v7718_v3 }
0x1070   : > { %6391 = vmatpush3.bf16.msra.mxu0 %v6996_v21 }
0x1071   : > { %6392 = vmatprep.subr.bf16.mxu0 %v7718_v3 }
0x1074   : > { %6393 = vmatpush3.bf16.msra.mxu0 %v6997_v6 }
0x1075   : > { %6394 = vmatprep.subr.bf16.mxu0 %v7718_v3 }
0x1078   : > { %6395 = vmatpush3.bf16.msra.mxu0 %v6998_v0 }
0x1079   : > { %6396 = vmatprep.subr.bf16.mxu0 %v7718_v3 }
0x107c   : > { %6397 = vmatpush3.bf16.msra.mxu0 %v6999_v32 }
0x1132   : > { %v5513_v54 = vpop.f32.mrb[60].mxu0  ;;  %v5556_v11 = vpop.f32.mrb[60].mxu1 }
0x1133   : > { %v6494_v25 = vadd.f32 %v5513_v54, %v8712_v34  ;;  %v5515_v61 = vpop.f32.mrb[61].mxu0  ;;  %v5558_v10 = vpop.f32.mrb[61].mxu1  ;;  %v6526_v23 = vadd.f32 %v5556_v11, %v8728_v31 }
0x1134   : > { %v6495_v37 = vadd.f32 %v5515_v61, %v8716_v55  ;;  %v5517_v9 = vpop.f32.mrb[62].mxu0  ;;  %v5560_v18 = vpop.f32.mrb[62].mxu1  ;;  %v6527_v26 = vadd.f32 %v5558_v10, %v8723_v4 }
0x1135   : > { %v6312_v27 = vmul.f32 -1.442695, %v6494_v25  ;;  %v6496_v29 = vadd.f32 %v5517_v9, %v8712_v34  ;;  %v5519_v30 = vpop.f32.mrb[63].mxu0  ;;  %v5562_v35 = vpop.f32.mrb[63].mxu1  ;;  %v6528_v34 = vadd.f32 %v5560_v18, %v8728_v31 }
0x1136   : > { %v6314_v33 = vmul.f32 -1.442695, %v6495_v37  ;;  %v6497_v8 = vadd.f32 %v5519_v30, %v8716_v55  ;;  %v6316_v28 = vmul.f32 -1.442695, %v6527_v26  ;;  %v6529_v13 = vadd.f32 %v5562_v35, %v8723_v4 }
0x1137   : > { %7480 = vpow2.f32 %v6312_v27  ;;  %v6313_v7 = vmul.f32 -1.442695, %v6496_v29 }
0x1138   : > { %7482 = vpow2.f32 %v6314_v33  ;;  %v6315_v20 = vmul.f32 -1.442695, %v6497_v8  ;;  %v6317_v55 = vmul.f32 -1.442695, %v6529_v13 }
0x1139   : > { %7484 = vpow2.f32 %v6313_v7 }
0x113a   : > { %7486 = vpow2.f32 %v6315_v20 }
0x113b   : > { %7488 = vtanh.f32 %v6526_v23 }
0x113c   : > { %7490 = vpow2.f32 %v6316_v28 }
0x113d   : > { %7492 = vtanh.f32 %v6528_v34 }
0x1141   : > { %v7481_v19 = vpop.eup %7480 }
0x1142   : > { %v7483_v39 = vpop.eup %7482  ;;  %v5579_v52 = vadd.f32 1.0, %v7481_v19 }
0x1143   : > { %v5591_v40 = vadd.f32 1.0, %v7483_v39  ;;  %v7485_v41 = vpop.eup %7484 }
0x1144   : > { %7494 = vrcp.f32 %v5579_v52  ;;  %v5580_v42 = vadd.f32 1.0, %v7485_v41  ;;  %v7487_v44 = vpop.eup %7486 }
0x1145   : > { %7496 = vrcp.f32 %v5591_v40  ;;  %v5592_v45 = vadd.f32 1.0, %v7487_v44  ;;  %v7489_v4 = vpop.eup %7488 }
0x1146   : > { %7498 = vpow2.f32 %v6317_v55  ;;  %v7491_v46 = vpop.eup %7490 }
0x1147   : > { %7500 = vrcp.f32 %v5580_v42  ;;  %v7493_v31 = vpop.eup %7492  ;;  %v5605_v15 = vadd.f32 1.0, %v7491_v46 }
0x1148   : > { %7502 = vrcp.f32 %v5592_v45 }
0x1149   : > { %7504 = vrcp.f32 %v5605_v15 }
0x114e   : > { %v7495_v17 = vpop.eup %7494 }
0x114f   : > { %v7497_v14 = vpop.eup %7496  ;;  %v5613_v49 = vmul.f32 %v7495_v17, %v7489_v4 }
0x1150   : > { %v7499_v51 = vpop.eup %7498  ;;  %v5611_v50 = vmul.f32 %v7497_v14, %v9095_v57 }
0x1151   : > { %v7501_v48 = vpop.eup %7500  ;;  %v5606_v59 = vadd.f32 1.0, %v7499_v51 }
0x1152   : > { %v5615_v43 = vadd.f32 %v5613_v49, %v5611_v50  ;;  %v5614_v58 = vmul.f32 %v7501_v48, %v7493_v31  ;;  %v7503_v53 = vpop.eup %7502 }
0x1153   : > { %v5612_v60 = vmul.f32 %v7503_v53, %v9099_v63  ;;  %v7505_v1 = vpop.eup %7504 }
0x1154   : > { %7506 = vtanh.f32 %v5615_v43 }
0x1155   : > { %v5616_v62 = vadd.f32 %v5614_v58, %v5612_v60  ;;  %7508 = vrcp.f32 %v5606_v59 }
0x1157   : > { %7510 = vtanh.f32 %v5616_v62 }
0x115e   : > { %v7507_v47 = vpop.eup %7506 }
0x115f   : > { %v5619_v22 = vmul.f32 %v7507_v47, %v7505_v1  ;;  %v7509_v2 = vpop.eup %7508 }
0x1161   : > { %v7511_v5 = vpop.eup %7510 }
0x1162   : > { %v5620_v57 = vmul.f32 %v7511_v5, %v7509_v2 }
0x1164   : > { %v5621_v24 = vpack.c.bf16 %v5620_v57, %v5619_v22 }
0x1166   : > { %6399 = vmatmul.mubr.bf16.vlgmr.msra.gmra.mrb[64].mxu0 %v5621_v24 }
0x1239   : > { %v5727_v63 = vpop.f32.mrb[64].mxu0 }
0x123a   : > { %v5728_v16 = vadd.f32 %v6318_v38, %v5727_v63  ;;  %v6400_v3 = vpop.f32.mrb[65].mxu0 }
0x123b   : > { %v5730_v36 = vpop.f32.mrb[66].mxu0 }
0x123c   : > { %5734 = vst [vmem:[%s338_s16] sm:$0xff] %v5728_v16  ;;  %v5731_v56 = vadd.f32 %v6318_v38, %v5730_v36  ;;  %v6401_v12 = vpop.f32.mrb[67].mxu0 }
0x123e   : > { %5735 = vst [vmem:[%s338_s16 + $0x8] sm:$0xff] %v5731_v56 }
0x123f   : > { %7641 = shalt.err (!%p7638_p3)
}
0x1240   : > { %s7642_s15 = scalar_lea.hbm %s9122_s30, 256  ;;  %s7646_s11 = scalar_lea.hbm %s9172_s6, 512 }
0x1241   : > { %p7643_p6 = scmp.ne.s32.totalorder %s9122_s30, %s7642_s15  ;;  %p7647_p12 = scmp.lt.u32.totalorder %s9122_s30, %s9172_s6 }
0x1242   : > { %p7648_p13 = scmp.lt.u32.totalorder %s7646_s11, %s7642_s15  ;;  %p7650_p8 = scmp.lt.u32.totalorder %s7642_s15, %s9122_s30 }
0x1243   : > { %p7644_p5 = pnand %p7643_p6, %p9206_p7 }
0x1244   : > { %p7649_p0 = por %p7648_p13, %p7647_p12 }
0x1245   : > { %p7645_p11 = pneg %p7644_p5 }
0x1246   : > { %p7651_p9 = por %p7650_p8, %p7649_p0 }
0x1248   : > { %p7652_p10 = pnand %p7651_p9, %p7645_p11 }
0x124a   : > { %7655 = shalt.err (!%p7652_p10)
}
0x124b   : > { %s7721_s12 = smov 128   ;;  %s7722_s13 = smov 8  }
0x124c   : > { %6679 = dma.vmem_to_hbm [thread:$0]  (%p9206_p7), %s9117_s17, 256, %s9122_s30, %s5737_s14, %s7721_s12, %s7721_s12, %s7722_s13  }
0x124d PF: > { %s9207_s16 = sld [smem:[#allocation22_spill]]  ;;  %s5765_s18 = sand.u32 1, %s7690_s21  }
0x124e   : > { %s5766_s27 = scalar_lea.sflag [#allocation6], %s5765_s18 }
0x1253   : > { %p9208_p1 = scmp.ne.s32.totalorder %s9207_s16, 0 }
0x1255   : > { %p6692_p2 = pnand %p5857_p4, %p9208_p1 }
0x1257   : > { %7685 = dma.done.wait (!%p6692_p2), %s5766_s27, 256  }
0x1258   : > { %7687 = vsyncadd (!%p6692_p2), %s5766_s27, 4294967040  ;;  %s9209_s24 = sld [smem:[#allocation20_spill]]  ;;  %s9210_s1 = sld [smem:[#allocation21_spill]] }
0x1259   : > { %s9211_s21 = smov %s7694_s22  ;;  %s9212_s22 = smov %s7698_s23 }
0x125e   : > { %p21_p3 = scmp.ge.s32.totalorder %s9209_s24, 4   ;;  %s9213_s23 = smov %s9210_s1 }
0x1260   :  { %23 = sbr.rel (!%p21_p3) target bundleno = 9 (0x9), region = 123 }
0x1267   :  { %5771 = vsyncpa [#allocation5], 1 }
0x1268   :  { %5773 = vsyncpa [#allocation5 + $0x1], 1 }
0x1269   :  { %5774 = vsyncpa [#allocation8], 1 }
0x126a   :  { %5775 = vsyncpa [#allocation11], 1 }
0x126b   :  { %5776 = vsyncpa [#allocation6], 1 }
0x126c   :  { %5778 = vsyncpa [#allocation6 + $0x1], 1 }

</bundles_post_ra>
